<compile_context>
chip_gen: v5e
topology: v5e:2x2
jax: 0.10.0
libtpu: 0.0.40
codegen_flags: <defaults>
</compile_context>

<pallas_src>
import functools

import jax
import jax.numpy as jnp
import numpy as np
from jax import lax
from jax.experimental import pallas as pl
from jax.experimental.pallas import tpu as pltpu

_BIG = 16384.0                    # class separation along the synthetic z coord
_SAME_PEN = 4.0 * _BIG * _BIG     # = 2**30, penalty for same-class pairs
_PAD_Z = 1048576.0                # z coord of padded j pixels (never wins a min)
_ACC_INIT = _SAME_PEN             # accumulator init value


def _static_pow(x, alpha):
    """x ** alpha for a static Python alpha, avoiding float-exponent pow when possible."""
    ai = int(round(alpha))
    if abs(alpha - ai) < 1e-12 and 1 <= ai <= 8:
        if ai == 2:
            return x * x                       # alpha=2 fast path: single VPU mul
        return x ** ai                         # lax.integer_pow -> repeated multiplies
    return jnp.power(x, jnp.float32(alpha))    # float exponent: exp/log lowering


def _hausdorff_kernel(anyp_ref, anyt_ref,          # scalar prefetch (SMEM): (B,) int32
                      ifeat_ref, jfeat_ref,        # VMEM input blocks
                      out_ref,                     # per-(b, i-tile) partial sum
                      acc_p, acc_t,                # persistent scratch accumulators
                      *, alpha, tile, nchunks):
    b = pl.program_id(0)
    jb = pl.program_id(2)
    shape2 = (tile, tile)

    # ---- hoisted per-grid-step prep: i-side features broadcast to full vregs ----
    # ifeat columns: [row, col, z_pred, z_tgt, err, valid, 0, 0]
    ri_b = jnp.broadcast_to(ifeat_ref[0, :, 0:1], shape2)
    ci_b = jnp.broadcast_to(ifeat_ref[0, :, 1:2], shape2)
    zp_b = jnp.broadcast_to(ifeat_ref[0, :, 2:3], shape2)
    zt_b = jnp.broadcast_to(ifeat_ref[0, :, 3:4], shape2)

    @pl.when(jb == 0)
    def _init():
        acc_p[...] = jnp.full(shape2, _ACC_INIT, jnp.float32)
        acc_t[...] = jnp.full(shape2, _ACC_INIT, jnp.float32)

    # ---- inner loop over 256-lane chunks of this j super-block ----
    def chunk_body(c, carry):
        j0 = pl.multiple_of(c * tile, tile)
        # jfeat rows: [row, col, z'_pred, z'_tgt, ...]
        rj = jfeat_ref[0, 0:1, pl.ds(j0, tile)]          # (1, tile)
        cj = jfeat_ref[0, 1:2, pl.ds(j0, tile)]
        zpj = jfeat_ref[0, 2:3, pl.ds(j0, tile)]
        ztj = jfeat_ref[0, 3:4, pl.ds(j0, tile)]

        dr = ri_b - rj
        dc = ci_b - cj
        sq = dr * dr + dc * dc                           # shared between pred/target

        dzp = zp_b - zpj                                 # 0 exactly for opposite class
        dzt = zt_b - ztj
        acc_p[...] = jnp.minimum(acc_p[...], sq + dzp * dzp)
        acc_t[...] = jnp.minimum(acc_t[...], sq + dzt * dzt)
        return carry

    lax.fori_loop(0, nchunks, chunk_body, 0)

    # ---- epilogue: once per (batch, i-tile), on the last j super-block ----
    @pl.when(jb == pl.num_programs(2) - 1)
    def _finalize():
        d_p = jnp.sqrt(jnp.min(acc_p[...], axis=1, keepdims=True))   # (tile, 1)
        d_t = jnp.sqrt(jnp.min(acc_t[...], axis=1, keepdims=True))

        any_p = jnp.where(anyp_ref[b] > 0, 1.0, 0.0)     # scalar gates from SMEM
        any_t = jnp.where(anyt_ref[b] > 0, 1.0, 0.0)
        valid_i = ifeat_ref[0, :, 5:6]                   # (tile, 1) 1/0

        # TODO(synk): scipy's edt of an all-foreground image (no background pixel)
        # is not reproduced; only the no-foreground case is gated (matches module
        # semantics for every image that contains at least one background pixel).
        field_p = d_p * any_p * valid_i
        field_t = d_t * any_t * valid_i
        dist = _static_pow(field_p, alpha) + _static_pow(field_t, alpha)

        err = ifeat_ref[0, :, 4:5]                       # (tile, 1): (pred - target)^2
        ones_row = jnp.ones((1, tile), jnp.float32)
        psum = jnp.dot(ones_row, err * dist,
                       preferred_element_type=jnp.float32)           # (1, 1)
        out_ref[...] = jnp.broadcast_to(psum, out_ref.shape)


def hausdorff_dt_loss(pred, target, alpha=2.0, tile=256, max_chunks_per_block=32):
    """Pallas-TPU forward pass of HausdorffDTLoss (2D, single binary channel)."""
    assert pred.ndim == 4, "Only the 2D (b, 1, x, y) case is implemented"
    # TODO(synk): the 3D (b, 1, x, y, z) variant of the module is not implemented.
    assert pred.shape == target.shape
    B, C, H, W = pred.shape
    assert C == 1, "Uses one binary channel"
    assert tile > 0 and tile % 128 == 0
    assert float(H * H + W * W) < 0.25 * _SAME_PEN, "image too large for class penalty"

    n = H * W
    nchunks_total = -(-n // tile)
    nchunks = int(min(max_chunks_per_block, nchunks_total))
    jblk = tile * nchunks                       # lanes per j super-block (grid axis 2)
    n_pad = (-(-n // jblk)) * jblk              # multiple of jblk and of tile
    ni = n_pad // tile
    nj = n_pad // jblk

    # ---- O(n) feature precomputation in the wrapper (plain XLA) ----
    p = pred.reshape(B, n).astype(jnp.float32)
    t = target.reshape(B, n).astype(jnp.float32)
    if n_pad > n:
        p = jnp.pad(p, ((0, 0), (0, n_pad - n)))
        t = jnp.pad(t, ((0, 0), (0, n_pad - n)))

    idx = jnp.arange(n_pad, dtype=jnp.int32)
    r = (idx // W).astype(jnp.float32)
    c = (idx % W).astype(jnp.float32)
    valid = (idx < n).astype(jnp.float32)

    fg_p = p > 0.5
    fg_t = t > 0.5
    sp = jnp.where(fg_p, _BIG, -_BIG)           # i-side z coordinate (pred)
    st = jnp.where(fg_t, _BIG, -_BIG)           # i-side z coordinate (target)

    rb = jnp.broadcast_to(r[None, :], (B, n_pad))
    cb = jnp.broadcast_to(c[None, :], (B, n_pad))
    vb = jnp.broadcast_to(valid[None, :], (B, n_pad))
    zeros = jnp.zeros((B, n_pad), jnp.float32)
    err = (p - t) ** 2

    # i-side features (pixels along sublanes): (B, n_pad, 8)
    ifeat = jnp.stack([rb, cb, sp, st, err, vb, zeros, zeros], axis=-1)
    # j-side features (pixels along lanes): (B, 8, n_pad); z' = -z for valid, PAD_Z else
    zjp = jnp.where(vb > 0, -sp, _PAD_Z)
    zjt = jnp.where(vb > 0, -st, _PAD_Z)
    jfeat = jnp.stack([rb, cb, zjp, zjt, zeros, zeros, zeros, zeros], axis=1)

    any_p = jnp.any(fg_p, axis=1).astype(jnp.int32)      # (B,) scalar-prefetch gates
    any_t = jnp.any(fg_t, axis=1).astype(jnp.int32)

    kernel = functools.partial(_hausdorff_kernel, alpha=float(alpha),
                               tile=tile, nchunks=nchunks)

    # Right-sized VMEM budget: accumulators + double-buffered input blocks +
    # spilled i-side broadcasts + elementwise temporaries, plus headroom.
    acc_bytes = 2 * tile * tile * 4
    in_bytes = 2 * (8 * jblk * 4 + tile * 8 * 4)
    temp_bytes = 10 * tile * tile * 4
    vmem_limit = int(min(max(acc_bytes + in_bytes + temp_bytes + (6 << 20),
                             16 << 20), 96 << 20))

    partials = pl.pallas_call(
        kernel,
        out_shape=jax.ShapeDtypeStruct((B, ni, 8, 128), jnp.float32),
        grid_spec=pltpu.PrefetchScalarGridSpec(
            num_scalar_prefetch=2,
            grid=(B, ni, nj),
            in_specs=[
                pl.BlockSpec((1, tile, 8), lambda b, it, jb, ap, at: (b, it, 0)),
                pl.BlockSpec((1, 8, jblk), lambda b, it, jb, ap, at: (b, 0, jb)),
            ],
            out_specs=pl.BlockSpec((1, 1, 8, 128),
                                   lambda b, it, jb, ap, at: (b, it, 0, 0)),
            scratch_shapes=[pltpu.VMEM((tile, tile), jnp.float32),
                            pltpu.VMEM((tile, tile), jnp.float32)],
        ),
        compiler_params=pltpu.CompilerParams(
            dimension_semantics=("parallel", "parallel", "arbitrary"),
            vmem_limit_bytes=vmem_limit,
        ),
    )(any_p, any_t, ifeat, jfeat)

    total = jnp.sum(partials[:, :, 0, 0])
    return total / (B * C * H * W)


def hausdorff_dt_loss_ref(pred, target, alpha=2.0):
    """Pure-JAX reference with identical math (brute-force exact EDT)."""
    B, C, H, W = pred.shape
    N = H * W
    ys, xs = jnp.meshgrid(jnp.arange(H, dtype=jnp.float32),
                          jnp.arange(W, dtype=jnp.float32), indexing="ij")
    coords = jnp.stack([ys.reshape(-1), xs.reshape(-1)], axis=-1)
    sqd = jnp.sum((coords[:, None, :] - coords[None, :, :]) ** 2, axis=-1)
    big = 1e9

    def field(img_flat):                               # (N,)
        fg = (img_flat > 0.5).astype(jnp.float32)
        bg = 1.0 - fg
        any_fg = jnp.max(fg)
        d_to_bg = jnp.sqrt(jnp.min(sqd + big * fg[None, :], axis=1))
        d_to_fg = jnp.sqrt(jnp.min(sqd + big * bg[None, :], axis=1))
        return (d_to_bg + d_to_fg) * any_fg

    pf = pred.reshape(B, N).astype(jnp.float32)
    tf = target.reshape(B, N).astype(jnp.float32)
    p_dt = jax.vmap(field)(pf)
    t_dt = jax.vmap(field)(tf)
    err = (pf - tf) ** 2
    dist = p_dt ** alpha + t_dt ** alpha
    return jnp.mean(err * dist)


if __name__ == "__main__":
    key = jax.random.PRNGKey(0)

    # case 1: 16x16 (single i-tile, single j-block)
    k1, k2 = jax.random.split(key)
    pred = jax.random.uniform(k1, (2, 1, 16, 16), dtype=jnp.float32)
    target = (jax.random.uniform(k2, (2, 1, 16, 16)) > 0.5).astype(jnp.float32)
    loss = jax.block_until_ready(hausdorff_dt_loss(pred, target, alpha=2.0))
    ref = jax.block_until_ready(hausdorff_dt_loss_ref(pred, target, alpha=2.0))
    np.testing.assert_allclose(np.asarray(loss), np.asarray(ref), rtol=1e-3, atol=1e-3)

    # case 2: 24x24 with one all-background target element
    # (exercises padding, multiple i-tiles and the prefetched any-foreground gate)
    k3, k4 = jax.random.split(k2)
    pred2 = jax.random.uniform(k3, (2, 1, 24, 24), dtype=jnp.float32)
    target2 = (jax.random.uniform(k4, (2, 1, 24, 24)) > 0.5).astype(jnp.float32)
    target2 = target2.at[0].set(0.0)
    loss2 = jax.block_until_ready(hausdorff_dt_loss(pred2, target2, alpha=2.0))
    ref2 = jax.block_until_ready(hausdorff_dt_loss_ref(pred2, target2, alpha=2.0))
    np.testing.assert_allclose(np.asarray(loss2), np.asarray(ref2), rtol=1e-3, atol=1e-3)

    # case 3: same data, one chunk per j super-block -> nj > 1 (exercises the
    # accumulate-across-the-arbitrary-j-grid-axis path)
    loss3 = jax.block_until_ready(
        hausdorff_dt_loss(pred2, target2, alpha=2.0, max_chunks_per_block=1))
    np.testing.assert_allclose(np.asarray(loss3), np.asarray(ref2), rtol=1e-3, atol=1e-3)

    print("KERNEL_OK")
</pallas_src>

<mosaic_0001>
module attributes {stable_mosaic.version = 11 : i64} {
  func.func @_hausdorff_kernel(%arg0: i32, %arg1: i32, %arg2: i32, %arg3: memref<2xi32, #tpu.memory_space<smem>>, %arg4: memref<2xi32, #tpu.memory_space<smem>>, %arg5: memref<1x256x8xf32, #tpu.memory_space<vmem>>, %arg6: memref<1x8x256xf32, #tpu.memory_space<vmem>>, %arg7: memref<1x1x8x128xf32, #tpu.memory_space<vmem>>, %arg8: memref<256x256xf32, #tpu.memory_space<vmem>>, %arg9: memref<256x256xf32, #tpu.memory_space<vmem>>) attributes {dimension_semantics = [#tpu.dimension_semantics<parallel>, #tpu.dimension_semantics<parallel>, #tpu.dimension_semantics<arbitrary>], iteration_bounds = array<i64: 2, 1, 1>, scalar_prefetch = 2 : i64, scratch_operands = 2 : i64, tpu.core_type = #tpu.core_type<tc>, window_params = [{transform_indices = @transform_0, window_bounds = array<i64: 1, 256, 8>}, {transform_indices = @transform_1, window_bounds = array<i64: 1, 8, 256>}, {transform_indices = @transform_2, window_bounds = array<i64: 1, 1, 8, 128>}]} {
    %c0 = arith.constant 0 : index
    %c0_0 = arith.constant 0 : index
    %c0_1 = arith.constant 0 : index
    %0 = vector.load %arg5[%c0, %c0_0, %c0_1] : memref<1x256x8xf32, #tpu.memory_space<vmem>>, vector<1x256x1xf32>
    %1 = vector.shape_cast %0 : vector<1x256x1xf32> to vector<256x1xf32>
    %2 = vector.shape_cast %1 : vector<256x1xf32> to vector<256x1xf32>
    %3 = vector.broadcast %2 : vector<256x1xf32> to vector<256x256xf32>
    %c0_2 = arith.constant 0 : index
    %c0_3 = arith.constant 0 : index
    %c1 = arith.constant 1 : index
    %4 = vector.load %arg5[%c0_2, %c0_3, %c1] : memref<1x256x8xf32, #tpu.memory_space<vmem>>, vector<1x256x1xf32>
    %5 = vector.shape_cast %4 : vector<1x256x1xf32> to vector<256x1xf32>
    %6 = vector.shape_cast %5 : vector<256x1xf32> to vector<256x1xf32>
    %7 = vector.broadcast %6 : vector<256x1xf32> to vector<256x256xf32>
    %c0_4 = arith.constant 0 : index
    %c0_5 = arith.constant 0 : index
    %c2 = arith.constant 2 : index
    %8 = vector.load %arg5[%c0_4, %c0_5, %c2] : memref<1x256x8xf32, #tpu.memory_space<vmem>>, vector<1x256x1xf32>
    %9 = vector.shape_cast %8 : vector<1x256x1xf32> to vector<256x1xf32>
    %10 = vector.shape_cast %9 : vector<256x1xf32> to vector<256x1xf32>
    %11 = vector.broadcast %10 : vector<256x1xf32> to vector<256x256xf32>
    %c0_6 = arith.constant 0 : index
    %c0_7 = arith.constant 0 : index
    %c3 = arith.constant 3 : index
    %12 = vector.load %arg5[%c0_6, %c0_7, %c3] : memref<1x256x8xf32, #tpu.memory_space<vmem>>, vector<1x256x1xf32>
    %13 = vector.shape_cast %12 : vector<1x256x1xf32> to vector<256x1xf32>
    %14 = vector.shape_cast %13 : vector<256x1xf32> to vector<256x1xf32>
    %15 = vector.broadcast %14 : vector<256x1xf32> to vector<256x256xf32>
    %c0_i32 = arith.constant 0 : i32
    %16 = arith.cmpi eq, %arg2, %c0_i32 : i32
    %17 = arith.extui %16 : i1 to i32
    %c0_i32_8 = arith.constant 0 : i32
    %18 = arith.cmpi ne, %17, %c0_i32_8 : i32
    scf.if %18 {
      %cst = arith.constant 1.07374182E+9 : f32
      %57 = vector.broadcast %cst : f32 to vector<256x256xf32>
      %c0_28 = arith.constant 0 : index
      %c0_29 = arith.constant 0 : index
      %58 = vector.load %arg8[%c0_28, %c0_29] : memref<256x256xf32, #tpu.memory_space<vmem>>, vector<256x256xf32>
      tpu.vector_store %arg8[%c0_28, %c0_29], %57 {strides = array<i32>} : memref<256x256xf32, #tpu.memory_space<vmem>>, vector<256x256xf32>,
      %cst_30 = arith.constant 1.07374182E+9 : f32
      %59 = vector.broadcast %cst_30 : f32 to vector<256x256xf32>
      %c0_31 = arith.constant 0 : index
      %c0_32 = arith.constant 0 : index
      %60 = vector.load %arg9[%c0_31, %c0_32] : memref<256x256xf32, #tpu.memory_space<vmem>>, vector<256x256xf32>
      tpu.vector_store %arg9[%c0_31, %c0_32], %59 {strides = array<i32>} : memref<256x256xf32, #tpu.memory_space<vmem>>, vector<256x256xf32>,
    } else {
    }
    %c0_i32_9 = arith.constant 0 : i32
    %c256_i32 = arith.constant 256 : i32
    %19 = arith.muli %c0_i32_9, %c256_i32 : i32
    %20 = tpu.assume_multiple %19, 256 : i32
    %c0_10 = arith.constant 0 : index
    %c0_11 = arith.constant 0 : index
    %21 = arith.index_cast %20 : i32 to index
    %22 = vector.load %arg6[%c0_10, %c0_11, %21] : memref<1x8x256xf32, #tpu.memory_space<vmem>>, vector<1x1x256xf32>
    %23 = vector.shape_cast %22 : vector<1x1x256xf32> to vector<1x256xf32>
    %c0_12 = arith.constant 0 : index
    %c1_13 = arith.constant 1 : index
    %24 = arith.index_cast %20 : i32 to index
    %25 = vector.load %arg6[%c0_12, %c1_13, %24] : memref<1x8x256xf32, #tpu.memory_space<vmem>>, vector<1x1x256xf32>
    %26 = vector.shape_cast %25 : vector<1x1x256xf32> to vector<1x256xf32>
    %c0_14 = arith.constant 0 : index
    %c2_15 = arith.constant 2 : index
    %27 = arith.index_cast %20 : i32 to index
    %28 = vector.load %arg6[%c0_14, %c2_15, %27] : memref<1x8x256xf32, #tpu.memory_space<vmem>>, vector<1x1x256xf32>
    %29 = vector.shape_cast %28 : vector<1x1x256xf32> to vector<1x256xf32>
    %c0_16 = arith.constant 0 : index
    %c3_17 = arith.constant 3 : index
    %30 = arith.index_cast %20 : i32 to index
    %31 = vector.load %arg6[%c0_16, %c3_17, %30] : memref<1x8x256xf32, #tpu.memory_space<vmem>>, vector<1x1x256xf32>
    %32 = vector.shape_cast %31 : vector<1x1x256xf32> to vector<1x256xf32>
    %33 = vector.broadcast %23 : vector<1x256xf32> to vector<256x256xf32>
    %34 = arith.subf %3, %33 : vector<256x256xf32>
    %35 = vector.broadcast %26 : vector<1x256xf32> to vector<256x256xf32>
    %36 = arith.subf %7, %35 : vector<256x256xf32>
    %37 = arith.mulf %34, %34 : vector<256x256xf32>
    %38 = arith.mulf %36, %36 : vector<256x256xf32>
    %39 = arith.addf %37, %38 : vector<256x256xf32>
    %40 = vector.broadcast %29 : vector<1x256xf32> to vector<256x256xf32>
    %41 = arith.subf %11, %40 : vector<256x256xf32>
    %42 = vector.broadcast %32 : vector<1x256xf32> to vector<256x256xf32>
    %43 = arith.subf %15, %42 : vector<256x256xf32>
    %c0_18 = arith.constant 0 : index
    %c0_19 = arith.constant 0 : index
    %44 = vector.load %arg8[%c0_18, %c0_19] : memref<256x256xf32, #tpu.memory_space<vmem>>, vector<256x256xf32>
    %45 = arith.mulf %41, %41 : vector<256x256xf32>
    %46 = arith.addf %39, %45 : vector<256x256xf32>
    %47 = arith.minimumf %44, %46 : vector<256x256xf32>
    %c0_20 = arith.constant 0 : index
    %c0_21 = arith.constant 0 : index
    %48 = vector.load %arg8[%c0_20, %c0_21] : memref<256x256xf32, #tpu.memory_space<vmem>>, vector<256x256xf32>
    tpu.vector_store %arg8[%c0_20, %c0_21], %47 {strides = array<i32>} : memref<256x256xf32, #tpu.memory_space<vmem>>, vector<256x256xf32>,
    %c0_22 = arith.constant 0 : index
    %c0_23 = arith.constant 0 : index
    %49 = vector.load %arg9[%c0_22, %c0_23] : memref<256x256xf32, #tpu.memory_space<vmem>>, vector<256x256xf32>
    %50 = arith.mulf %43, %43 : vector<256x256xf32>
    %51 = arith.addf %39, %50 : vector<256x256xf32>
    %52 = arith.minimumf %49, %51 : vector<256x256xf32>
    %c0_24 = arith.constant 0 : index
    %c0_25 = arith.constant 0 : index
    %53 = vector.load %arg9[%c0_24, %c0_25] : memref<256x256xf32, #tpu.memory_space<vmem>>, vector<256x256xf32>
    tpu.vector_store %arg9[%c0_24, %c0_25], %52 {strides = array<i32>} : memref<256x256xf32, #tpu.memory_space<vmem>>, vector<256x256xf32>,
    %c1_i32 = arith.constant 1 : i32
    %c0_i32_26 = arith.constant 0 : i32
    %54 = arith.cmpi eq, %arg2, %c0_i32_26 : i32
    %55 = arith.extui %54 : i1 to i32
    %c0_i32_27 = arith.constant 0 : i32
    %56 = arith.cmpi ne, %55, %c0_i32_27 : i32
    scf.if %56 {
      %c0_28 = arith.constant 0 : index
      %c0_29 = arith.constant 0 : index
      %57 = vector.load %arg8[%c0_28, %c0_29] : memref<256x256xf32, #tpu.memory_space<vmem>>, vector<256x256xf32>
      %cst = arith.constant dense<0x7F800000> : vector<256xf32>
      %58 = vector.multi_reduction <minimumf>, %57, %cst [1] : vector<256x256xf32> to vector<256xf32>
      %59 = vector.shape_cast %58 : vector<256xf32> to vector<256x1xf32>
      %60 = math.sqrt %59 : vector<256x1xf32>
      %c0_30 = arith.constant 0 : index
      %c0_31 = arith.constant 0 : index
      %61 = vector.load %arg9[%c0_30, %c0_31] : memref<256x256xf32, #tpu.memory_space<vmem>>, vector<256x256xf32>
      %cst_32 = arith.constant dense<0x7F800000> : vector<256xf32>
      %62 = vector.multi_reduction <minimumf>, %61, %cst_32 [1] : vector<256x256xf32> to vector<256xf32>
      %63 = vector.shape_cast %62 : vector<256xf32> to vector<256x1xf32>
      %64 = math.sqrt %63 : vector<256x1xf32>
      %65 = arith.index_cast %arg0 : i32 to index
      %66 = memref.load %arg3[%65] : memref<2xi32, #tpu.memory_space<smem>>
      %c0_i32_33 = arith.constant 0 : i32
      %67 = arith.cmpi sgt, %66, %c0_i32_33 : i32
      %cst_34 = arith.constant 1.000000e+00 : f32
      %cst_35 = arith.constant 0.000000e+00 : f32
      %68 = arith.select %67, %cst_34, %cst_35 : f32
      %69 = arith.index_cast %arg0 : i32 to index
      %70 = memref.load %arg4[%69] : memref<2xi32, #tpu.memory_space<smem>>
      %c0_i32_36 = arith.constant 0 : i32
      %71 = arith.cmpi sgt, %70, %c0_i32_36 : i32
      %cst_37 = arith.constant 1.000000e+00 : f32
      %cst_38 = arith.constant 0.000000e+00 : f32
      %72 = arith.select %71, %cst_37, %cst_38 : f32
      %c0_39 = arith.constant 0 : index
      %c0_40 = arith.constant 0 : index
      %c5 = arith.constant 5 : index
      %73 = vector.load %arg5[%c0_39, %c0_40, %c5] : memref<1x256x8xf32, #tpu.memory_space<vmem>>, vector<1x256x1xf32>
      %74 = vector.shape_cast %73 : vector<1x256x1xf32> to vector<256x1xf32>
      %75 = vector.broadcast %68 : f32 to vector<256x1xf32>
      %76 = arith.mulf %60, %75 : vector<256x1xf32>
      %77 = arith.mulf %76, %74 : vector<256x1xf32>
      %78 = vector.broadcast %72 : f32 to vector<256x1xf32>
      %79 = arith.mulf %64, %78 : vector<256x1xf32>
      %80 = arith.mulf %79, %74 : vector<256x1xf32>
      %81 = arith.mulf %77, %77 : vector<256x1xf32>
      %82 = arith.mulf %80, %80 : vector<256x1xf32>
      %83 = arith.addf %81, %82 : vector<256x1xf32>
      %c0_41 = arith.constant 0 : index
      %c0_42 = arith.constant 0 : index
      %c4 = arith.constant 4 : index
      %84 = vector.load %arg5[%c0_41, %c0_42, %c4] : memref<1x256x8xf32, #tpu.memory_space<vmem>>, vector<1x256x1xf32>
      %85 = vector.shape_cast %84 : vector<1x256x1xf32> to vector<256x1xf32>
      %cst_43 = arith.constant 1.000000e+00 : f32
      %86 = vector.broadcast %cst_43 : f32 to vector<1x256xf32>
      %87 = arith.mulf %85, %83 : vector<256x1xf32>
      %cst_44 = arith.constant dense<0.000000e+00> : vector<1x1xf32>
      %88 = tpu.matmul %86, %87, %cst_44 {dimension_numbers = #tpu.dot_dimension_numbers<[1], [0], [0], [1], [0, 0, 1, 1], [], []>} : vector<1x256xf32>, vector<256x1xf32>, vector<1x1xf32> -> vector<1x1xf32>
      %89 = vector.shape_cast %88 : vector<1x1xf32> to vector<1x1x1x1xf32>
      %90 = vector.broadcast %89 : vector<1x1x1x1xf32> to vector<1x1x8x128xf32>
      %c0_45 = arith.constant 0 : index
      %c0_46 = arith.constant 0 : index
      %c0_47 = arith.constant 0 : index
      %c0_48 = arith.constant 0 : index
      %91 = vector.load %arg7[%c0_45, %c0_46, %c0_47, %c0_48] : memref<1x1x8x128xf32, #tpu.memory_space<vmem>>, vector<1x1x8x128xf32>
      tpu.vector_store %arg7[%c0_45, %c0_46, %c0_47, %c0_48], %90 {strides = array<i32>} : memref<1x1x8x128xf32, #tpu.memory_space<vmem>>, vector<1x1x8x128xf32>,
    } else {
    }
    return
  }
  func.func @transform_0(%arg0: i32, %arg1: i32, %arg2: i32, %arg3: memref<2xi32, #tpu.memory_space<smem>>, %arg4: memref<2xi32, #tpu.memory_space<smem>>) -> (i32, i32, i32) {
    %c0_i32 = arith.constant 0 : i32
    %c0_i32_0 = arith.constant 0 : i32
    return %arg0, %arg1, %c0_i32 : i32, i32, i32
  }
  func.func @transform_1(%arg0: i32, %arg1: i32, %arg2: i32, %arg3: memref<2xi32, #tpu.memory_space<smem>>, %arg4: memref<2xi32, #tpu.memory_space<smem>>) -> (i32, i32, i32) {
    %c0_i32 = arith.constant 0 : i32
    %c0_i32_0 = arith.constant 0 : i32
    return %arg0, %c0_i32, %arg2 : i32, i32, i32
  }
  func.func @transform_2(%arg0: i32, %arg1: i32, %arg2: i32, %arg3: memref<2xi32, #tpu.memory_space<smem>>, %arg4: memref<2xi32, #tpu.memory_space<smem>>) -> (i32, i32, i32, i32) {
    %c0_i32 = arith.constant 0 : i32
    %c0_i32_0 = arith.constant 0 : i32
    %c0_i32_1 = arith.constant 0 : i32
    return %arg0, %arg1, %c0_i32, %c0_i32_0 : i32, i32, i32, i32
  }
}

</mosaic_0001>

<bundles_post_ra>
// kernel: tpu_custom_call.1
= control target key start
LH: loop header
LB: loop body
LE: loop exit
PB: predicated region body
PF: predicated region fallthrough
CT: control target
= control target key end

     0   :  { %s4277_s21 = smov [#allocation5]   ;;  %s4278_s22 = smov [#allocation6]   ;;  %s7521_s0 = inlined_call_operand.vmem [shape: s32[2], index: 0, kind: input, shape index: {}]   ;;  %s7522_s2 = inlined_call_operand.vmem [shape: f32[2,256,8], index: 2, kind: input, shape index: {}]   ;;  %s7523_s3 = inlined_call_operand.vmem [shape: f32[2,8,256], index: 3, kind: input, shape index: {}]   ;;  %s7524_s4 = inlined_call_operand.hbm [shape: f32[2,1,8,128], index: 4, kind: output, shape index: {}]   ;;  %s7525_s1 = inlined_call_operand.vmem [shape: s32[2], index: 1, kind: input, shape index: {}]  }
   0x1   :  { %s10_s17 = sshll.u32 %s7521_s0, 4  ;;  %s15_s20 = sshll.u32 %s7525_s1, 4  ;;  %s11_s17 = int_to_ptr.vmem [resolvable:$true] %s10_s17  ;;  %s16_s20 = int_to_ptr.vmem [resolvable:$true] %s15_s20 }
   0x2   :  { %13 = dma.vmem_to_smem %s11_s17, 16, %s4277_s21, [#allocation4] }
   0x3   :  { %18 = dma.vmem_to_smem %s16_s20, 16, %s4278_s22, [#allocation4] }
   0x4   :  { %4247 = dma.done.wait [#allocation4], 32 }
   0x5   :  { %4248 = vsyncadd [#allocation4], 4294967264 }
   0x6   :  { %21 = sfence }
   0x7   :  { %22 = vsyncpa [#allocation8], 0 }
   0x8   :  { %24 = vsyncpa [#allocation8 + $0x1], 0  ;;  %s4317_s23 = smov 0   ;;  %s4319_s24 = smov 0  }
   0x9   :  { %s4321_s0 = smov 0   ;;  %s4323_s25 = smov 0  }
   0xa   :  { %s4325_s1 = smov 0   ;;  %s4327_s26 = smov 0  }
   0xb LB: > { %s3853_s27 = sadd.s32 4294967295, %s4275_s26   ;;  %s3854_s28 = sadd.s32 4294967294, %s4275_s26   ;;  %s4275_s26 = sphi %s4327_s26, %s30_s26   ;;  %s4271_s1 = sphi %s4325_s1, %s8065_s1   ;;  %s4267_s25 = sphi %s4323_s25, %s8064_s25   ;;  %s4263_s0 = sphi %s4321_s0, %s8063_s0   ;;  %s4259_s24 = sphi %s4319_s24, %s8062_s24   ;;  %s4255_s23 = sphi %s4317_s23, %s8061_s23  }
   0xc   : > { %s49_s29 = sadd.s32 1, %s4271_s1  ;;  %s114_s30 = sadd.s32 1, %s4263_s0 }
   0xd   : > { %p51_p0 = scmp.ge.s32.totalorder %s49_s29, 2  ;;  %p124_p1 = scmp.ne.s32.totalorder %s4263_s0, %s4259_s24 }
   0xe   : > { %p125_p2 = scmp.eq.s32.totalorder %s3853_s27, 1  ;;  %p130_p3 = scmp.ne.s32.totalorder %s4259_s24, %s4255_s23 }
   0xf   : > { %s8067_s29 = smov (%p51_p0, %s49_s29), 0  ;;  %p131_p5 = scmp.eq.s32.totalorder %s3854_s28, 1 }
  0x10   : > { %p4357_p4 = por %p125_p2, %p124_p1  ;;  %s109_s6 = ssub.s32 %s4271_s1, %s8067_s29 }
  0x11   : > { %p3857_p6 = scmp.ge.s32.totalorder %s4275_s26, 1  ;;  %p112_p7 = scmp.eq.s32.totalorder %s109_s6, 0 }
  0x12   : > { %p4364_p8 = por %p131_p5, %p130_p3  ;;  %p175_p9 = scmp.lt.s32.totalorder %s4275_s26, 3 }
  0x13   : > { %s4370_s8 = scalar_select %p112_p7, %s4263_s0, %s114_s30  }
  0x14   : > { %p176_p10 = pnand %p3857_p6, %p175_p9 }
  0x16   : > { %179 = sbr.rel (%p176_p10) target bundleno = 1261 (0x4ed), region = 28 }
  0x1b   : > { %p211_p11 = scmp.lt.s32.totalorder %s4267_s25, 1  ;;  %v4279_v0 = vmov 0   ;;  %v4280_v33 = vmov 1   ;;  %v4281_v58 = vmov 2   ;;  %s5937_s18 = sld [smem:[#allocation5 + %s4267_s25]] }
  0x1c   : > { %3940 = vset.pattern.permute.xlu2 %v4279_v0  ;;  %3939 = vset.pattern.permute.xlu1 %v4279_v0  ;;  %s6057_s20 = sld [smem:[#allocation6 + %s4267_s25]]  ;;  %s4283_s22 = smov 127  }
  0x1d   : > { %3938 = vset.pattern.permute.xlu0 %v4279_v0  ;;  %s4374_s9 = scalar_select %p211_p11, %s4267_s25, 1 }
  0x1e   : > { %s4284_s27 = smov 124   ;;  %s207_s28 = sand.u32 1, %s4259_s24  }
  0x1f   : > { %s3870_s10 = sshll.u32 %s4374_s9, 8  ;;  %s3871_s14 = sshll.u32 %s4374_s9, 4 }
  0x20   : > { %s4380_s13 = scalar_lea.vmem %s7522_s2, %s3870_s10  ;;  %s4746_s17 = scalar_lea.vmem %s7523_s3, %s3871_s14 }
  0x21   : > { %v4383_v1 = vld [vmem:[%s4380_s13 + $0x20] sm:$0xff]  ;;  %v4386_v2 = vld [vmem:[%s4380_s13 + $0x10] sm:$0xff]  ;;  %v4395_v4 = vld [vmem:[%s4380_s13 + $0x28] sm:$0xff]  ;;  %p3145_p12 = scmp.gt.s32.totalorder %s5937_s18, 0  ;;  %s3858_s30 = sshll.u32 %s207_s28, 3 }
  0x22   : > { %v4389_v3 = vld [vmem:[%s4380_s13] sm:$0xff]  ;;  %284 = vperm.xlu2 %3940, %v4383_v1   ;;  %274 = vperm.xlu1 %3939, %v4386_v2   ;;  %v4398_v5 = vld [vmem:[%s4380_s13 + $0x18] sm:$0xff]  ;;  %v4401_v6 = vld [vmem:[%s4380_s13 + $0x8] sm:$0xff]  ;;  %p3148_p13 = scmp.gt.s32.totalorder %s6057_s20, 0  ;;  %s3867_s6 = sshll.u32 %s4267_s25, 3 }
  0x23   : > { %264 = vperm.xlu0 %3938, %v4389_v3   ;;  %v4407_v7 = vld [vmem:[%s4380_s13 + $0x40] sm:$0xff]  ;;  %v4410_v8 = vld [vmem:[%s4380_s13 + $0x38] sm:$0xff]  ;;  %v4413_v9 = vld [vmem:[%s4380_s13 + $0x30] sm:$0xff]  ;;  %s3146_s19 = scalar_select %p3145_p12, 1.0, 0.0 }
  0x24   : > { %v4419_v10 = vld [vmem:[%s4380_s13 + $0x58] sm:$0xff]  ;;  %v4422_v11 = vld [vmem:[%s4380_s13 + $0x50] sm:$0xff]  ;;  %v4425_v12 = vld [vmem:[%s4380_s13 + $0x48] sm:$0xff]  ;;  %s3149_s21 = scalar_select %p3148_p13, 1.0, 0.0 }
  0x25   : > { %v4431_v13 = vld [vmem:[%s4380_s13 + $0x70] sm:$0xff]  ;;  %v4434_v14 = vld [vmem:[%s4380_s13 + $0x68] sm:$0xff]  ;;  %v4437_v15 = vld [vmem:[%s4380_s13 + $0x60] sm:$0xff]  ;;  %s3753_s11 = scalar_lea.hbm %s7524_s4, %s3867_s6  ;;  %s209_s12 = scalar_lea.vmem [#allocation7], %s3858_s30 }
  0x26   : > { %v4443_v16 = vld [vmem:[%s4380_s13 + $0x88] sm:$0xff]  ;;  %v4446_v17 = vld [vmem:[%s4380_s13 + $0x80] sm:$0xff]  ;;  %v4449_v18 = vld [vmem:[%s4380_s13 + $0x78] sm:$0xff]  ;;  %s3757_s14 = sshll.u32 %s3753_s11, 4  ;;  %s3742_s16 = scalar_lea.sflag [#allocation8], %s207_s28  ;;  %s3758_s14 = int_to_ptr.hbm [resolvable:$true] %s3757_s14 }
  0x27   : > { %v4455_v19 = vld [vmem:[%s4380_s13 + $0xa0] sm:$0xff]  ;;  %v4458_v20 = vld [vmem:[%s4380_s13 + $0x98] sm:$0xff]  ;;  %v4461_v21 = vld [vmem:[%s4380_s13 + $0x90] sm:$0xff]  ;;  %s4215_s20 = scalar_lea.hbm %s7524_s4, 16 }
  0x28   : > { %v4467_v22 = vld [vmem:[%s4380_s13 + $0xb8] sm:$0xff]  ;;  %v4470_v23 = vld [vmem:[%s4380_s13 + $0xb0] sm:$0xff]  ;;  %v4473_v24 = vld [vmem:[%s4380_s13 + $0xa8] sm:$0xff] }
  0x29   : > { %v4479_v25 = vld [vmem:[%s4380_s13 + $0xd0] sm:$0xff]  ;;  %v4482_v26 = vld [vmem:[%s4380_s13 + $0xc8] sm:$0xff]  ;;  %v4485_v27 = vld [vmem:[%s4380_s13 + $0xc0] sm:$0xff] }
  0x2a   : > { %289 = vperm.xlu2 %3940, %v4395_v4   ;;  %279 = vperm.xlu1 %3939, %v4398_v5   ;;  %v4491_v28 = vld [vmem:[%s4380_s13 + $0xe8] sm:$0xff]  ;;  %v4494_v29 = vld [vmem:[%s4380_s13 + $0xe0] sm:$0xff]  ;;  %v4497_v30 = vld [vmem:[%s4380_s13 + $0xd8] sm:$0xff] }
  0x2b   : > { %269 = vperm.xlu0 %3938, %v4401_v6   ;;  %v4503_v31 = vld [vmem:[%s4380_s13 + $0xf8] sm:$0xff]  ;;  %v4506_v32 = vld [vmem:[%s4380_s13 + $0xf0] sm:$0xff] }
  0x32   : > { %304 = vperm.xlu2 %3940, %v4407_v7   ;;  %299 = vperm.xlu1 %3939, %v4410_v8  }
  0x33   : > { %294 = vperm.xlu0 %3938, %v4413_v9  }
  0x3a   : > { %319 = vperm.xlu2 %3940, %v4419_v10   ;;  %314 = vperm.xlu1 %3939, %v4422_v11  }
  0x3b   : > { %309 = vperm.xlu0 %3938, %v4425_v12  }
  0x42   : > { %334 = vperm.xlu2 %3940, %v4431_v13   ;;  %329 = vperm.xlu1 %3939, %v4434_v14  }
  0x43   : > { %324 = vperm.xlu0 %3938, %v4437_v15  }
  0x4a   : > { %349 = vperm.xlu2 %3940, %v4443_v16   ;;  %344 = vperm.xlu1 %3939, %v4446_v17  }
  0x4b   : > { %339 = vperm.xlu0 %3938, %v4449_v18  }
  0x52   : > { %364 = vperm.xlu2 %3940, %v4455_v19   ;;  %359 = vperm.xlu1 %3939, %v4458_v20  }
  0x53   : > { %354 = vperm.xlu0 %3938, %v4461_v21  }
  0x5a   : > { %379 = vperm.xlu2 %3940, %v4467_v22   ;;  %374 = vperm.xlu1 %3939, %v4470_v23  }
  0x5b   : > { %369 = vperm.xlu0 %3938, %v4473_v24  }
  0x62   : > { %394 = vperm.xlu2 %3940, %v4479_v25   ;;  %389 = vperm.xlu1 %3939, %v4482_v26  }
  0x63   : > { %384 = vperm.xlu0 %3938, %v4485_v27  }
  0x6a   : > { %409 = vperm.xlu2 %3940, %v4491_v28   ;;  %404 = vperm.xlu1 %3939, %v4494_v29  }
  0x6b   : > { %399 = vperm.xlu0 %3938, %v4497_v30  }
  0x72   : > { %3941 = vset.pattern.permute.xlu2 %v4280_v33  ;;  %419 = vperm.xlu1 %3939, %v4503_v31  }
  0x73   : > { %414 = vperm.xlu0 %3938, %v4506_v32   ;;  %423 = vperm.xlu2 %3941, %v4389_v3  }
  0x7a   : > { %3943 = vset.pattern.permute.xlu1 %v4280_v33 }
  0x7b   : > { %3942 = vset.pattern.permute.xlu0 %v4280_v33  ;;  %431 = vperm.xlu1 %3943, %v4386_v2  }
  0x7c   : > { %435 = vperm.xlu2 %3941, %v4398_v5   ;;  %427 = vperm.xlu0 %3942, %v4401_v6   ;;  %v4514_v34 = vpop.permute.xlu2 %284 }
  0x83   : > { %439 = vperm.xlu1 %3943, %v4383_v1  }
  0x84   : > { %443 = vperm.xlu2 %3941, %v4395_v4   ;;  %447 = vperm.xlu0 %3942, %v4413_v9   ;;  %v4519_v35 = vpop.permute.xlu2 %289 }
  0x8b   : > { %451 = vperm.xlu1 %3943, %v4410_v8  }
  0x8c   : > { %455 = vperm.xlu2 %3941, %v4407_v7   ;;  %459 = vperm.xlu0 %3942, %v4425_v12   ;;  %v4524_v36 = vpop.permute.xlu2 %304 }
  0x93   : > { %463 = vperm.xlu1 %3943, %v4422_v11  }
  0x94   : > { %467 = vperm.xlu2 %3941, %v4419_v10   ;;  %471 = vperm.xlu0 %3942, %v4437_v15   ;;  %v4529_v37 = vpop.permute.xlu2 %319  ;;  %v4531_v38 = vpop.permute.xlu1 %274 }
  0x95   : > { %v4533_v39 = vpop.permute.xlu0 %264 }
  0x9b   : > { %475 = vperm.xlu1 %3943, %v4434_v14  }
  0x9c   : > { %479 = vperm.xlu2 %3941, %v4431_v13   ;;  %483 = vperm.xlu0 %3942, %v4449_v18   ;;  %v4538_v40 = vpop.permute.xlu2 %334  ;;  %v4540_v41 = vpop.permute.xlu1 %279 }
  0x9d   : > { %v4542_v42 = vpop.permute.xlu0 %269 }
  0xa3   : > { %487 = vperm.xlu1 %3943, %v4446_v17  }
  0xa4   : > { %491 = vperm.xlu2 %3941, %v4443_v16   ;;  %495 = vperm.xlu0 %3942, %v4461_v21   ;;  %v4547_v43 = vpop.permute.xlu2 %349  ;;  %v4549_v44 = vpop.permute.xlu1 %299 }
  0xa5   : > { %v4551_v45 = vpop.permute.xlu0 %294 }
  0xab   : > { %499 = vperm.xlu1 %3943, %v4458_v20  }
  0xac   : > { %503 = vperm.xlu2 %3941, %v4455_v19   ;;  %507 = vperm.xlu0 %3942, %v4473_v24   ;;  %v4556_v46 = vpop.permute.xlu2 %364  ;;  %v4558_v47 = vpop.permute.xlu1 %314 }
  0xad   : > { %v4560_v48 = vpop.permute.xlu0 %309 }
  0xb3   : > { %511 = vperm.xlu1 %3943, %v4470_v23  }
  0xb4   : > { %515 = vperm.xlu2 %3941, %v4467_v22   ;;  %519 = vperm.xlu0 %3942, %v4485_v27   ;;  %v4565_v49 = vpop.permute.xlu2 %379  ;;  %v4567_v50 = vpop.permute.xlu1 %329 }
  0xb5   : > { %v4569_v51 = vpop.permute.xlu0 %324 }
  0xbb   : > { %523 = vperm.xlu1 %3943, %v4482_v26  }
  0xbc   : > { %527 = vperm.xlu2 %3941, %v4479_v25   ;;  %531 = vperm.xlu0 %3942, %v4497_v30   ;;  %v4574_v52 = vpop.permute.xlu2 %394  ;;  %v4576_v53 = vpop.permute.xlu1 %344 }
  0xbd   : > { %v4578_v54 = vpop.permute.xlu0 %339 }
  0xc3   : > { %535 = vperm.xlu1 %3943, %v4494_v29  }
  0xc4   : > { %539 = vperm.xlu2 %3941, %v4491_v28   ;;  %543 = vperm.xlu0 %3942, %v4506_v32   ;;  %v4583_v55 = vpop.permute.xlu2 %409  ;;  %v4585_v56 = vpop.permute.xlu1 %359 }
  0xc5   : > { %v4587_v57 = vpop.permute.xlu0 %354 }
  0xcb   : > { %547 = vperm.xlu1 %3943, %v4503_v31  }
  0xcc   : > { %3944 = vset.pattern.permute.xlu2 %v4281_v58  ;;  %3945 = vset.pattern.permute.xlu0 %v4281_v58  ;;  %v4590_v59 = vpop.permute.xlu1 %374 }
  0xcd   : > { %7665 = vst [vmem:[#allocation11_spill] sm:$0xff] %v4590_v59  ;;  %551 = vperm.xlu2 %3944, %v4389_v3   ;;  %555 = vperm.xlu0 %3945, %v4401_v6   ;;  %v4594_v60 = vpop.permute.xlu0 %369  ;;  %v4596_v61 = vpop.permute.xlu2 %423 }
  0xce   : > { %7666 = vst [vmem:[#allocation12_spill] sm:$0xff] %v4594_v60 }
  0xd3   : > { %3946 = vset.pattern.permute.xlu1 %v4281_v58 }
  0xd4   : > { %559 = vperm.xlu1 %3946, %v4386_v2   ;;  %v4599_v62 = vpop.permute.xlu1 %389 }
  0xd5   : > { %7667 = vst [vmem:[#allocation13_spill] sm:$0xff] %v4599_v62  ;;  %563 = vperm.xlu2 %3944, %v4398_v5   ;;  %575 = vperm.xlu0 %3945, %v4413_v9   ;;  %v4603_v63 = vpop.permute.xlu0 %384 }
  0xd6   : > { %7668 = vst [vmem:[#allocation14_spill] sm:$0xff] %v4603_v63  ;;  %v4605_v0 = vpop.permute.xlu2 %435 }
  0xd7   : > { %7669 = vst [vmem:[#allocation15_spill] sm:$0xff] %v4605_v0 }
  0xdc   : > { %567 = vperm.xlu1 %3946, %v4383_v1   ;;  %v4608_v33 = vpop.permute.xlu1 %404 }
  0xdd   : > { %7670 = vst [vmem:[#allocation16_spill] sm:$0xff] %v4608_v33  ;;  %571 = vperm.xlu2 %3944, %v4395_v4   ;;  %587 = vperm.xlu0 %3945, %v4425_v12   ;;  %v4612_v58 = vpop.permute.xlu0 %399 }
  0xde   : > { %7671 = vst [vmem:[#allocation17_spill] sm:$0xff] %v4612_v58  ;;  %v4614_v60 = vpop.permute.xlu2 %443 }
  0xdf   : > { %7672 = vst [vmem:[#allocation18_spill] sm:$0xff] %v4614_v60 }
  0xe4   : > { %579 = vperm.xlu1 %3946, %v4410_v8   ;;  %v4617_v62 = vpop.permute.xlu1 %419 }
  0xe5   : > { %7673 = vst [vmem:[#allocation19_spill] sm:$0xff] %v4617_v62  ;;  %583 = vperm.xlu2 %3944, %v4407_v7   ;;  %599 = vperm.xlu0 %3945, %v4437_v15   ;;  %v4621_v63 = vpop.permute.xlu0 %414 }
  0xe6   : > { %7674 = vst [vmem:[#allocation20_spill] sm:$0xff] %v4621_v63  ;;  %v4623_v0 = vpop.permute.xlu2 %455 }
  0xe7   : > { %7675 = vst [vmem:[#allocation21_spill] sm:$0xff] %v4623_v0 }
  0xec   : > { %591 = vperm.xlu1 %3946, %v4422_v11  }
  0xed   : > { %595 = vperm.xlu2 %3944, %v4419_v10   ;;  %611 = vperm.xlu0 %3945, %v4449_v18   ;;  %v4628_v58 = vpop.permute.xlu1 %431 }
  0xee   : > { %7676 = vst [vmem:[#allocation22_spill] sm:$0xff] %v4628_v58  ;;  %v4630_v60 = vpop.permute.xlu2 %467  ;;  %v4632_v33 = vpop.permute.xlu0 %427 }
  0xef   : > { %7677 = vst [vmem:[#allocation23_spill] sm:$0xff] %v4630_v60 }
  0xf0   : > { %7678 = vst [vmem:[#allocation24_spill] sm:$0xff] %v4632_v33 }
  0xf4   : > { %603 = vperm.xlu1 %3946, %v4434_v14  }
  0xf5   : > { %607 = vperm.xlu2 %3944, %v4431_v13   ;;  %623 = vperm.xlu0 %3945, %v4461_v21   ;;  %v4637_v63 = vpop.permute.xlu1 %439 }
  0xf6   : > { %7679 = vst [vmem:[#allocation25_spill] sm:$0xff] %v4637_v63  ;;  %v4639_v62 = vpop.permute.xlu2 %479  ;;  %v4641_v0 = vpop.permute.xlu0 %447 }
  0xf7   : > { %7680 = vst [vmem:[#allocation26_spill] sm:$0xff] %v4639_v62 }
  0xf8   : > { %7681 = vst [vmem:[#allocation27_spill] sm:$0xff] %v4641_v0 }
  0xfc   : > { %615 = vperm.xlu1 %3946, %v4446_v17  }
  0xfd   : > { %619 = vperm.xlu2 %3944, %v4443_v16   ;;  %635 = vperm.xlu0 %3945, %v4473_v24   ;;  %v4646_v60 = vpop.permute.xlu1 %451 }
  0xfe   : > { %7682 = vst [vmem:[#allocation28_spill] sm:$0xff] %v4646_v60  ;;  %v4648_v58 = vpop.permute.xlu2 %491  ;;  %v4650_v33 = vpop.permute.xlu0 %459 }
  0xff   : > { %7683 = vst [vmem:[#allocation29_spill] sm:$0xff] %v4648_v58 }
 0x100   : > { %7684 = vst [vmem:[#allocation30_spill] sm:$0xff] %v4650_v33 }
 0x104   : > { %627 = vperm.xlu1 %3946, %v4458_v20  }
 0x105   : > { %631 = vperm.xlu2 %3944, %v4455_v19   ;;  %647 = vperm.xlu0 %3945, %v4485_v27   ;;  %v4655_v62 = vpop.permute.xlu1 %463 }
 0x106   : > { %7685 = vst [vmem:[#allocation31_spill] sm:$0xff] %v4655_v62  ;;  %v4657_v0 = vpop.permute.xlu2 %503  ;;  %v4659_v63 = vpop.permute.xlu0 %471 }
 0x107   : > { %7686 = vst [vmem:[#allocation32_spill] sm:$0xff] %v4657_v0 }
 0x108   : > { %7687 = vst [vmem:[#allocation33_spill] sm:$0xff] %v4659_v63 }
 0x10c   : > { %639 = vperm.xlu1 %3946, %v4470_v23  }
 0x10d   : > { %643 = vperm.xlu2 %3944, %v4467_v22   ;;  %659 = vperm.xlu0 %3945, %v4497_v30   ;;  %v4664_v58 = vpop.permute.xlu1 %475 }
 0x10e   : > { %7688 = vst [vmem:[#allocation34_spill] sm:$0xff] %v4664_v58  ;;  %v4666_v33 = vpop.permute.xlu2 %515  ;;  %v4668_v60 = vpop.permute.xlu0 %483  ;;  %v4282_v58 = vmov 3  }
 0x10f   : > { %7689 = vst [vmem:[#allocation35_spill] sm:$0xff] %v4666_v33 }
 0x110   : > { %7690 = vst [vmem:[#allocation36_spill] sm:$0xff] %v4668_v60 }
 0x114   : > { %651 = vperm.xlu1 %3946, %v4482_v26  }
 0x115   : > { %655 = vperm.xlu2 %3944, %v4479_v25   ;;  %671 = vperm.xlu0 %3945, %v4506_v32   ;;  %v4673_v0 = vpop.permute.xlu1 %487 }
 0x116   : > { %7691 = vst [vmem:[#allocation37_spill] sm:$0xff] %v4673_v0  ;;  %v4675_v63 = vpop.permute.xlu2 %527  ;;  %v4677_v62 = vpop.permute.xlu0 %495 }
 0x117   : > { %7692 = vst [vmem:[#allocation38_spill] sm:$0xff] %v4675_v63 }
 0x118   : > { %7693 = vst [vmem:[#allocation39_spill] sm:$0xff] %v4677_v62 }
 0x11c   : > { %663 = vperm.xlu1 %3946, %v4494_v29  }
 0x11d   : > { %667 = vperm.xlu2 %3944, %v4491_v28   ;;  %3948 = vset.pattern.permute.xlu0 %v4282_v58  ;;  %v4681_v33 = vpop.permute.xlu1 %499 }
 0x11e   : > { %7694 = vst [vmem:[#allocation40_spill] sm:$0xff] %v4681_v33  ;;  %v4683_v60 = vpop.permute.xlu2 %539  ;;  %683 = vperm.xlu0 %3948, %v4401_v6   ;;  %v4686_v59 = vpop.permute.xlu0 %507 }
 0x11f   : > { %7695 = vst [vmem:[#allocation41_spill] sm:$0xff] %v4683_v60 }
 0x120   : > { %7696 = vst [vmem:[#allocation42_spill] sm:$0xff] %v4686_v59 }
 0x124   : > { %675 = vperm.xlu1 %3946, %v4503_v31  }
 0x125   : > { %3947 = vset.pattern.permute.xlu2 %v4282_v58  ;;  %v4689_v63 = vpop.permute.xlu1 %511 }
 0x126   : > { %7697 = vst [vmem:[#allocation43_spill] sm:$0xff] %v4689_v63  ;;  %679 = vperm.xlu2 %3947, %v4389_v3   ;;  %703 = vperm.xlu0 %3948, %v4413_v9   ;;  %v4693_v62 = vpop.permute.xlu0 %519 }
 0x127   : > { %7698 = vst [vmem:[#allocation44_spill] sm:$0xff] %v4693_v62  ;;  %v4695_v0 = vpop.permute.xlu2 %551 }
 0x12c   : > { %3949 = vset.pattern.permute.xlu1 %v4282_v58 }
 0x12d   : > { %687 = vperm.xlu1 %3949, %v4386_v2   ;;  %v4698_v60 = vpop.permute.xlu1 %523 }
 0x12e   : > { %7699 = vst [vmem:[#allocation45_spill] sm:$0xff] %v4698_v60  ;;  %691 = vperm.xlu2 %3947, %v4398_v5   ;;  %715 = vperm.xlu0 %3948, %v4425_v12   ;;  %v4702_v6 = vpop.permute.xlu0 %531 }
 0x12f   : > { %7700 = vst [vmem:[#allocation46_spill] sm:$0xff] %v4702_v6  ;;  %v4704_v63 = vpop.permute.xlu2 %563 }
 0x135   : > { %695 = vperm.xlu1 %3949, %v4383_v1   ;;  %v4707_v3 = vpop.permute.xlu1 %535 }
 0x136   : > { %7701 = vst [vmem:[#allocation47_spill] sm:$0xff] %v4707_v3  ;;  %699 = vperm.xlu2 %3947, %v4395_v4   ;;  %727 = vperm.xlu0 %3948, %v4437_v15   ;;  %v4711_v9 = vpop.permute.xlu0 %543 }
 0x137   : > { %7702 = vst [vmem:[#allocation48_spill] sm:$0xff] %v4711_v9  ;;  %v4713_v2 = vpop.permute.xlu2 %571 }
 0x13d   : > { %707 = vperm.xlu1 %3949, %v4410_v8   ;;  %v4716_v5 = vpop.permute.xlu1 %547 }
 0x13e   : > { %711 = vperm.xlu2 %3947, %v4407_v7   ;;  %739 = vperm.xlu0 %3948, %v4449_v18  }
 0x13f   : > { %v4720_v1 = vpop.permute.xlu2 %583  ;;  %v4722_v12 = vpop.permute.xlu0 %555 }
 0x145   : > { %719 = vperm.xlu1 %3949, %v4422_v11  }
 0x146   : > { %723 = vperm.xlu2 %3947, %v4419_v10   ;;  %751 = vperm.xlu0 %3948, %v4461_v21   ;;  %v4727_v4 = vpop.permute.xlu1 %559  ;;  %v938_v10 = vld [vmem:[%s4746_s17] ss:$8 sm:$0x3] }
 0x147   : > { %v4729_v8 = vpop.permute.xlu2 %595  ;;  %v4731_v15 = vpop.permute.xlu0 %575  ;;  %v4760_v58 = vperm.slane %v938_v10, 1 }
 0x148   : > { %7703 = vst [vmem:[#allocation49_spill] sm:$0xff] %v4729_v8 }
 0x14d   : > { %731 = vperm.xlu1 %3949, %v4434_v14  }
 0x14e   : > { %735 = vperm.xlu2 %3947, %v4431_v13   ;;  %763 = vperm.xlu0 %3948, %v4473_v24   ;;  %v4736_v7 = vpop.permute.xlu1 %567  ;;  %v4758_v24 = vperm.slane %v938_v10, 0 }
 0x14f   : > { %v4738_v18 = vpop.permute.xlu2 %607  ;;  %v4740_v11 = vpop.permute.xlu0 %587 }
 0x150   : > { %7704 = vst [vmem:[#allocation50_spill] sm:$0xff] %v4738_v18  ;;  %v958_v60 = vsub.f32 %v4514_v34, %v4758_v24  ;;  %v972_v10 = vsub.f32 %v4529_v37, %v4758_v24  ;;  %v954_v8 = vsub.f32 %v4531_v38, %v4758_v24 }
 0x151   : > { %7705 = vst [vmem:[#allocation51_spill] sm:$0xff] %v4740_v11 }
 0x152   : > { %v4785_v3 = vmul.f32 %v958_v60, %v958_v60 }
 0x155   : > { %743 = vperm.xlu1 %3949, %v4446_v17   ;;  %v959_v17 = vsub.f32 %v4514_v34, %v4760_v58  ;;  %v973_v34 = vsub.f32 %v4529_v37, %v4760_v58 }
 0x156   : > { %747 = vperm.xlu2 %3947, %v4443_v16   ;;  %775 = vperm.xlu0 %3948, %v4485_v27   ;;  %v4752_v13 = vpop.permute.xlu1 %579  ;;  %v960_v16 = vsub.f32 %v4519_v35, %v4758_v24  ;;  %v961_v27 = vsub.f32 %v4519_v35, %v4760_v58 }
 0x157   : > { %7706 = vst [vmem:[#allocation52_spill] sm:$0xff] %v4752_v13  ;;  %v4754_v14 = vpop.permute.xlu2 %619  ;;  %v4756_v21 = vpop.permute.xlu0 %599  ;;  %v4795_v62 = vmul.f32 %v959_v17, %v959_v17  ;;  %v4811_v33 = vmul.f32 %v973_v34, %v973_v34  ;;  %v4813_v17 = vmul.f32 %v954_v8, %v954_v8  ;;  %v953_v8 = vsub.f32 %v4542_v42, %v4760_v58 }
 0x158   : > { %7707 = vst [vmem:[#allocation53_spill] sm:$0xff] %v4754_v14  ;;  %v966_v14 = vsub.f32 %v4524_v36, %v4758_v24  ;;  %v4797_v59 = vmul.f32 %v960_v16, %v960_v16  ;;  %v979_v16 = vsub.f32 %v4538_v40, %v4760_v58  ;;  %v984_v34 = vsub.f32 %v4547_v43, %v4758_v24 }
 0x159   : > { %7708 = vst [vmem:[#allocation54_spill] sm:$0xff] %v4756_v21  ;;  %v967_v21 = vsub.f32 %v4524_v36, %v4760_v58  ;;  %v955_v36 = vsub.f32 %v4531_v38, %v4760_v58  ;;  %v951_v38 = vsub.f32 %v4533_v39, %v4760_v58 }
 0x15a   : > { %7712 = vst [vmem:[#allocation58_spill] sm:$0xff] %v4811_v33 }
 0x15b   : > { %v4803_v60 = vmul.f32 %v967_v21, %v967_v21  ;;  %v4819_v21 = vmul.f32 %v955_v36, %v955_v36  ;;  %v964_v36 = vsub.f32 %v4549_v44, %v4758_v24 }
 0x15d   : > { %755 = vperm.xlu1 %3949, %v4458_v20   ;;  %v950_v20 = vsub.f32 %v4533_v39, %v4758_v24  ;;  %v957_v39 = vsub.f32 %v4540_v41, %v4760_v58 }
 0x15e   : > { %759 = vperm.xlu2 %3947, %v4455_v19   ;;  %787 = vperm.xlu0 %3948, %v4497_v30   ;;  %v4783_v35 = vpop.permute.xlu1 %591  ;;  %v4799_v19 = vmul.f32 %v961_v27, %v961_v27  ;;  %v4801_v30 = vmul.f32 %v966_v14, %v966_v14  ;;  %v956_v14 = vsub.f32 %v4540_v41, %v4758_v24 }
 0x15f   : > { %7709 = vst [vmem:[#allocation55_spill] sm:$0xff] %v4783_v35  ;;  %v4791_v6 = vpop.permute.xlu2 %631  ;;  %v4793_v37 = vpop.permute.xlu0 %611  ;;  %v4805_v35 = vmul.f32 %v972_v10, %v972_v10  ;;  %v4821_v27 = vmul.f32 %v950_v20, %v950_v20  ;;  %v952_v10 = vsub.f32 %v4542_v42, %v4758_v24  ;;  %v4835_v20 = vmul.f32 %v951_v38, %v951_v38 }
 0x160   : > { %7710 = vst [vmem:[#allocation56_spill] sm:$0xff] %v4791_v6  ;;  %v978_v6 = vsub.f32 %v4538_v40, %v4758_v24  ;;  %v985_v40 = vsub.f32 %v4547_v43, %v4760_v58  ;;  %v965_v41 = vsub.f32 %v4549_v44, %v4760_v58  ;;  %v962_v42 = vsub.f32 %v4551_v45, %v4758_v24 }
 0x161   : > { %7711 = vst [vmem:[#allocation57_spill] sm:$0xff] %v4793_v37  ;;  %v4844_v37 = vmul.f32 %v979_v16, %v979_v16  ;;  %v4846_v33 = vmul.f32 %v956_v14, %v956_v14  ;;  %v963_v43 = vsub.f32 %v4551_v45, %v4760_v58  ;;  %v4854_v38 = vmul.f32 %v957_v39, %v957_v39  ;;  %v3863_v14 = vld [vmem:[%s4746_s17 + $0x1] ss:$8 sm:$0x3] }
 0x162   : > { %v4837_v9 = vmul.f32 %v978_v6, %v978_v6  ;;  %v4856_v44 = vmul.f32 %v952_v10, %v952_v10  ;;  %v991_v16 = vsub.f32 %v4556_v46, %v4760_v58  ;;  %v4873_v39 = vmul.f32 %v964_v36, %v964_v36 }
 0x163   : > { %v4875_v10 = vmul.f32 %v965_v41, %v965_v41  ;;  %v4877_v11 = vmul.f32 %v962_v42, %v962_v42  ;;  %v4883_v18 = vmul.f32 %v963_v43, %v963_v43  ;;  %v996_v42 = vsub.f32 %v4565_v49, %v4758_v24 }
 0x164   : > { %v4893_v41 = vmul.f32 %v991_v16, %v991_v16  ;;  %v976_v43 = vsub.f32 %v4567_v50, %v4758_v24 }
 0x165   : > { %767 = vperm.xlu1 %3949, %v4470_v23   ;;  %v990_v23 = vsub.f32 %v4556_v46, %v4758_v24  ;;  %v970_v46 = vsub.f32 %v4558_v47, %v4758_v24 }
 0x166   : > { %771 = vperm.xlu2 %3947, %v4467_v22   ;;  %799 = vperm.xlu0 %3948, %v4506_v32   ;;  %v4852_v6 = vpop.permute.xlu1 %603  ;;  %v4867_v22 = vmul.f32 %v953_v8, %v953_v8  ;;  %v4869_v32 = vmul.f32 %v984_v34, %v984_v34  ;;  %v968_v8 = vsub.f32 %v4560_v48, %v4758_v24 }
 0x167   : > { %7713 = vst [vmem:[#allocation59_spill] sm:$0xff] %v4852_v6  ;;  %v4863_v13 = vpop.permute.xlu2 %643  ;;  %v4865_v45 = vpop.permute.xlu0 %623  ;;  %v4871_v6 = vmul.f32 %v985_v40, %v985_v40  ;;  %v969_v34 = vsub.f32 %v4560_v48, %v4760_v58  ;;  %v4889_v40 = vperm.slane %v3863_v14, 0  ;;  %v4891_v36 = vmul.f32 %v990_v23, %v990_v23 }
 0x168   : > { %7714 = vst [vmem:[#allocation60_spill] sm:$0xff] %v4863_v13  ;;  %v971_v13 = vsub.f32 %v4558_v47, %v4760_v58  ;;  %v997_v47 = vsub.f32 %v4565_v49, %v4760_v58  ;;  %v977_v48 = vsub.f32 %v4567_v50, %v4760_v58  ;;  %v974_v23 = vsub.f32 %v4569_v51, %v4758_v24 }
 0x169   : > { %7715 = vst [vmem:[#allocation61_spill] sm:$0xff] %v4865_v45  ;;  %v4897_v45 = vperm.slane %v3863_v14, 1  ;;  %v975_v14 = vsub.f32 %v4569_v51, %v4760_v58  ;;  %v4916_v49 = vmul.f32 %v968_v8, %v968_v8  ;;  %v1003_v50 = vsub.f32 %v4574_v52, %v4760_v58 }
 0x16a   : > { %7716 = vst [vmem:[#allocation62_spill] sm:$0xff] %v4869_v32  ;;  %v4909_v16 = vmul.f32 %v971_v13, %v971_v13  ;;  %v4927_v51 = vmul.f32 %v996_v42, %v996_v42  ;;  %v981_v8 = vsub.f32 %v4578_v54, %v4760_v58  ;;  %v4945_v42 = vmul.f32 %v974_v23, %v974_v23 }
 0x16b   : > { %7717 = vst [vmem:[#allocation63_spill] sm:$0xff] %v4871_v6  ;;  %v4918_v6 = vmul.f32 %v969_v34, %v969_v34  ;;  %v1008_v32 = vsub.f32 %v4583_v55, %v4758_v24 }
 0x16c   : > { %7718 = vst [vmem:[#allocation64_spill] sm:$0xff] %v4891_v36  ;;  %v4907_v36 = vmul.f32 %v970_v46, %v970_v46  ;;  %v982_v46 = vsub.f32 %v4576_v53, %v4758_v24 }
 0x16d   : > { %7719 = vst [vmem:[#allocation65_spill] sm:$0xff] %v4893_v41  ;;  %v1002_v41 = vsub.f32 %v4574_v52, %v4758_v24  ;;  %779 = vperm.xlu1 %3949, %v4482_v26   ;;  %v980_v26 = vsub.f32 %v4578_v54, %v4758_v24  ;;  %v1009_v54 = vsub.f32 %v4583_v55, %v4760_v58 }
 0x16e   : > { %7720 = vst [vmem:[#allocation66_spill] sm:$0xff] %v4907_v36  ;;  %783 = vperm.xlu2 %3947, %v4479_v25   ;;  %v4925_v13 = vpop.permute.xlu1 %615  ;;  %v4939_v36 = vmul.f32 %v997_v47, %v997_v47  ;;  %v4941_v25 = vmul.f32 %v976_v43, %v976_v43  ;;  %v4957_v47 = vmul.f32 %v982_v46, %v982_v46 }
 0x16f   : > { %7721 = vst [vmem:[#allocation67_spill] sm:$0xff] %v4909_v16  ;;  %v983_v16 = vsub.f32 %v4576_v53, %v4760_v58  ;;  %v4935_v34 = vpop.permute.xlu2 %655  ;;  %v4937_v52 = vpop.permute.xlu0 %635  ;;  %v4949_v53 = vmul.f32 %v1002_v41, %v1002_v41  ;;  %v1019_v43 = vsub.f32 %v4596_v61, %v4889_v40  ;;  %v4965_v41 = vmul.f32 %v980_v26, %v980_v26 }
 0x170   : > { %7722 = vst [vmem:[#allocation68_spill] sm:$0xff] %v4925_v13  ;;  %v4943_v13 = vmul.f32 %v977_v48, %v977_v48  ;;  %v1020_v48 = vsub.f32 %v4596_v61, %v4897_v45  ;;  %v989_v55 = vsub.f32 %v4585_v56, %v4760_v58  ;;  %v987_v46 = vsub.f32 %v4587_v57, %v4760_v58  ;;  %v7736_v61 = vld [vmem:[#allocation11_spill] sm:$0xff] }
 0x171   : > { %7723 = vst [vmem:[#allocation69_spill] sm:$0xff] %v4927_v51  ;;  %v4947_v51 = vmul.f32 %v975_v14, %v975_v14  ;;  %v4963_v23 = vmul.f32 %v983_v16, %v983_v16  ;;  %v4967_v14 = vmul.f32 %v981_v8, %v981_v8  ;;  %v994_v16 = vsub.f32 %v7736_v61, %v4758_v24 }
 0x172   : > { %7724 = vst [vmem:[#allocation70_spill] sm:$0xff] %v4935_v34  ;;  %v4955_v34 = vmul.f32 %v1003_v50, %v1003_v50  ;;  %v986_v50 = vsub.f32 %v4587_v57, %v4758_v24  ;;  %v4981_v26 = vmul.f32 %v1009_v54, %v1009_v54  ;;  %v995_v8 = vsub.f32 %v7736_v61, %v4760_v58 }
 0x173   : > { %7725 = vst [vmem:[#allocation71_spill] sm:$0xff] %v4937_v52  ;;  %v988_v52 = vsub.f32 %v4585_v56, %v4758_v24  ;;  %v1148_v57 = vmul.f32 %v1020_v48, %v1020_v48 }
 0x174   : > { %7726 = vst [vmem:[#allocation72_spill] sm:$0xff] %v4939_v36  ;;  %v7740_v36 = vld [vmem:[#allocation13_spill] sm:$0xff] }
 0x175   : > { %7727 = vst [vmem:[#allocation73_spill] sm:$0xff] %v4941_v25  ;;  %791 = vperm.xlu1 %3949, %v4494_v29   ;;  %v4995_v54 = vmul.f32 %v988_v52, %v988_v52  ;;  %v1001_v61 = vsub.f32 %v7740_v36, %v4760_v58  ;;  %v7743_v29 = vld [vmem:[#allocation15_spill] sm:$0xff]  ;;  %v5013_v52 = vmul.f32 %v994_v16, %v994_v16  ;;  %v7752_v25 = vld [vmem:[#allocation14_spill] sm:$0xff] }
 0x176   : > { %7728 = vst [vmem:[#allocation74_spill] sm:$0xff] %v4943_v13  ;;  %v1000_v13 = vsub.f32 %v7740_v36, %v4758_v24  ;;  %795 = vperm.xlu2 %3947, %v4491_v28   ;;  %v5009_v28 = vmul.f32 %v986_v50, %v986_v50  ;;  %v5030_v50 = vadd.f32 %v1148_v57, %v4835_v20 }
 0x177   : > { %7729 = vst [vmem:[#allocation75_spill] sm:$0xff] %v4945_v42  ;;  %v5005_v48 = vpop.permute.xlu0 %647  ;;  %v5034_v16 = vmul.f32 %v1001_v61, %v1001_v61 }
 0x178   : > { %7730 = vst [vmem:[#allocation76_spill] sm:$0xff] %v4947_v51  ;;  %v998_v51 = vsub.f32 %v7752_v25, %v4758_v24 }
 0x179   : > { %7731 = vst [vmem:[#allocation77_spill] sm:$0xff] %v4949_v53  ;;  %v7739_v53 = vld [vmem:[#allocation12_spill] sm:$0xff] }
 0x17a   : > { %7732 = vst [vmem:[#allocation78_spill] sm:$0xff] %v4955_v34  ;;  %v4979_v34 = vmul.f32 %v1008_v32, %v1008_v32  ;;  %v993_v56 = vsub.f32 %v7739_v53, %v4760_v58  ;;  %v4993_v32 = vpop.permute.xlu1 %627  ;;  %v5046_v20 = vmul.f32 %v998_v51, %v998_v51 }
 0x17b   : > { %7733 = vst [vmem:[#allocation79_spill] sm:$0xff] %v4957_v47  ;;  %v1147_v47 = vmul.f32 %v1019_v43, %v1019_v43  ;;  %v5003_v43 = vpop.permute.xlu2 %667 }
 0x17c   : > { %7734 = vst [vmem:[#allocation80_spill] sm:$0xff] %v4963_v23  ;;  %v992_v23 = vsub.f32 %v7739_v53, %v4758_v24  ;;  %v1026_v53 = vsub.f32 %v7743_v29, %v4897_v45 }
 0x17d   : > { %7735 = vst [vmem:[#allocation81_spill] sm:$0xff] %v4967_v14  ;;  %803 = vperm.xlu1 %3949, %v4503_v31  }
 0x17e   : > { %7737 = vst [vmem:[#allocation11_spill] sm:$0xff] %v4979_v34  ;;  %v5007_v34 = vmul.f32 %v989_v55, %v989_v55  ;;  %v5017_v36 = vmul.f32 %v992_v23, %v992_v23  ;;  %v5027_v55 = vadd.f32 %v1147_v47, %v4821_v27 }
 0x17f   : > { %7738 = vst [vmem:[#allocation82_spill] sm:$0xff] %v4981_v26  ;;  %v1025_v26 = vsub.f32 %v7743_v29, %v4889_v40  ;;  %v999_v29 = vsub.f32 %v7752_v25, %v4760_v58  ;;  %v7759_v25 = vld [vmem:[#allocation24_spill] sm:$0xff] }
 0x180   : > { %7741 = vst [vmem:[#allocation12_spill] sm:$0xff] %v4993_v32  ;;  %v5011_v32 = vmul.f32 %v987_v46, %v987_v46  ;;  %v5032_v46 = vmul.f32 %v1000_v13, %v1000_v13 }
 0x181   : > { %7742 = vst [vmem:[#allocation13_spill] sm:$0xff] %v4995_v54  ;;  %v5015_v54 = vmul.f32 %v995_v8, %v995_v8  ;;  %v1153_v23 = vmul.f32 %v1025_v26, %v1025_v26  ;;  %v1154_v8 = vmul.f32 %v1026_v53, %v1026_v53  ;;  %v5048_v13 = vmul.f32 %v999_v29, %v999_v29  ;;  %v7762_v26 = vld [vmem:[#allocation18_spill] sm:$0xff] }
 0x182   : > { %7744 = vst [vmem:[#allocation15_spill] sm:$0xff] %v5003_v43  ;;  %v3864_v43 = vld [vmem:[%s4746_s17 + $0x2] ss:$8 sm:$0x3]  ;;  %v1029_v57 = vsub.f32 %v7762_v26, %v4889_v40  ;;  %v1030_v61 = vsub.f32 %v7762_v26, %v4897_v45  ;;  %v5063_v29 = vpop.permute.xlu1 %639 }
 0x183   : > { %7745 = vst [vmem:[#allocation83_spill] sm:$0xff] %v5005_v48  ;;  %v5024_v48 = vmul.f32 %v993_v56, %v993_v56  ;;  %v1022_v56 = vsub.f32 %v7759_v25, %v4897_v45  ;;  %v5042_v27 = vperm.slane %v3864_v43, 0  ;;  %v5044_v47 = vperm.slane %v3864_v43, 1 }
 0x184   : > { %7746 = vst [vmem:[#allocation84_spill] sm:$0xff] %v5007_v34  ;;  %v5069_v26 = vadd.f32 %v1154_v8, %v4854_v38  ;;  %v1158_v38 = vmul.f32 %v1030_v61, %v1030_v61  ;;  %v7771_v8 = vld [vmem:[#allocation19_spill] sm:$0xff] }
 0x185   : > { %7747 = vst [vmem:[#allocation85_spill] sm:$0xff] %v5009_v28  ;;  %v1282_v51 = vsub.f32 %v4722_v12, %v5042_v27  ;;  %v1283_v43 = vsub.f32 %v4722_v12, %v5044_v47  ;;  %v1150_v34 = vmul.f32 %v1022_v56, %v1022_v56 }
 0x186   : > { %7748 = vst [vmem:[#allocation86_spill] sm:$0xff] %v5011_v32  ;;  %v1012_v32 = vsub.f32 %v7771_v8, %v4758_v24 }
 0x187   : > { %7749 = vst [vmem:[#allocation87_spill] sm:$0xff] %v5013_v52 }
 0x188   : > { %7750 = vst [vmem:[#allocation88_spill] sm:$0xff] %v5015_v54  ;;  %v7758_v54 = vld [vmem:[#allocation16_spill] sm:$0xff] }
 0x189   : > { %7751 = vst [vmem:[#allocation89_spill] sm:$0xff] %v5017_v36  ;;  %v1006_v52 = vsub.f32 %v7758_v54, %v4758_v24  ;;  %v1021_v36 = vsub.f32 %v7759_v25, %v4889_v40  ;;  %v1007_v53 = vsub.f32 %v7758_v54, %v4760_v58  ;;  %v7763_v25 = vld [vmem:[#allocation17_spill] sm:$0xff] }
 0x18a   : > { %7753 = vst [vmem:[#allocation14_spill] sm:$0xff] %v5024_v48  ;;  %v1005_v31 = vsub.f32 %v7763_v25, %v4760_v58  ;;  %v7767_v54 = vld [vmem:[#allocation21_spill] sm:$0xff] }
 0x18b   : > { %7754 = vst [vmem:[#allocation90_spill] sm:$0xff] %v5027_v55  ;;  %v5077_v48 = vmul.f32 %v1006_v52, %v1006_v52  ;;  %v1036_v12 = vsub.f32 %v7767_v54, %v4897_v45  ;;  %v5087_v28 = vmul.f32 %v1007_v53, %v1007_v53  ;;  %v1479_v52 = vmul.f32 %v1282_v51, %v1282_v51 }
 0x18c   : > { %7755 = vst [vmem:[#allocation91_spill] sm:$0xff] %v5030_v50  ;;  %v5091_v42 = vmul.f32 %v1005_v31, %v1005_v31  ;;  %v7784_v31 = vld [vmem:[#allocation23_spill] sm:$0xff] }
 0x18d   : > { %7756 = vst [vmem:[#allocation92_spill] sm:$0xff] %v5032_v46  ;;  %v5066_v46 = vadd.f32 %v1153_v23, %v4846_v33  ;;  %v5081_v33 = vpop.permute.xlu2 %679  ;;  %v1157_v23 = vmul.f32 %v1029_v57, %v1029_v57 }
 0x18e   : > { %7757 = vst [vmem:[#allocation93_spill] sm:$0xff] %v5034_v16  ;;  %v1004_v16 = vsub.f32 %v7763_v25, %v4758_v24  ;;  %v1013_v25 = vsub.f32 %v7771_v8, %v4760_v58 }
 0x18f   : > { %7760 = vst [vmem:[#allocation16_spill] sm:$0xff] %v5046_v20  ;;  %v5075_v20 = vpop.permute.xlu0 %659  ;;  %v5106_v51 = vadd.f32 %v1157_v23, %v4797_v59 }
 0x190   : > { %7761 = vst [vmem:[#allocation24_spill] sm:$0xff] %v5048_v13  ;;  %v1035_v13 = vsub.f32 %v7767_v54, %v4889_v40  ;;  %v1164_v54 = vmul.f32 %v1036_v12, %v1036_v12  ;;  %v1041_v12 = vsub.f32 %v7784_v31, %v4889_v40 }
 0x191   : > { %7764 = vst [vmem:[#allocation18_spill] sm:$0xff] %v5063_v29  ;;  %v1149_v29 = vmul.f32 %v1021_v36, %v1021_v36  ;;  %v7775_v36 = vld [vmem:[#allocation20_spill] sm:$0xff] }
 0x192   : > { %7765 = vst [vmem:[#allocation17_spill] sm:$0xff] %v5066_v46  ;;  %v1010_v56 = vsub.f32 %v7775_v36, %v4758_v24  ;;  %v1011_v57 = vsub.f32 %v7775_v36, %v4760_v58  ;;  %v1163_v61 = vmul.f32 %v1035_v13, %v1035_v13  ;;  %v5111_v24 = vmul.f32 %v1012_v32, %v1012_v32 }
 0x193   : > { %7766 = vst [vmem:[#allocation94_spill] sm:$0xff] %v5069_v26  ;;  %v5100_v53 = vadd.f32 %v1149_v29, %v4856_v44  ;;  %v5113_v58 = vmul.f32 %v1013_v25, %v1013_v25  ;;  %v1290_v13 = vsub.f32 %v4713_v2, %v5042_v27  ;;  %v1291_v44 = vsub.f32 %v4713_v2, %v5044_v47  ;;  %v5119_v29 = vpop.permute.xlu1 %651 }
 0x194   : > { %7768 = vst [vmem:[#allocation21_spill] sm:$0xff] %v5075_v20  ;;  %v5089_v20 = vmul.f32 %v1004_v16, %v1004_v16  ;;  %v5103_v16 = vadd.f32 %v1150_v34, %v4867_v22  ;;  %v5123_v34 = vmul.f32 %v1010_v56, %v1010_v56  ;;  %v5134_v2 = vadd.f32 %v1163_v61, %v4801_v30 }
 0x195   : > { %7769 = vst [vmem:[#allocation95_spill] sm:$0xff] %v5077_v48  ;;  %v1480_v48 = vmul.f32 %v1283_v43, %v1283_v43  ;;  %v5109_v43 = vadd.f32 %v1158_v38, %v4799_v19  ;;  %v1543_v22 = vadd.f32 %v1479_v52, %v5100_v53  ;;  %v5125_v19 = vmul.f32 %v1011_v57, %v1011_v57  ;;  %v5141_v25 = vpop.permute.xlu2 %691  ;;  %v7788_v52 = vld [vmem:[#allocation25_spill] sm:$0xff] }
 0x196   : > { %7770 = vst [vmem:[#allocation96_spill] sm:$0xff] %v5081_v33  ;;  %v7776_v33 = vld [vmem:[#allocation22_spill] sm:$0xff]  ;;  %v5137_v38 = vadd.f32 %v1164_v54, %v4803_v60  ;;  %v1028_v36 = vsub.f32 %v7788_v52, %v4897_v45  ;;  %v1280_v56 = vsub.f32 %v4695_v0, %v5042_v27  ;;  %v1281_v30 = vsub.f32 %v4695_v0, %v5044_v47 }
 0x197   : > { %7772 = vst [vmem:[#allocation19_spill] sm:$0xff] %v5087_v28  ;;  %v1023_v14 = vsub.f32 %v7776_v33, %v4889_v40  ;;  %v1544_v59 = vadd.f32 %v1480_v48, %v5103_v16  ;;  %v1024_v32 = vsub.f32 %v7776_v33, %v4897_v45  ;;  %v5131_v23 = vpop.permute.xlu0 %671  ;;  %v1042_v48 = vsub.f32 %v7784_v31, %v4897_v45 }
 0x198   : > { %7773 = vst [vmem:[#allocation97_spill] sm:$0xff] %v5089_v20  ;;  %v1027_v33 = vsub.f32 %v7788_v52, %v4889_v40  ;;  %v1487_v60 = vmul.f32 %v1290_v13, %v1290_v13  ;;  %v1488_v57 = vmul.f32 %v1291_v44, %v1291_v44  ;;  %v1169_v31 = vmul.f32 %v1041_v12, %v1041_v12  ;;  %v7790_v52 = vld [vmem:[#allocation27_spill] sm:$0xff] }
 0x199   : > { %7774 = vst [vmem:[#allocation98_spill] sm:$0xff] %v5091_v42  ;;  %v1151_v8 = vmul.f32 %v1023_v14, %v1023_v14  ;;  %v1607_v14 = vmin.f32 %v1543_v22, 1.0737418e+09  ;;  %v1608_v61 = vmin.f32 %v1544_v59, 1.0737418e+09  ;;  %v1152_v54 = vmul.f32 %v1024_v32, %v1024_v32 }
 0x19a   : > { %7777 = vst [vmem:[#allocation20_spill] sm:$0xff] %v5100_v53  ;;  %v1031_v28 = vsub.f32 %v7790_v52, %v4889_v40  ;;  %v1296_v0 = vsub.f32 %v4720_v1, %v5042_v27  ;;  %v1297_v13 = vsub.f32 %v4720_v1, %v5044_v47  ;;  %v1155_v44 = vmul.f32 %v1027_v33, %v1027_v33 }
 0x19b   : > { %7778 = vst [vmem:[#allocation22_spill] sm:$0xff] %v5103_v16  ;;  %v7789_v16 = vld [vmem:[#allocation26_spill] sm:$0xff]  ;;  %v1156_v22 = vmul.f32 %v1028_v36, %v1028_v36  ;;  %v1032_v59 = vsub.f32 %v7790_v52, %v4897_v45  ;;  %v1477_v32 = vmul.f32 %v1280_v56, %v1280_v56  ;;  %v1478_v12 = vmul.f32 %v1281_v30, %v1281_v30  ;;  %v5165_v42 = vpop.permute.xlu1 %663 }
 0x19c   : > { %7779 = vst [vmem:[#allocation99_spill] sm:$0xff] %v5106_v51  ;;  %v1047_v53 = vsub.f32 %v7789_v16, %v4889_v40  ;;  %v1552_v20 = vadd.f32 %v1488_v57, %v5109_v43  ;;  %v5176_v36 = vadd.f32 %v1169_v31, %v4805_v35  ;;  %v1159_v56 = vmul.f32 %v1031_v28, %v1031_v28 }
 0x19d   : > { %7780 = vst [vmem:[#allocation100_spill] sm:$0xff] %v5109_v43  ;;  %v1493_v30 = vmul.f32 %v1296_v0, %v1296_v0  ;;  %v1494_v52 = vmul.f32 %v1297_v13, %v1297_v13  ;;  %v5183_v57 = vadd.f32 %v1155_v44, %v4785_v3  ;;  %v1286_v35 = vsub.f32 %v4704_v63, %v5042_v27 }
 0x19e   : > { %7781 = vst [vmem:[#allocation101_spill] sm:$0xff] %v5119_v29  ;;  %v5155_v29 = vmul.f32 %v1042_v48, %v1042_v48  ;;  %v1551_v48 = vadd.f32 %v1487_v60, %v5106_v51  ;;  %v1175_v1 = vmul.f32 %v1047_v53, %v1047_v53  ;;  %v1541_v53 = vadd.f32 %v1477_v32, %v5027_v55 }
 0x19f   : > { %7782 = vst [vmem:[#allocation102_spill] sm:$0xff] %v5123_v34  ;;  %v5173_v34 = vadd.f32 %v1152_v54, %v4819_v21  ;;  %v5180_v60 = vpop.permute.xlu0 %683  ;;  %v1160_v21 = vmul.f32 %v1032_v59, %v1032_v59  ;;  %v1081_v3 = vsub.f32 %v4716_v5, %v4889_v40  ;;  %v5203_v54 = vadd.f32 %v1159_v56, %v4877_v11 }
 0x1a0   : > { %7783 = vst [vmem:[#allocation103_spill] sm:$0xff] %v5125_v19  ;;  %v5170_v19 = vadd.f32 %v1151_v8, %v4813_v17  ;;  %v5186_v17 = vadd.f32 %v1156_v22, %v4795_v62  ;;  %v1615_v28 = vmin.f32 %v1551_v48, 1.0737418e+09  ;;  %v1616_v8 = vmin.f32 %v1552_v20, 1.0737418e+09 }
 0x1a1   : > { %7785 = vst [vmem:[#allocation23_spill] sm:$0xff] %v5134_v2  ;;  %v1287_v62 = vsub.f32 %v4704_v63, %v5044_v47  ;;  %v1082_v20 = vsub.f32 %v4716_v5, %v4897_v45  ;;  %v1557_v31 = vadd.f32 %v1493_v30, %v5134_v2  ;;  %v5210_v0 = vadd.f32 %v1160_v21, %v4883_v18  ;;  %v7806_v21 = vld [vmem:[#allocation29_spill] sm:$0xff] }
 0x1a2   : > { %7786 = vst [vmem:[#allocation104_spill] sm:$0xff] %v5137_v38  ;;  %v1284_v63 = vsub.f32 %v4727_v4, %v5042_v27  ;;  %v1285_v11 = vsub.f32 %v4727_v4, %v5044_v47  ;;  %v1483_v44 = vmul.f32 %v1286_v35, %v1286_v35  ;;  %v2135_v59 = vmin.f32 %v1615_v28, %v1616_v8 }
 0x1a3   : > { %7787 = vst [vmem:[#allocation105_spill] sm:$0xff] %v5141_v25  ;;  %v1048_v25 = vsub.f32 %v7789_v16, %v4897_v45  ;;  %v2123_v16 = vmin.f32 %v1607_v14, %v1608_v61  ;;  %v5193_v14 = vadd.f32 %v1175_v1, %v4837_v9  ;;  %v1558_v9 = vadd.f32 %v1494_v52, %v5137_v38  ;;  %v676_v22 = vpop.permute.xlu1 %675 }
 0x1a4   : > { %7791 = vst [vmem:[#allocation25_spill] sm:$0xff] %v5165_v42  ;;  %v5178_v42 = vpop.permute.xlu2 %699  ;;  %v1605_v5 = vmin.f32 %v1541_v53, 1.0737418e+09  ;;  %v1342_v48 = vsub.f32 %v676_v22, %v5042_v27  ;;  %v1343_v18 = vsub.f32 %v676_v22, %v5044_v47  ;;  %v1621_v4 = vmin.f32 %v1557_v31, 1.0737418e+09 }
 0x1a5   : > { %7792 = vst [vmem:[#allocation26_spill] sm:$0xff] %v5170_v19  ;;  %v1176_v33 = vmul.f32 %v1048_v25, %v1048_v25  ;;  %2124 = vmin.xlane.f32.xlu0 %v2123_v16  ;;  %v1542_v25 = vadd.f32 %v1478_v12, %v5030_v50  ;;  %v1484_v12 = vmul.f32 %v1287_v62, %v1287_v62  ;;  %v1622_v52 = vmin.f32 %v1558_v9, 1.0737418e+09 }
 0x1a6   : > { %7793 = vst [vmem:[#allocation27_spill] sm:$0xff] %v5173_v34  ;;  %v1209_v16 = vmul.f32 %v1081_v3, %v1081_v3  ;;  %v1053_v53 = vsub.f32 %v7806_v21, %v4889_v40  ;;  %v1054_v35 = vsub.f32 %v7806_v21, %v4897_v45  ;;  %v1481_v28 = vmul.f32 %v1284_v63, %v1284_v63 }
 0x1a7   : > { %7794 = vst [vmem:[#allocation106_spill] sm:$0xff] %v5176_v36  ;;  %v5196_v61 = vadd.f32 %v1176_v33, %v4844_v37  ;;  %v7803_v37 = vld [vmem:[#allocation28_spill] sm:$0xff]  ;;  %v1606_v32 = vmin.f32 %v1542_v25, 1.0737418e+09  ;;  %v1210_v33 = vmul.f32 %v1082_v20, %v1082_v20  ;;  %v5224_v30 = vpop.permute.xlu0 %703  ;;  %v1482_v8 = vmul.f32 %v1285_v11, %v1285_v11  ;;  %v7807_v25 = vld [vmem:[#allocation30_spill] sm:$0xff] }
 0x1a8   : > { %7795 = vst [vmem:[#allocation107_spill] sm:$0xff] %v5178_v42  ;;  %v1033_v13 = vsub.f32 %v7803_v37, %v4889_v40  ;;  %v1034_v1 = vsub.f32 %v7803_v37, %v4897_v45  ;;  %v1037_v62 = vsub.f32 %v7807_v25, %v4889_v40  ;;  %v1038_v3 = vsub.f32 %v7807_v25, %v4897_v45  ;;  %v7853_v42 = vld [vmem:[#allocation74_spill] sm:$0xff] }
 0x1a9   : > { %7796 = vst [vmem:[#allocation108_spill] sm:$0xff] %v5180_v60  ;;  %v1539_v20 = vmul.f32 %v1342_v48, %v1342_v48  ;;  %v1540_v37 = vmul.f32 %v1343_v18, %v1343_v18  ;;  %v2120_v22 = vmin.f32 %v1605_v5, %v1606_v32  ;;  %v1547_v31 = vadd.f32 %v1483_v44, %v5066_v46 }
 0x1aa   : > { %7797 = vst [vmem:[#allocation109_spill] sm:$0xff] %v5183_v57  ;;  %v1548_v9 = vadd.f32 %v1484_v12, %v5069_v26  ;;  %v1292_v63 = vsub.f32 %v4731_v15, %v5042_v27  ;;  %v1293_v11 = vsub.f32 %v4731_v15, %v5044_v47  ;;  %v2144_v21 = vmin.f32 %v1621_v4, %v1622_v52  ;;  %v7810_v12 = vld [vmem:[#allocation50_spill] sm:$0xff] }
 0x1ab   : > { %7798 = vst [vmem:[#allocation110_spill] sm:$0xff] %v5186_v17  ;;  %v5244_v60 = vadd.f32 %v1210_v33, %v5113_v58  ;;  %v1288_v5 = vsub.f32 %v4736_v7, %v5042_v27  ;;  %v1289_v44 = vsub.f32 %v4736_v7, %v5044_v47  ;;  %v1545_v32 = vadd.f32 %v1481_v28, %v5170_v19  ;;  %v5260_v7 = vpop.permute.xlu1 %687 }
 0x1ac   : > { %7799 = vst [vmem:[#allocation111_spill] sm:$0xff] %v5193_v14  ;;  %v5222_v56 = vpop.permute.xlu2 %711  ;;  %v1309_v15 = vsub.f32 %v7810_v12, %v5044_v47  ;;  %v1161_v18 = vmul.f32 %v1033_v13, %v1033_v13  ;;  %v1162_v33 = vmul.f32 %v1034_v1, %v1034_v1  ;;  %v1181_v4 = vmul.f32 %v1053_v53, %v1053_v53 }
 0x1ad   : > { %7800 = vst [vmem:[#allocation112_spill] sm:$0xff] %v5196_v61  ;;  %2136 = vmin.xlane.f32.xlu0 %v2135_v59  ;;  %v5237_v59 = vadd.f32 %v1209_v16, %v5111_v24  ;;  %v1546_v24 = vadd.f32 %v1482_v8, %v5173_v34  ;;  %v1308_v16 = vsub.f32 %v7810_v12, %v5042_v27  ;;  %v1611_v12 = vmin.f32 %v1547_v31, 1.0737418e+09 }
 0x1ae   : > { %7801 = vst [vmem:[#allocation113_spill] sm:$0xff] %v5203_v54  ;;  %v1604_v58 = vadd.f32 %v1540_v37, %v5244_v60  ;;  %v5258_v52 = vmul.f32 %v1054_v35, %v1054_v35  ;;  %2121 = vmin.xlane.f32.xlu2 %v2120_v22  ;;  %v1489_v28 = vmul.f32 %v1292_v63, %v1292_v63  ;;  %v1612_v19 = vmin.f32 %v1548_v9, 1.0737418e+09  ;;  %v7814_v63 = vld [vmem:[#allocation51_spill] sm:$0xff] }
 0x1af   : > { %7802 = vst [vmem:[#allocation114_spill] sm:$0xff] %v5210_v0  ;;  %v1603_v48 = vadd.f32 %v1539_v20, %v5237_v59  ;;  %v1490_v8 = vmul.f32 %v1293_v11, %v1293_v11  ;;  %v5264_v34 = vpop.permute.xlu0 %715  ;;  %v1485_v20 = vmul.f32 %v1288_v5, %v1288_v5  ;;  %v1486_v26 = vmul.f32 %v1289_v44, %v1289_v44 }
 0x1b0   : > { %7804 = vst [vmem:[#allocation28_spill] sm:$0xff] %v5222_v56  ;;  %v1609_v37 = vmin.f32 %v1545_v32, 1.0737418e+09  ;;  %v1610_v13 = vmin.f32 %v1546_v24, 1.0737418e+09  ;;  %v1505_v1 = vmul.f32 %v1308_v16, %v1308_v16  ;;  %v1506_v53 = vmul.f32 %v1309_v15, %v1309_v15  ;;  %v7888_v56 = vld [vmem:[#allocation87_spill] sm:$0xff] }
 0x1b1   : > { %7805 = vst [vmem:[#allocation115_spill] sm:$0xff] %v5224_v30  ;;  %v1667_v35 = vmin.f32 %v1603_v48, 1.0737418e+09  ;;  %v1668_v46 = vmin.f32 %v1604_v58, 1.0737418e+09  ;;  %v1165_v22 = vmul.f32 %v1037_v62, %v1037_v62  ;;  %v1166_v50 = vmul.f32 %v1038_v3, %v1038_v3 }
 0x1b2   : > { %7808 = vst [vmem:[#allocation29_spill] sm:$0xff] %v5237_v59  ;;  %v1298_v11 = vsub.f32 %v7814_v63, %v5042_v27  ;;  %v2129_v5 = vmin.f32 %v1611_v12, %v1612_v19  ;;  %v1553_v44 = vadd.f32 %v1489_v28, %v5203_v54  ;;  %v2126_v32 = vmin.f32 %v1609_v37, %v1610_v13 }
 0x1b3   : > { %7809 = vst [vmem:[#allocation30_spill] sm:$0xff] %v5244_v60  ;;  %v1549_v24 = vadd.f32 %v1485_v20, %v5183_v57  ;;  %v1550_v62 = vadd.f32 %v1486_v26, %v5186_v17  ;;  %v1554_v3 = vadd.f32 %v1490_v8, %v5210_v0  ;;  %v5279_v16 = vadd.f32 %v1161_v18, %v4873_v39  ;;  %v5286_v12 = vpop.permute.xlu1 %695 }
 0x1b4   : > { %7811 = vst [vmem:[#allocation50_spill] sm:$0xff] %v5260_v7  ;;  %v5262_v25 = vpop.permute.xlu2 %723  ;;  %v7815_v7 = vld [vmem:[#allocation52_spill] sm:$0xff]  ;;  %v2213_v15 = vmin.f32 %v1667_v35, %v1668_v46  ;;  %v1569_v48 = vadd.f32 %v1505_v1, %v5193_v14  ;;  %v1570_v58 = vadd.f32 %v1506_v53, %v5196_v61  ;;  %v1495_v19 = vmul.f32 %v1298_v11, %v1298_v11  ;;  %v7822_v35 = vld [vmem:[#allocation58_spill] sm:$0xff] }
 0x1b5   : > { %7812 = vst [vmem:[#allocation116_spill] sm:$0xff] %v5262_v25  ;;  %2145 = vmin.xlane.f32.xlu0 %v2144_v21  ;;  %v1299_v21 = vsub.f32 %v7814_v63, %v5044_v47  ;;  %v1294_v31 = vsub.f32 %v7815_v7, %v5042_v27  ;;  %v1295_v9 = vsub.f32 %v7815_v7, %v5044_v47  ;;  %v1614_v20 = vmin.f32 %v1550_v62, 1.0737418e+09  ;;  %v7821_v1 = vld [vmem:[#allocation36_spill] sm:$0xff]  ;;  %v7823_v63 = vld [vmem:[#allocation62_spill] sm:$0xff] }
 0x1b6   : > { %7813 = vst [vmem:[#allocation117_spill] sm:$0xff] %v5264_v34  ;;  %v5284_v7 = vadd.f32 %v1162_v33, %v4875_v10  ;;  %2130 = vmin.xlane.f32.xlu2 %v2129_v5  ;;  %2127 = vmin.xlane.f32.xlu1 %v2126_v32  ;;  %v5289_v26 = vadd.f32 %v1165_v22, %v4916_v49  ;;  %v1613_v33 = vmin.f32 %v1549_v24, 1.0737418e+09  ;;  %v1617_v37 = vmin.f32 %v1553_v44, 1.0737418e+09  ;;  %v3865_v32 = vld [vmem:[%s4746_s17 + $0x3] ss:$8 sm:$0x3] }
 0x1b7   : > { %7816 = vst [vmem:[#allocation51_spill] sm:$0xff] %v5279_v16  ;;  %v1496_v28 = vmul.f32 %v1299_v21, %v1299_v21  ;;  %v5292_v39 = vadd.f32 %v1166_v50, %v4918_v6  ;;  %v1491_v46 = vmul.f32 %v1294_v31, %v1294_v31  ;;  %v1492_v18 = vmul.f32 %v1295_v9, %v1295_v9  ;;  %v5296_v10 = vpop.permute.xlu0 %727  ;;  %v7824_v9 = vld [vmem:[#allocation57_spill] sm:$0xff]  ;;  %v7861_v25 = vld [vmem:[#allocation80_spill] sm:$0xff]  ;;  %s4209_s17 = sshra.s32 %s3758_s14, 4  ;;  %s4210_s17 = int_to_ptr.hbm [resolvable:$true] %s4209_s17 }
 0x1b8   : > { %7817 = vst [vmem:[#allocation52_spill] sm:$0xff] %v5284_v7  ;;  %v1618_v13 = vmin.f32 %v1554_v3, 1.0737418e+09  ;;  %v1049_v53 = vsub.f32 %v7821_v1, %v4889_v40  ;;  %v1050_v49 = vsub.f32 %v7821_v1, %v4897_v45  ;;  %v1633_v6 = vmin.f32 %v1569_v48, 1.0737418e+09  ;;  %s4211_s18 = scalar_lea.hbm %s4210_s17, 8  ;;  %p4216_p3 = scmp.lt.s32.totalorder %s4210_s17, %s7524_s4 }
 0x1b9   : > { %7818 = vst [vmem:[#allocation118_spill] sm:$0xff] %v5286_v12  ;;  %v1634_v50 = vmin.f32 %v1570_v58, 1.0737418e+09  ;;  %v5304_v22 = vadd.f32 %v5155_v29, %v7822_v35  ;;  %v5307_v11 = vadd.f32 %v1181_v4, %v7823_v63  ;;  %v1559_v21 = vadd.f32 %v1495_v19, %v5289_v26  ;;  %v7825_v29 = vld [vmem:[#allocation63_spill] sm:$0xff]  ;;  %p4212_p0 = scmp.ne.s32.totalorder %s4210_s17, %s4211_s18  ;;  %p4217_p5 = scmp.lt.s32.totalorder %s4215_s20, %s4211_s18 }
 0x1ba   : > { %7819 = vst [vmem:[#allocation119_spill] sm:$0xff] %v5289_v26  ;;  %v1560_v31 = vadd.f32 %v1496_v28, %v5292_v39  ;;  %v1310_v5 = vsub.f32 %v7824_v9, %v5042_v27  ;;  %v1311_v44 = vsub.f32 %v7824_v9, %v5044_v47  ;;  %v1555_v24 = vadd.f32 %v1491_v46, %v5279_v16  ;;  %v7826_v4 = vld [vmem:[#allocation31_spill] sm:$0xff]  ;;  %v7855_v16 = vld [vmem:[#allocation40_spill] sm:$0xff] }
 0x1bb   : > { %7820 = vst [vmem:[#allocation120_spill] sm:$0xff] %v5292_v39  ;;  %v1556_v62 = vadd.f32 %v1492_v18, %v5284_v7  ;;  %v5320_v3 = vadd.f32 %v5258_v52, %v7825_v29  ;;  %v2132_v48 = vmin.f32 %v1613_v33, %v1614_v20  ;;  %v2138_v58 = vmin.f32 %v1617_v37, %v1618_v13  ;;  %v5330_v18 = vpop.permute.xlu1 %707  ;;  %p4213_p1 = pnand %p4212_p0, %p4357_p4  ;;  %p4218_p6 = por %p4217_p5, %p4216_p3 }
 0x1bc   : > { %v5294_v8 = vpop.permute.xlu2 %735  ;;  %v1040_v19 = vsub.f32 %v7826_v4, %v4897_v45  ;;  %v1177_v28 = vmul.f32 %v1049_v53, %v1049_v53  ;;  %v1178_v1 = vmul.f32 %v1050_v49, %v1050_v49  ;;  %v2162_v35 = vmin.f32 %v1633_v6, %v1634_v50  ;;  %7827 = vst [vmem:[#allocation36_spill] sm:$0xff] %v5330_v18  ;;  %v7829_v53 = vld [vmem:[#allocation32_spill] sm:$0xff] }
 0x1bd   : > { %2214 = vmin.xlane.f32.xlu0 %v2213_v15  ;;  %v1039_v15 = vsub.f32 %v7826_v4, %v4889_v40  ;;  %v5326_v63 = vperm.slane %v3865_v32, 0  ;;  %v5328_v46 = vperm.slane %v3865_v32, 1  ;;  %v1623_v52 = vmin.f32 %v1559_v21, 1.0737418e+09  ;;  %v7830_v21 = vld [vmem:[#allocation33_spill] sm:$0xff]  ;;  %v7832_v4 = vld [vmem:[#allocation48_spill] sm:$0xff]  ;;  %p4214_p2 = pneg %p4213_p1 }
 0x1be   : > { %2133 = vmin.xlane.f32.xlu2 %v2132_v48  ;;  %2139 = vmin.xlane.f32.xlu1 %v2138_v58  ;;  %v1624_v9 = vmin.f32 %v1560_v31, 1.0737418e+09  ;;  %v1507_v29 = vmul.f32 %v1310_v5, %v1310_v5  ;;  %v1508_v17 = vmul.f32 %v1311_v44, %v1311_v44  ;;  %v1619_v37 = vmin.f32 %v1555_v24, 1.0737418e+09  ;;  %v7831_v24 = vld [vmem:[#allocation81_spill] sm:$0xff] }
 0x1bf   : > { %v740_v20 = vpop.permute.xlu0 %739  ;;  %v1620_v13 = vmin.f32 %v1556_v62, 1.0737418e+09  ;;  %v1059_v49 = vsub.f32 %v7829_v53, %v4889_v40  ;;  %v1060_v6 = vsub.f32 %v7829_v53, %v4897_v45  ;;  %v1043_v31 = vsub.f32 %v7830_v21, %v4889_v40  ;;  %p4219_p7 = pnand %p4218_p6, %p4214_p2 }
 0x1c0   : > { %v1379_v50 = vsub.f32 %v740_v20, %v5326_v63  ;;  %v1380_v32 = vsub.f32 %v740_v20, %v5328_v46  ;;  %v1044_v5 = vsub.f32 %v7830_v21, %v4897_v45  ;;  %v1241_v44 = vadd.f32 %v1177_v28, %v4965_v41 }
 0x1c1   : > { %v1242_v62 = vadd.f32 %v1178_v1, %v7831_v24  ;;  %v1079_v48 = vsub.f32 %v7832_v4, %v4889_v40  ;;  %v1080_v58 = vsub.f32 %v7832_v4, %v4897_v45  ;;  %v2147_v20 = vmin.f32 %v1623_v52, %v1624_v9  ;;  %v7834_v52 = vld [vmem:[#allocation34_spill] sm:$0xff] }
 0x1c2   : > { %v1828_v53 = vmul.f32 %v1380_v32, %v1380_v32  ;;  %v1571_v57 = vadd.f32 %v1507_v29, %v1241_v44  ;;  %v1340_v12 = vsub.f32 %v5131_v23, %v5042_v27  ;;  %v1341_v41 = vsub.f32 %v5131_v23, %v5044_v47 }
 0x1c3   : > { %v1572_v55 = vadd.f32 %v1508_v17, %v1242_v62  ;;  %v1167_v21 = vmul.f32 %v1039_v15, %v1039_v15  ;;  %v1168_v24 = vmul.f32 %v1040_v19, %v1040_v19  ;;  %v1187_v43 = vmul.f32 %v1059_v49, %v1059_v49 }
 0x1c4   : > { %v5332_v33 = vpop.permute.xlu2 %747  ;;  %v1892_v1 = vadd.f32 %v1828_v53, %v1242_v62  ;;  %v1188_v51 = vmul.f32 %v1060_v6, %v1060_v6  ;;  %v1171_v0 = vmul.f32 %v1043_v31, %v1043_v31  ;;  %v1207_v4 = vmul.f32 %v1079_v48, %v1079_v48  ;;  %v7837_v31 = vld [vmem:[#allocation66_spill] sm:$0xff]  ;;  %v7839_v48 = vld [vmem:[#allocation35_spill] sm:$0xff] }
 0x1c5   : > { %7828 = vst [vmem:[#allocation58_spill] sm:$0xff] %v5332_v33  ;;  %2163 = vmin.xlane.f32.xlu0 %v2162_v35  ;;  %v1827_v35 = vmul.f32 %v1379_v50, %v1379_v50  ;;  %v2141_v33 = vmin.f32 %v1619_v37, %v1620_v13  ;;  %v1208_v50 = vmul.f32 %v1080_v58, %v1080_v58  ;;  %v5354_v37 = vpop.permute.xlu1 %719  ;;  %v1635_v13 = vmin.f32 %v1571_v57, 1.0737418e+09 }
 0x1c6   : > { %7833 = vst [vmem:[#allocation62_spill] sm:$0xff] %v5354_v37  ;;  %2148 = vmin.xlane.f32.xlu1 %v2147_v20  ;;  %v1172_v17 = vmul.f32 %v1044_v5, %v1044_v5  ;;  %v1045_v9 = vsub.f32 %v7834_v52, %v4889_v40  ;;  %v1636_v15 = vmin.f32 %v1572_v55, 1.0737418e+09  ;;  %v1537_v19 = vmul.f32 %v1340_v12, %v1340_v12  ;;  %v7841_v55 = vld [vmem:[#allocation65_spill] sm:$0xff]  ;;  %v7842_v12 = vld [vmem:[#allocation102_spill] sm:$0xff] }
 0x1c7   : > { %v1891_v28 = vadd.f32 %v1827_v35, %v1241_v44  ;;  %2142 = vmin.xlane.f32.xlu2 %v2141_v33  ;;  %v5360_v23 = vpop.permute.xlu0 %751  ;;  %v1538_v49 = vmul.f32 %v1341_v41, %v1341_v41  ;;  %v1956_v32 = vmin.f32 %v1892_v1, 1.0737418e+09  ;;  %v5363_v44 = vadd.f32 %v1167_v21, %v7837_v31  ;;  %v7838_v33 = vld [vmem:[#allocation67_spill] sm:$0xff]  ;;  %v7840_v35 = vld [vmem:[#allocation64_spill] sm:$0xff] }
 0x1c8   : > { %7836 = vst [vmem:[#allocation63_spill] sm:$0xff] %v5360_v23  ;;  %v5366_v62 = vadd.f32 %v1168_v24, %v7838_v33  ;;  %v1046_v5 = vsub.f32 %v7834_v52, %v4897_v45  ;;  %v1065_v58 = vsub.f32 %v7839_v48, %v4889_v40  ;;  %v5373_v53 = vadd.f32 %v1187_v43, %v7840_v35  ;;  %v7843_v41 = vld [vmem:[#allocation103_spill] sm:$0xff] }
 0x1c9   : > { %v1955_v6 = vmin.f32 %v1891_v28, 1.0737418e+09  ;;  %v5376_v57 = vadd.f32 %v1188_v51, %v7841_v55  ;;  %v5379_v20 = vadd.f32 %v1207_v4, %v7842_v12  ;;  %v5382_v28 = vadd.f32 %v1208_v50, %v7843_v41  ;;  %v7844_v24 = vld [vmem:[#allocation59_spill] sm:$0xff]  ;;  %v7846_v12 = vld [vmem:[#allocation37_spill] sm:$0xff]  ;;  %v7847_v41 = vld [vmem:[#allocation76_spill] sm:$0xff] }
 0x1ca   : > { %v1173_v1 = vmul.f32 %v1045_v9, %v1045_v9  ;;  %v1066_v21 = vsub.f32 %v7839_v48, %v4897_v45  ;;  %v1306_v52 = vsub.f32 %v7844_v24, %v5042_v27  ;;  %v1307_v43 = vsub.f32 %v7844_v24, %v5044_v47  ;;  %v7845_v35 = vld [vmem:[#allocation75_spill] sm:$0xff] }
 0x1cb   : > { %v2165_v31 = vmin.f32 %v1635_v13, %v1636_v15  ;;  %v2709_v33 = vmin.f32 %v1955_v6, %v1956_v32  ;;  %v1601_v51 = vadd.f32 %v1537_v19, %v5379_v20  ;;  %v1602_v4 = vadd.f32 %v1538_v49, %v5382_v28  ;;  %v7848_v13 = vld [vmem:[#allocation38_spill] sm:$0xff] }
 0x1cc   : > { %v5358_v29 = vpop.permute.xlu2 %759  ;;  %v5393_v55 = vadd.f32 %v1171_v0, %v7845_v35  ;;  %v1174_v50 = vmul.f32 %v1046_v5, %v1046_v5  ;;  %v1193_v9 = vmul.f32 %v1065_v58, %v1065_v58  ;;  %v1051_v48 = vsub.f32 %v7846_v12, %v4889_v40  ;;  %v7849_v0 = vld [vmem:[#allocation73_spill] sm:$0xff] }
 0x1cd   : > { %7835 = vst [vmem:[#allocation57_spill] sm:$0xff] %v5358_v29  ;;  %v5398_v23 = vadd.f32 %v1172_v17, %v7847_v41  ;;  %v1052_v24 = vsub.f32 %v7846_v12, %v4897_v45  ;;  %v1071_v15 = vsub.f32 %v7848_v13, %v4889_v40  ;;  %v5404_v19 = vpop.permute.xlu1 %731  ;;  %v5407_v49 = vadd.f32 %v1173_v1, %v7849_v0  ;;  %v7850_v17 = vld [vmem:[#allocation39_spill] sm:$0xff]  ;;  %v7854_v1 = vld [vmem:[#allocation69_spill] sm:$0xff] }
 0x1ce   : > { %2710 = vmin.xlane.f32.xlu1 %v2709_v33  ;;  %v1194_v6 = vmul.f32 %v1066_v21, %v1066_v21  ;;  %v1072_v32 = vsub.f32 %v7848_v13, %v4897_v45  ;;  %v1055_v5 = vsub.f32 %v7850_v17, %v4889_v40  ;;  %v1503_v12 = vmul.f32 %v1306_v52, %v1306_v52 }
 0x1cf   : > { %2166 = vmin.xlane.f32.xlu2 %v2165_v31  ;;  %v5415_v35 = vpop.permute.xlu0 %763  ;;  %v1504_v41 = vmul.f32 %v1307_v43, %v1307_v43  ;;  %v1665_v31 = vmin.f32 %v1601_v51, 1.0737418e+09  ;;  %v1666_v54 = vmin.f32 %v1602_v4, 1.0737418e+09  ;;  %v5418_v33 = vadd.f32 %v1174_v50, %v7853_v42  ;;  %v7856_v42 = vld [vmem:[#allocation41_spill] sm:$0xff] }
 0x1d0   : > { %7852 = vst [vmem:[#allocation32_spill] sm:$0xff] %v5415_v35  ;;  %v5421_v0 = vadd.f32 %v1193_v9, %v7854_v1  ;;  %v1179_v21 = vmul.f32 %v1051_v48, %v1051_v48  ;;  %v1056_v13 = vsub.f32 %v7850_v17, %v4897_v45  ;;  %v1180_v29 = vmul.f32 %v1052_v24, %v1052_v24  ;;  %v7857_v9 = vld [vmem:[#allocation42_spill] sm:$0xff]  ;;  %v7858_v1 = vld [vmem:[#allocation72_spill] sm:$0xff] }
 0x1d1   : > { %v1199_v7 = vmul.f32 %v1071_v15, %v1071_v15  ;;  %v1057_v30 = vsub.f32 %v7855_v16, %v4889_v40  ;;  %v1058_v52 = vsub.f32 %v7855_v16, %v4897_v45  ;;  %v1200_v43 = vmul.f32 %v1072_v32, %v1072_v32  ;;  %v7859_v16 = vld [vmem:[#allocation79_spill] sm:$0xff] }
 0x1d2   : > { %v1183_v51 = vmul.f32 %v1055_v5, %v1055_v5  ;;  %v1077_v4 = vsub.f32 %v7856_v42, %v4889_v40  ;;  %v1078_v50 = vsub.f32 %v7856_v42, %v4897_v45  ;;  %v1061_v48 = vsub.f32 %v7857_v9, %v4889_v40 }
 0x1d3   : > { %v1567_v24 = vadd.f32 %v1503_v12, %v5407_v49  ;;  %v1568_v15 = vadd.f32 %v1504_v41, %v5418_v33  ;;  %v2210_v17 = vmin.f32 %v1665_v31, %v1666_v54  ;;  %v5438_v35 = vadd.f32 %v1194_v6, %v7858_v1  ;;  %v7863_v12 = vld [vmem:[#allocation43_spill] sm:$0xff]  ;;  %v7865_v54 = vld [vmem:[#allocation77_spill] sm:$0xff]  ;;  %v7866_v31 = vld [vmem:[#allocation78_spill] sm:$0xff] }
 0x1d4   : > { %v5413_v58 = vpop.permute.xlu2 %771  ;;  %v5441_v32 = vadd.f32 %v1179_v21, %v7859_v16  ;;  %v1184_v5 = vmul.f32 %v1056_v13, %v1056_v13  ;;  %v1062_v18 = vsub.f32 %v7857_v9, %v4897_v45  ;;  %v5446_v42 = vadd.f32 %v1180_v29, %v7861_v25 }
 0x1d5   : > { %7851 = vst [vmem:[#allocation31_spill] sm:$0xff] %v5413_v58  ;;  %v1185_v38 = vmul.f32 %v1057_v30, %v1057_v30  ;;  %v1186_v2 = vmul.f32 %v1058_v52, %v1058_v52  ;;  %v1063_v39 = vsub.f32 %v7863_v12, %v4889_v40  ;;  %v5450_v41 = vpop.permute.xlu1 %743  ;;  %v5453_v6 = vadd.f32 %v1199_v7, %v7865_v54  ;;  %v7868_v30 = vld [vmem:[#allocation85_spill] sm:$0xff] }
 0x1d6   : > { %7860 = vst [vmem:[#allocation33_spill] sm:$0xff] %v5441_v32  ;;  %2211 = vmin.xlane.f32.xlu1 %v2210_v17  ;;  %v5456_v21 = vadd.f32 %v1200_v43, %v7866_v31  ;;  %v1205_v13 = vmul.f32 %v1077_v4, %v1077_v4  ;;  %v1206_v1 = vmul.f32 %v1078_v50, %v1078_v50  ;;  %v1631_v16 = vmin.f32 %v1567_v24, 1.0737418e+09  ;;  %v7872_v4 = vld [vmem:[#allocation44_spill] sm:$0xff]  ;;  %v7873_v54 = vld [vmem:[#allocation13_spill] sm:$0xff]  ;;  %v7877_v24 = vld [vmem:[#allocation11_spill] sm:$0xff] }
 0x1d7   : > { %7862 = vst [vmem:[#allocation81_spill] sm:$0xff] %v5446_v42  ;;  %v5460_v25 = vpop.permute.xlu0 %775  ;;  %v5463_v29 = vadd.f32 %v1183_v51, %v7868_v30  ;;  %v1189_v52 = vmul.f32 %v1061_v48, %v1061_v48  ;;  %v1632_v42 = vmin.f32 %v1568_v15, 1.0737418e+09  ;;  %v1190_v7 = vmul.f32 %v1062_v18, %v1062_v18  ;;  %v7875_v32 = vld [vmem:[#allocation84_spill] sm:$0xff]  ;;  %v7879_v18 = vld [vmem:[#allocation82_spill] sm:$0xff]  ;;  %v7882_v30 = vld [vmem:[#allocation89_spill] sm:$0xff] }
 0x1d8   : > { %7864 = vst [vmem:[#allocation48_spill] sm:$0xff] %v5450_v41  ;;  %v7870_v41 = vld [vmem:[#allocation86_spill] sm:$0xff]  ;;  %v1064_v43 = vsub.f32 %v7863_v12, %v4897_v45  ;;  %v1067_v50 = vsub.f32 %v7872_v4, %v4889_v40  ;;  %v5473_v31 = vadd.f32 %v1185_v38, %v7873_v54  ;;  %v5476_v26 = vadd.f32 %v1186_v2, %v7875_v32  ;;  %v7884_v2 = vld [vmem:[#allocation47_spill] sm:$0xff]  ;;  %v7896_v58 = vld [vmem:[#allocation97_spill] sm:$0xff] }
 0x1d9   : > { %7867 = vst [vmem:[#allocation34_spill] sm:$0xff] %v5460_v25  ;;  %v5466_v17 = vadd.f32 %v1184_v5, %v7870_v41  ;;  %v1191_v51 = vmul.f32 %v1063_v39, %v1063_v39  ;;  %v1068_v48 = vsub.f32 %v7872_v4, %v4897_v45  ;;  %v5481_v15 = vadd.f32 %v1205_v13, %v7877_v24  ;;  %v7881_v12 = vld [vmem:[#allocation46_spill] sm:$0xff] }
 0x1da   : > { %7869 = vst [vmem:[#allocation66_spill] sm:$0xff] %v5463_v29  ;;  %v5484_v5 = vadd.f32 %v1206_v1, %v7879_v18  ;;  %v1073_v41 = vsub.f32 %v7881_v12, %v4889_v40  ;;  %v1074_v38 = vsub.f32 %v7881_v12, %v4897_v45  ;;  %v5491_v54 = vadd.f32 %v1189_v52, %v7882_v30  ;;  %v7885_v4 = vld [vmem:[#allocation14_spill] sm:$0xff]  ;;  %v7890_v30 = vld [vmem:[#allocation45_spill] sm:$0xff] }
 0x1db   : > { %7871 = vst [vmem:[#allocation67_spill] sm:$0xff] %v5466_v17  ;;  %v1075_v39 = vsub.f32 %v7884_v2, %v4889_v40  ;;  %v1076_v32 = vsub.f32 %v7884_v2, %v4897_v45  ;;  %v2159_v13 = vmin.f32 %v1631_v16, %v1632_v42  ;;  %v5498_v24 = vadd.f32 %v1190_v7, %v7885_v4 }
 0x1dc   : > { %v5458_v9 = vpop.permute.xlu2 %783  ;;  %7874 = vst [vmem:[#allocation35_spill] sm:$0xff] %v5473_v31  ;;  %v1192_v1 = vmul.f32 %v1064_v43, %v1064_v43  ;;  %v1195_v18 = vmul.f32 %v1067_v50, %v1067_v50  ;;  %v5503_v12 = vadd.f32 %v1191_v51, %v7888_v56  ;;  %v5505_v52 = vmul.f32 %v1068_v48, %v1068_v48 }
 0x1dd   : > { %7876 = vst [vmem:[#allocation64_spill] sm:$0xff] %v5476_v26  ;;  %v7887_v26 = vld [vmem:[#allocation49_spill] sm:$0xff]  ;;  %v1070_v2 = vsub.f32 %v7890_v30, %v4897_v45  ;;  %v5511_v42 = vpop.permute.xlu1 %755  ;;  %v1201_v16 = vmul.f32 %v1073_v41, %v1073_v41  ;;  %v1202_v7 = vmul.f32 %v1074_v38, %v1074_v38  ;;  %v1373_v43 = vsub.f32 %v5296_v10, %v5326_v63  ;;  %v7894_v41 = vld [vmem:[#allocation16_spill] sm:$0xff] }
 0x1de   : > { %7878 = vst [vmem:[#allocation65_spill] sm:$0xff] %v5481_v15  ;;  %v1302_v31 = vsub.f32 %v7887_v26, %v5042_v27  ;;  %2160 = vmin.xlane.f32.xlu1 %v2159_v13  ;;  %v1374_v56 = vsub.f32 %v5296_v10, %v5328_v46  ;;  %v1203_v48 = vmul.f32 %v1075_v39, %v1075_v39 }
 0x1df   : > { %7880 = vst [vmem:[#allocation102_spill] sm:$0xff] %v5484_v5  ;;  %v5517_v51 = vpop.permute.xlu0 %787  ;;  %v1204_v4 = vmul.f32 %v1076_v32, %v1076_v32  ;;  %v5525_v38 = vadd.f32 %v1195_v18, %v7894_v41  ;;  %v1303_v13 = vsub.f32 %v7887_v26, %v5044_v47  ;;  %v5534_v34 = vadd.f32 %v1201_v16, %v7896_v58  ;;  %v7898_v18 = vld [vmem:[#allocation95_spill] sm:$0xff]  ;;  %v7900_v58 = vld [vmem:[#allocation53_spill] sm:$0xff] }
 0x1e0   : > { %7883 = vst [vmem:[#allocation103_spill] sm:$0xff] %v5491_v54  ;;  %v1069_v54 = vsub.f32 %v7890_v30, %v4889_v40  ;;  %v7892_v30 = vld [vmem:[#allocation88_spill] sm:$0xff]  ;;  %v5540_v41 = vadd.f32 %v1203_v48, %v7898_v18  ;;  %v1314_v16 = vsub.f32 %v7900_v58, %v5042_v27 }
 0x1e1   : > { %7886 = vst [vmem:[#allocation59_spill] sm:$0xff] %v5498_v24  ;;  %v5531_v24 = vmul.f32 %v1070_v2, %v1070_v2  ;;  %v1500_v2 = vmul.f32 %v1303_v13, %v1303_v13 }
 0x1e2   : > { %7889 = vst [vmem:[#allocation75_spill] sm:$0xff] %v5503_v12  ;;  %v1499_v12 = vmul.f32 %v1302_v31, %v1302_v31  ;;  %v5529_v10 = vmul.f32 %v1069_v54, %v1069_v54 }
 0x1e3   : > { %7891 = vst [vmem:[#allocation37_spill] sm:$0xff] %v5511_v42  ;;  %v5522_v42 = vadd.f32 %v1192_v1, %v7892_v30  ;;  %v1821_v1 = vmul.f32 %v1373_v43, %v1373_v43  ;;  %v1822_v30 = vmul.f32 %v1374_v56, %v1374_v56  ;;  %v7901_v43 = vld [vmem:[#allocation54_spill] sm:$0xff] }
 0x1e4   : > { %v796_v50 = vpop.permute.xlu2 %795  ;;  %7895 = vst [vmem:[#allocation38_spill] sm:$0xff] %v5525_v38  ;;  %v1304_v56 = vsub.f32 %v7901_v43, %v5042_v27 }
 0x1e5   : > { %v1407_v40 = vsub.f32 %v796_v50, %v5326_v63  ;;  %v1408_v45 = vsub.f32 %v796_v50, %v5328_v46  ;;  %7893 = vst [vmem:[#allocation76_spill] sm:$0xff] %v5522_v42  ;;  %v7897_v50 = vld [vmem:[#allocation98_spill] sm:$0xff]  ;;  %v7899_v42 = vld [vmem:[#allocation19_spill] sm:$0xff]  ;;  %v1885_v13 = vadd.f32 %v1821_v1, %v5393_v55 }
 0x1e6   : > { %v5537_v25 = vadd.f32 %v1202_v7, %v7897_v50  ;;  %v5543_v26 = vadd.f32 %v1204_v4, %v7899_v42  ;;  %v1315_v7 = vsub.f32 %v7900_v58, %v5044_v47  ;;  %v7902_v42 = vld [vmem:[#allocation21_spill] sm:$0xff]  ;;  %v1375_v50 = vsub.f32 %v5404_v19, %v5326_v63  ;;  %v7904_v1 = vld [vmem:[#allocation55_spill] sm:$0xff] }
 0x1e7   : > { %v1855_v39 = vmul.f32 %v1407_v40, %v1407_v40  ;;  %v1856_v32 = vmul.f32 %v1408_v45, %v1408_v45  ;;  %v5548_v40 = vadd.f32 %v1499_v12, %v5176_v36  ;;  %v1334_v48 = vsub.f32 %v7902_v42, %v5042_v27  ;;  %v800_v18 = vpop.permute.xlu0 %799 }
 0x1e8   : > { %v1335_v12 = vsub.f32 %v7902_v42, %v5044_v47  ;;  %v1376_v58 = vsub.f32 %v5404_v19, %v5328_v46  ;;  %v1409_v36 = vsub.f32 %v800_v18, %v5326_v63  ;;  %v1512_v38 = vmul.f32 %v1315_v7, %v1315_v7 }
 0x1e9   : > { %v1919_v31 = vadd.f32 %v1855_v39, %v5481_v15  ;;  %v1920_v54 = vadd.f32 %v1856_v32, %v5484_v5  ;;  %v5558_v39 = vpop.permute.xlu1 %767  ;;  %v1886_v32 = vadd.f32 %v1822_v30, %v5398_v23  ;;  %v1305_v42 = vsub.f32 %v7901_v43, %v5044_v47  ;;  %v7905_v15 = vld [vmem:[#allocation56_spill] sm:$0xff] }
 0x1ea   : > { %7903 = vst [vmem:[#allocation73_spill] sm:$0xff] %v5558_v39  ;;  %v1511_v39 = vmul.f32 %v1314_v16, %v1314_v16  ;;  %v1300_v30 = vsub.f32 %v7904_v1, %v5042_v27  ;;  %v1301_v5 = vsub.f32 %v7904_v1, %v5044_v47  ;;  %v1320_v37 = vsub.f32 %v7905_v15, %v5042_v27 }
 0x1eb   : > { %v1983_v4 = vmin.f32 %v1919_v31, 1.0737418e+09  ;;  %v1984_v45 = vmin.f32 %v1920_v54, 1.0737418e+09  ;;  %v1410_v31 = vsub.f32 %v800_v18, %v5328_v46  ;;  %v1857_v19 = vmul.f32 %v1409_v36, %v1409_v36  ;;  %v7906_v36 = vld [vmem:[#allocation25_spill] sm:$0xff] }
 0x1ec   : > { %v1531_v14 = vmul.f32 %v1334_v48, %v1334_v48  ;;  %v1532_v18 = vmul.f32 %v1335_v12, %v1335_v12  ;;  %v1950_v16 = vmin.f32 %v1886_v32, 1.0737418e+09  ;;  %v1823_v7 = vmul.f32 %v1375_v50, %v1375_v50 }
 0x1ed   : > { %v2751_v54 = vmin.f32 %v1983_v4, %v1984_v45  ;;  %v1858_v61 = vmul.f32 %v1410_v31, %v1410_v31  ;;  %v1949_v4 = vmin.f32 %v1885_v13, 1.0737418e+09  ;;  %v1824_v45 = vmul.f32 %v1376_v58, %v1376_v58 }
 0x1ee   : > { %v1921_v43 = vadd.f32 %v1857_v19, %v5379_v20  ;;  %v1501_v59 = vmul.f32 %v1304_v56, %v1304_v56  ;;  %v1502_v17 = vmul.f32 %v1305_v42, %v1305_v42  ;;  %v1497_v29 = vmul.f32 %v1300_v30, %v1300_v30 }
 0x1ef   : > { %2752 = vmin.xlane.f32.xlu1 %v2751_v54  ;;  %v1922_v60 = vadd.f32 %v1858_v61, %v5382_v28  ;;  %v1321_v1 = vsub.f32 %v7905_v15, %v5044_v47  ;;  %v1336_v31 = vsub.f32 %v7906_v36, %v5042_v27  ;;  %v1337_v48 = vsub.f32 %v7906_v36, %v5044_v47 }
 0x1f0   : > { %v1985_v13 = vmin.f32 %v1921_v43, 1.0737418e+09  ;;  %v1498_v50 = vmul.f32 %v1301_v5, %v1301_v5  ;;  %v1517_v20 = vmul.f32 %v1320_v37, %v1320_v37  ;;  %v1595_v61 = vadd.f32 %v1531_v14, %v5534_v34 }
 0x1f1   : > { %v5586_v12 = vpop.permute.xlu1 %779  ;;  %v1986_v32 = vmin.f32 %v1922_v60, 1.0737418e+09  ;;  %v1596_v28 = vadd.f32 %v1532_v18, %v5537_v25  ;;  %v2700_v56 = vmin.f32 %v1949_v4, %v1950_v16  ;;  %v1887_v15 = vadd.f32 %v1823_v7, %v5407_v49 }
 0x1f2   : > { %v1888_v54 = vadd.f32 %v1824_v45, %v5418_v33  ;;  %v1564_v42 = vadd.f32 %v1500_v2, %v5304_v22  ;;  %v1565_v30 = vadd.f32 %v1501_v59, %v5393_v55  ;;  %v1566_v19 = vadd.f32 %v1502_v17, %v5398_v23  ;;  %v7907_v45 = vld [vmem:[#allocation60_spill] sm:$0xff] }
 0x1f3   : > { %v2754_v58 = vmin.f32 %v1985_v13, %v1986_v32  ;;  %v1518_v43 = vmul.f32 %v1321_v1, %v1321_v1  ;;  %v1575_v60 = vadd.f32 %v1511_v39, %v5307_v11  ;;  %v1533_v37 = vmul.f32 %v1336_v31, %v1336_v31 }
 0x1f4   : > { %v1534_v5 = vmul.f32 %v1337_v48, %v1337_v48  ;;  %v1627_v14 = vmin.f32 %v5548_v40, 1.0737418e+09  ;;  %v1576_v18 = vadd.f32 %v1512_v38, %v5320_v3  ;;  %v1561_v49 = vadd.f32 %v1497_v29, %v5363_v44 }
 0x1f5   : > { %2755 = vmin.xlane.f32.xlu0 %v2754_v58  ;;  %v1562_v33 = vadd.f32 %v1498_v50, %v5366_v62  ;;  %v1581_v2 = vadd.f32 %v1517_v20, %v5373_v53  ;;  %v1659_v59 = vmin.f32 %v1595_v61, 1.0737418e+09  ;;  %v1660_v55 = vmin.f32 %v1596_v28, 1.0737418e+09  ;;  %v7908_v58 = vld [vmem:[#allocation61_spill] sm:$0xff] }
 0x1f6   : > { %v1951_v23 = vmin.f32 %v1887_v15, 1.0737418e+09  ;;  %v1952_v17 = vmin.f32 %v1888_v54, 1.0737418e+09  ;;  %v1582_v39 = vadd.f32 %v1518_v43, %v5376_v57  ;;  %v1628_v4 = vmin.f32 %v1564_v42, 1.0737418e+09 }
 0x1f7   : > { %2701 = vmin.xlane.f32.xlu1 %v2700_v56  ;;  %v1629_v16 = vmin.f32 %v1565_v30, 1.0737418e+09  ;;  %v1630_v7 = vmin.f32 %v1566_v19, 1.0737418e+09  ;;  %v1326_v40 = vsub.f32 %v7907_v45, %v5042_v27  ;;  %v1597_v29 = vadd.f32 %v1533_v37, %v5540_v41  ;;  %v7909_v30 = vld [vmem:[#allocation24_spill] sm:$0xff] }
 0x1f8   : > { %v1598_v38 = vadd.f32 %v1534_v5, %v5543_v26  ;;  %v1639_v36 = vmin.f32 %v1575_v60, 1.0737418e+09  ;;  %v1401_v31 = vsub.f32 %v5458_v9, %v5326_v63  ;;  %v1402_v48 = vsub.f32 %v5458_v9, %v5328_v46  ;;  %v7910_v37 = vld [vmem:[#allocation92_spill] sm:$0xff] }
 0x1f9   : > { %v5604_v1 = vpop.permute.xlu1 %791  ;;  %v1625_v13 = vmin.f32 %v1561_v49, 1.0737418e+09  ;;  %v1640_v32 = vmin.f32 %v1576_v18, 1.0737418e+09  ;;  %v2201_v50 = vmin.f32 %v1659_v59, %v1660_v55  ;;  %v2703_v20 = vmin.f32 %v1951_v23, %v1952_v17  ;;  %v7911_v18 = vld [vmem:[#allocation93_spill] sm:$0xff] }
 0x1fa   : > { %v1626_v61 = vmin.f32 %v1562_v33, 1.0737418e+09  ;;  %v1645_v28 = vmin.f32 %v1581_v2, 1.0737418e+09  ;;  %v1327_v56 = vsub.f32 %v7907_v45, %v5044_v47  ;;  %v1316_v15 = vsub.f32 %v7908_v58, %v5042_v27 }
 0x1fb   : > { %v1317_v54 = vsub.f32 %v7908_v58, %v5044_v47  ;;  %v1646_v42 = vmin.f32 %v1582_v39, 1.0737418e+09  ;;  %v5620_v19 = vadd.f32 %v5505_v52, %v7909_v30  ;;  %v1523_v9 = vmul.f32 %v1326_v40, %v1326_v40 }
 0x1fc   : > { %v1661_v43 = vmin.f32 %v1597_v29, 1.0737418e+09  ;;  %v1662_v60 = vmin.f32 %v1598_v38, 1.0737418e+09  ;;  %v5624_v5 = vadd.f32 %v5529_v10, %v7910_v37  ;;  %v5628_v49 = vadd.f32 %v5531_v24, %v7911_v18 }
 0x1fd   : > { %2704 = vmin.xlane.f32.xlu0 %v2703_v20  ;;  %v1849_v33 = vmul.f32 %v1401_v31, %v1401_v31  ;;  %v1850_v2 = vmul.f32 %v1402_v48, %v1402_v48  ;;  %v2150_v59 = vmin.f32 %v1625_v13, %v1626_v61  ;;  %v5630_v55 = vmin.f32 %v1627_v14, %v1628_v4 }
 0x1fe   : > { %v5632_v52 = vmin.f32 %v1629_v16, %v1630_v7  ;;  %v5634_v23 = vmin.f32 %v1639_v36, %v1640_v32  ;;  %v1524_v17 = vmul.f32 %v1327_v56, %v1327_v56  ;;  %v1513_v39 = vmul.f32 %v1316_v15, %v1316_v15  ;;  %v7914_v56 = vld [vmem:[#allocation67_spill] sm:$0xff] }
 0x1ff   : > { %2202 = vmin.xlane.f32.xlu1 %v2201_v50  ;;  %v1514_v45 = vmul.f32 %v1317_v54, %v1317_v54  ;;  %v5636_v40 = vmin.f32 %v1645_v28, %v1646_v42  ;;  %v5639_v10 = vadd.f32 %v1523_v9, %v5421_v0  ;;  %v1377_v24 = vsub.f32 %v5294_v8, %v5326_v63  ;;  %v7913_v50 = vld [vmem:[#allocation66_spill] sm:$0xff] }
 0x200   : > { %7912 = vst [vmem:[#allocation39_spill] sm:$0xff] %v5634_v23  ;;  %v1378_v29 = vsub.f32 %v5294_v8, %v5328_v46  ;;  %v2204_v4 = vmin.f32 %v1661_v43, %v1662_v60  ;;  %v1913_v16 = vadd.f32 %v1849_v33, %v5453_v6  ;;  %v1914_v7 = vadd.f32 %v1850_v2, %v5456_v21  ;;  %v7916_v43 = vld [vmem:[#allocation30_spill] sm:$0xff] }
 0x201   : > { %v804_v14 = vpop.permute.xlu1 %803  ;;  %v1403_v31 = vsub.f32 %v5517_v51, %v5326_v63  ;;  %v1404_v48 = vsub.f32 %v5517_v51, %v5328_v46  ;;  %v1399_v13 = vsub.f32 %v5586_v12, %v5326_v63  ;;  %v1400_v8 = vsub.f32 %v5586_v12, %v5328_v46  ;;  %v7915_v12 = vld [vmem:[#allocation29_spill] sm:$0xff] }
 0x202   : > { %v1411_v38 = vsub.f32 %v804_v14, %v5326_v63  ;;  %v1412_v36 = vsub.f32 %v804_v14, %v5328_v46  ;;  %v5658_v32 = vadd.f32 %v1524_v17, %v5438_v35  ;;  %v5661_v20 = vadd.f32 %v1513_v39, %v7913_v50  ;;  %v7917_v17 = vld [vmem:[#allocation15_spill] sm:$0xff] }
 0x203   : > { %v5664_v58 = vadd.f32 %v1514_v45, %v7914_v56  ;;  %v1825_v15 = vmul.f32 %v1377_v24, %v1377_v24  ;;  %v1826_v54 = vmul.f32 %v1378_v29, %v1378_v29  ;;  %v1651_v51 = vmin.f32 %v5639_v10, 1.0737418e+09  ;;  %v7918_v29 = vld [vmem:[#allocation111_spill] sm:$0xff] }
 0x204   : > { %v1859_v61 = vmul.f32 %v1411_v38, %v1411_v38  ;;  %v1860_v28 = vmul.f32 %v1412_v36, %v1412_v36  ;;  %v1977_v42 = vmin.f32 %v1913_v16, 1.0737418e+09  ;;  %v1978_v30 = vmin.f32 %v1914_v7, 1.0737418e+09  ;;  %v7920_v7 = vld [vmem:[#allocation62_spill] sm:$0xff] }
 0x205   : > { %2205 = vmin.xlane.f32.xlu0 %v2204_v4  ;;  %v1851_v37 = vmul.f32 %v1403_v31, %v1403_v31  ;;  %v1852_v18 = vmul.f32 %v1404_v48, %v1404_v48  ;;  %v1847_v33 = vmul.f32 %v1399_v13, %v1399_v13  ;;  %v1848_v2 = vmul.f32 %v1400_v8, %v1400_v8  ;;  %v7919_v4 = vld [vmem:[#allocation112_spill] sm:$0xff]  ;;  %v7921_v31 = vld [vmem:[#allocation34_spill] sm:$0xff] }
 0x206   : > { %v1923_v9 = vadd.f32 %v1859_v61, %v7915_v12  ;;  %v1924_v60 = vadd.f32 %v1860_v28, %v7916_v43  ;;  %v1338_v39 = vsub.f32 %v7917_v17, %v5042_v27  ;;  %v1339_v45 = vsub.f32 %v7917_v17, %v5044_v47 }
 0x207   : > { %2151 = vmin.xlane.f32.xlu1 %v2150_v59  ;;  %v1889_v14 = vadd.f32 %v1825_v15, %v7918_v29  ;;  %v1890_v16 = vadd.f32 %v1826_v54, %v7919_v4  ;;  %v1369_v38 = vsub.f32 %v7920_v7, %v5326_v63  ;;  %v1370_v36 = vsub.f32 %v7920_v7, %v5328_v46  ;;  %v7922_v29 = vld [vmem:[#allocation68_spill] sm:$0xff] }
 0x208   : > { %v1987_v59 = vmin.f32 %v1923_v9, 1.0737418e+09  ;;  %v1988_v24 = vmin.f32 %v1924_v60, 1.0737418e+09  ;;  %v1397_v48 = vsub.f32 %v7921_v31, %v5326_v63  ;;  %v1398_v13 = vsub.f32 %v7921_v31, %v5328_v46 }
 0x209   : > { %v2742_v61 = vmin.f32 %v1977_v42, %v1978_v30  ;;  %v1915_v28 = vadd.f32 %v1851_v37, %v5534_v34  ;;  %v1916_v15 = vadd.f32 %v1852_v18, %v5537_v25  ;;  %v1911_v54 = vadd.f32 %v1847_v33, %v5624_v5 }
 0x20a   : > { %v2757_v8 = vmin.f32 %v1987_v59, %v1988_v24  ;;  %v1912_v12 = vadd.f32 %v1848_v2, %v5628_v49  ;;  %v1535_v9 = vmul.f32 %v1338_v39, %v1338_v39  ;;  %v1652_v43 = vmin.f32 %v5658_v32, 1.0737418e+09 }
 0x20b   : > { %v1641_v60 = vmin.f32 %v5661_v20, 1.0737418e+09  ;;  %v1642_v17 = vmin.f32 %v5664_v58, 1.0737418e+09  ;;  %v1312_v59 = vsub.f32 %v7922_v29, %v5042_v27  ;;  %v1536_v42 = vmul.f32 %v1339_v45, %v1339_v45  ;;  %v7923_v58 = vld [vmem:[#allocation70_spill] sm:$0xff] }
 0x20c   : > { %2758 = vmin.xlane.f32.xlu2 %v2757_v8  ;;  %v1953_v30 = vmin.f32 %v1889_v14, 1.0737418e+09  ;;  %v1954_v34 = vmin.f32 %v1890_v16, 1.0737418e+09  ;;  %v1817_v25 = vmul.f32 %v1369_v38, %v1369_v38  ;;  %v1818_v37 = vmul.f32 %v1370_v36, %v1370_v36  ;;  %v7924_v14 = vld [vmem:[#allocation65_spill] sm:$0xff] }
 0x20d   : > { %2154 = vmin.xlane.f32.xlu0 %v5630_v55  ;;  %v1845_v18 = vmul.f32 %v1397_v48, %v1397_v48  ;;  %v1846_v33 = vmul.f32 %v1398_v13, %v1398_v13  ;;  %v1979_v2 = vmin.f32 %v1915_v28, 1.0737418e+09  ;;  %v1980_v39 = vmin.f32 %v1916_v15, 1.0737418e+09  ;;  %v7925_v55 = vld [vmem:[#allocation102_spill] sm:$0xff]  ;;  %v7926_v38 = vld [vmem:[#allocation117_spill] sm:$0xff] }
 0x20e   : > { %v1975_v32 = vmin.f32 %v1911_v54, 1.0737418e+09  ;;  %v1976_v24 = vmin.f32 %v1912_v12, 1.0737418e+09  ;;  %v1313_v20 = vsub.f32 %v7922_v29, %v5044_v47  ;;  %v1332_v4 = vsub.f32 %v7923_v58, %v5042_v27  ;;  %v7928_v54 = vld [vmem:[#allocation38_spill] sm:$0xff] }
 0x20f   : > { %2743 = vmin.xlane.f32.xlu1 %v2742_v61  ;;  %v1333_v45 = vsub.f32 %v7923_v58, %v5044_v47  ;;  %v1599_v16 = vadd.f32 %v1535_v9, %v7924_v14  ;;  %v1600_v7 = vadd.f32 %v1536_v42, %v7925_v55  ;;  %v1367_v36 = vsub.f32 %v7926_v38, %v5326_v63  ;;  %v7927_v61 = vld [vmem:[#allocation31_spill] sm:$0xff] }
 0x210   : > { %v1368_v31 = vsub.f32 %v7926_v38, %v5328_v46  ;;  %v2706_v48 = vmin.f32 %v1953_v30, %v1954_v34  ;;  %v1881_v13 = vadd.f32 %v1817_v25, %v5363_v44  ;;  %v1882_v8 = vadd.f32 %v1818_v37, %v5366_v62  ;;  %v7929_v30 = vld [vmem:[#allocation71_spill] sm:$0xff] }
 0x211   : > { %v1395_v28 = vsub.f32 %v7927_v61, %v5326_v63  ;;  %v1396_v15 = vsub.f32 %v7927_v61, %v5328_v46  ;;  %v1909_v12 = vadd.f32 %v1845_v18, %v7928_v54  ;;  %v1910_v9 = vadd.f32 %v1846_v33, %v5620_v19  ;;  %v7933_v61 = vld [vmem:[#allocation120_spill] sm:$0xff] }
 0x212   : > { %v2739_v29 = vmin.f32 %v1975_v32, %v1976_v24  ;;  %v2745_v42 = vmin.f32 %v1979_v2, %v1980_v39  ;;  %v1509_v58 = vmul.f32 %v1312_v59, %v1312_v59  ;;  %v1510_v14 = vmul.f32 %v1313_v20, %v1313_v20 }
 0x213   : > { %v1322_v34 = vsub.f32 %v7929_v30, %v5042_v27  ;;  %v1323_v44 = vsub.f32 %v7929_v30, %v5044_v47  ;;  %v1815_v62 = vmul.f32 %v1367_v36, %v1367_v36  ;;  %v1816_v25 = vmul.f32 %v1368_v31, %v1368_v31  ;;  %v7931_v36 = vld [vmem:[#allocation28_spill] sm:$0xff] }
 0x214   : > { %2707 = vmin.xlane.f32.xlu2 %v2706_v48  ;;  %v1663_v37 = vmin.f32 %v1599_v16, 1.0737418e+09  ;;  %v1664_v55 = vmin.f32 %v1600_v7, 1.0737418e+09  ;;  %v1945_v18 = vmin.f32 %v1881_v13, 1.0737418e+09  ;;  %v1946_v38 = vmin.f32 %v1882_v8, 1.0737418e+09  ;;  %v7932_v13 = vld [vmem:[#allocation119_spill] sm:$0xff] }
 0x215   : > { %2746 = vmin.xlane.f32.xlu0 %v2745_v42  ;;  %v1843_v33 = vmul.f32 %v1395_v28, %v1395_v28  ;;  %v5719_v59 = vmin.f32 %v1651_v51, %v1652_v43  ;;  %v1844_v2 = vmul.f32 %v1396_v15, %v1396_v15  ;;  %v1973_v39 = vmin.f32 %v1909_v12, 1.0737418e+09  ;;  %v7934_v28 = vld [vmem:[#allocation73_spill] sm:$0xff] }
 0x216   : > { %v1974_v32 = vmin.f32 %v1910_v9, 1.0737418e+09  ;;  %v5721_v24 = vmin.f32 %v1641_v60, %v1642_v17  ;;  %v1529_v20 = vmul.f32 %v1332_v4, %v1332_v4  ;;  %v1530_v48 = vmul.f32 %v1333_v45, %v1333_v45 }
 0x217   : > { %2740 = vmin.xlane.f32.xlu1 %v2739_v29  ;;  %v1365_v31 = vsub.f32 %v7931_v36, %v5326_v63  ;;  %v1366_v16 = vsub.f32 %v7931_v36, %v5328_v46  ;;  %v1519_v7 = vmul.f32 %v1322_v34, %v1322_v34  ;;  %v1879_v8 = vadd.f32 %v1815_v62, %v7932_v13  ;;  %v7935_v29 = vld [vmem:[#allocation33_spill] sm:$0xff] }
 0x218   : > { %7930 = vst [vmem:[#allocation74_spill] sm:$0xff] %v5721_v24  ;;  %v1880_v10 = vadd.f32 %v1816_v25, %v7933_v61  ;;  %v2207_v51 = vmin.f32 %v1663_v37, %v1664_v55  ;;  %v1907_v43 = vadd.f32 %v1843_v33, %v5421_v0  ;;  %v1405_v60 = vsub.f32 %v5604_v1, %v5326_v63  ;;  %v7936_v62 = vld [vmem:[#allocation81_spill] sm:$0xff] }
 0x219   : > { %v1406_v17 = vsub.f32 %v5604_v1, %v5328_v46  ;;  %v2694_v4 = vmin.f32 %v1945_v18, %v1946_v38  ;;  %v1908_v45 = vadd.f32 %v1844_v2, %v5438_v35  ;;  %v1393_v15 = vsub.f32 %v7934_v28, %v5326_v63  ;;  %v7937_v18 = vld [vmem:[#allocation103_spill] sm:$0xff] }
 0x21a   : > { %v1394_v12 = vsub.f32 %v7934_v28, %v5328_v46  ;;  %v2736_v9 = vmin.f32 %v1973_v39, %v1974_v32  ;;  %v5740_v42 = vadd.f32 %v1509_v58, %v7935_v29  ;;  %v1520_v0 = vmul.f32 %v1323_v44, %v1323_v44  ;;  %v7938_v32 = vld [vmem:[#allocation59_spill] sm:$0xff] }
 0x21b   : > { %v1813_v30 = vmul.f32 %v1365_v31, %v1365_v31  ;;  %v1814_v34 = vmul.f32 %v1366_v16, %v1366_v16  ;;  %v5743_v25 = vadd.f32 %v1510_v14, %v7936_v62  ;;  %v5746_v1 = vadd.f32 %v1529_v20, %v5453_v6  ;;  %v7939_v6 = vld [vmem:[#allocation23_spill] sm:$0xff]  ;;  %v7940_v31 = vld [vmem:[#allocation104_spill] sm:$0xff] }
 0x21c   : > { %2208 = vmin.xlane.f32.xlu2 %v2207_v51  ;;  %v1943_v35 = vmin.f32 %v1879_v8, 1.0737418e+09  ;;  %v1944_v37 = vmin.f32 %v1880_v10, 1.0737418e+09  ;;  %v5749_v55 = vadd.f32 %v1530_v48, %v5456_v21  ;;  %v5752_v58 = vadd.f32 %v1519_v7, %v7937_v18  ;;  %v7941_v21 = vld [vmem:[#allocation116_spill] sm:$0xff]  ;;  %v7944_v28 = vld [vmem:[#allocation75_spill] sm:$0xff] }
 0x21d   : > { %2695 = vmin.xlane.f32.xlu0 %v2694_v4  ;;  %v1853_v44 = vmul.f32 %v1405_v60, %v1405_v60  ;;  %v1854_v38 = vmul.f32 %v1406_v17, %v1406_v17  ;;  %v1971_v33 = vmin.f32 %v1907_v43, 1.0737418e+09  ;;  %v1972_v2 = vmin.f32 %v1908_v45, 1.0737418e+09  ;;  %v7942_v8 = vld [vmem:[#allocation36_spill] sm:$0xff] }
 0x21e   : > { %v1841_v39 = vmul.f32 %v1393_v15, %v1393_v15  ;;  %v1842_v14 = vmul.f32 %v1394_v12, %v1394_v12  ;;  %v5755_v36 = vadd.f32 %v1520_v0, %v7938_v32  ;;  %v1877_v20 = vadd.f32 %v1813_v30, %v7939_v6  ;;  %v7943_v43 = vld [vmem:[#allocation32_spill] sm:$0xff] }
 0x21f   : > { %2737 = vmin.xlane.f32.xlu1 %v2736_v9  ;;  %v1878_v16 = vadd.f32 %v1814_v34, %v7940_v31  ;;  %v1371_v48 = vsub.f32 %v7941_v21, %v5326_v63  ;;  %v1372_v7 = vsub.f32 %v7941_v21, %v5328_v46  ;;  %v1363_v61 = vsub.f32 %v7942_v8, %v5326_v63  ;;  %v7945_v12 = vld [vmem:[#allocation76_spill] sm:$0xff]  ;;  %v5784_v21 = vpop.xlane.xlu0 %2124 }
 0x220   : > { %v2691_v10 = vmin.f32 %v1943_v35, %v1944_v37  ;;  %v1364_v51 = vsub.f32 %v7942_v8, %v5328_v46  ;;  %v1391_v60 = vsub.f32 %v7943_v43, %v5326_v63  ;;  %v1917_v17 = vadd.f32 %v1853_v44, %v5540_v41  ;;  %v7946_v30 = vld [vmem:[#allocation12_spill] sm:$0xff]  ;;  %7948 = vst [vmem:[#allocation40_spill] sm:$0xff] %v5784_v21 }
 0x221   : > { %v1918_v4 = vadd.f32 %v1854_v38, %v5543_v26  ;;  %v1392_v45 = vsub.f32 %v7943_v43, %v5328_v46  ;;  %v1905_v15 = vadd.f32 %v1841_v39, %v7944_v28  ;;  %v1906_v9 = vadd.f32 %v1842_v14, %v7945_v12  ;;  %v5778_v35 = vpop.xlane.xlu2 %2121 }
 0x222   : > { %v2733_v0 = vmin.f32 %v1971_v33, %v1972_v2  ;;  %v1318_v34 = vsub.f32 %v7946_v30, %v5042_v27  ;;  %7947 = vst [vmem:[#allocation69_spill] sm:$0xff] %v5778_v35  ;;  %v1941_v44 = vmin.f32 %v1877_v20, 1.0737418e+09  ;;  %v1942_v38 = vmin.f32 %v1878_v16, 1.0737418e+09  ;;  %v7949_v20 = vld [vmem:[#allocation83_spill] sm:$0xff] }
 0x223   : > { %v1819_v6 = vmul.f32 %v1371_v48, %v1371_v48  ;;  %v1820_v39 = vmul.f32 %v1372_v7, %v1372_v7  ;;  %v1811_v33 = vmul.f32 %v1363_v61, %v1363_v61  ;;  %v1812_v2 = vmul.f32 %v1364_v51, %v1364_v51  ;;  %v7950_v7 = vld [vmem:[#allocation115_spill] sm:$0xff]  ;;  %v7951_v51 = vld [vmem:[#allocation106_spill] sm:$0xff] }
 0x224   : > { %2157 = vmin.xlane.f32.xlu2 %v5632_v52  ;;  %v1981_v14 = vmin.f32 %v1917_v17, 1.0737418e+09  ;;  %v1982_v31 = vmin.f32 %v1918_v4, 1.0737418e+09  ;;  %v1839_v8 = vmul.f32 %v1391_v60, %v1391_v60  ;;  %v1840_v52 = vmul.f32 %v1392_v45, %v1392_v45  ;;  %v7952_v45 = vld [vmem:[#allocation51_spill] sm:$0xff] }
 0x225   : > { %2692 = vmin.xlane.f32.xlu0 %v2691_v10  ;;  %v1969_v43 = vmin.f32 %v1905_v15, 1.0737418e+09  ;;  %v1970_v13 = vmin.f32 %v1906_v9, 1.0737418e+09  ;;  %v1319_v37 = vsub.f32 %v7946_v30, %v5044_v47  ;;  %v1328_v16 = vsub.f32 %v7949_v20, %v5042_v27  ;;  %v7953_v9 = vld [vmem:[#allocation52_spill] sm:$0xff]  ;;  %v7954_v30 = vld [vmem:[#allocation57_spill] sm:$0xff] }
 0x226   : > { %v1329_v48 = vsub.f32 %v7949_v20, %v5044_v47  ;;  %v1361_v61 = vsub.f32 %v7950_v7, %v5326_v63  ;;  %v1362_v10 = vsub.f32 %v7950_v7, %v5328_v46  ;;  %v1883_v60 = vadd.f32 %v1819_v6, %v7951_v51 }
 0x227   : > { %2734 = vmin.xlane.f32.xlu1 %v2733_v0  ;;  %v1884_v17 = vadd.f32 %v1820_v39, %v5304_v22  ;;  %v2688_v4 = vmin.f32 %v1941_v44, %v1942_v38  ;;  %v1875_v15 = vadd.f32 %v1811_v33, %v7952_v45  ;;  %v1876_v0 = vadd.f32 %v1812_v2, %v7953_v9  ;;  %v7961_v45 = vld [vmem:[#allocation113_spill] sm:$0xff] }
 0x228   : > { %v1389_v26 = vsub.f32 %v7954_v30, %v5326_v63  ;;  %v2748_v41 = vmin.f32 %v1981_v14, %v1982_v31  ;;  %v1390_v20 = vsub.f32 %v7954_v30, %v5328_v46  ;;  %v1903_v23 = vadd.f32 %v1839_v8, %v7937_v18 }
 0x229   : > { %v1904_v7 = vadd.f32 %v1840_v52, %v7938_v32  ;;  %v2730_v24 = vmin.f32 %v1969_v43, %v1970_v13  ;;  %v1515_v6 = vmul.f32 %v1318_v34, %v1318_v34  ;;  %v1525_v51 = vmul.f32 %v1328_v16, %v1328_v16  ;;  %v5806_v44 = vpop.xlane.xlu1 %2127  ;;  %v5810_v13 = vpop.xlane.xlu2 %2130 }
 0x22a   : > { %v1526_v22 = vmul.f32 %v1329_v48, %v1329_v48  ;;  %7955 = vst [vmem:[#allocation41_spill] sm:$0xff] %v5806_v44  ;;  %v1809_v39 = vmul.f32 %v1361_v61, %v1361_v61  ;;  %v1810_v33 = vmul.f32 %v1362_v10, %v1362_v10  ;;  %v1947_v2 = vmin.f32 %v1883_v60, 1.0737418e+09  ;;  %v7958_v10 = vld [vmem:[#allocation101_spill] sm:$0xff] }
 0x22b   : > { %v1648_v14 = vmin.f32 %v5755_v36, 1.0737418e+09  ;;  %v1948_v31 = vmin.f32 %v1884_v17, 1.0737418e+09  ;;  %v1939_v18 = vmin.f32 %v1875_v15, 1.0737418e+09  ;;  %v1940_v8 = vmin.f32 %v1876_v0, 1.0737418e+09  ;;  %7956 = vst [vmem:[#allocation42_spill] sm:$0xff] %v5810_v13  ;;  %v5823_v17 = vpop.xlane.xlu0 %2136  ;;  %v7962_v15 = vld [vmem:[#allocation114_spill] sm:$0xff] }
 0x22c   : > { %2749 = vmin.xlane.f32.xlu2 %v2748_v41  ;;  %v1837_v32 = vmul.f32 %v1389_v26, %v1389_v26  ;;  %v1516_v34 = vmul.f32 %v1319_v37, %v1319_v37  ;;  %v1838_v52 = vmul.f32 %v1390_v20, %v1390_v20  ;;  %v1967_v43 = vmin.f32 %v1903_v23, 1.0737418e+09  ;;  %v7957_v41 = vld [vmem:[#allocation35_spill] sm:$0xff]  ;;  %7959 = vst [vmem:[#allocation72_spill] sm:$0xff] %v5823_v17 }
 0x22d   : > { %2689 = vmin.xlane.f32.xlu0 %v2688_v4  ;;  %v1968_v16 = vmin.f32 %v1904_v7, 1.0737418e+09  ;;  %v5813_v48 = vadd.f32 %v1515_v6, %v7957_v41  ;;  %v5816_v61 = vadd.f32 %v1525_v51, %v7928_v54  ;;  %v1330_v60 = vsub.f32 %v7958_v10, %v5042_v27  ;;  %v7960_v23 = vld [vmem:[#allocation107_spill] sm:$0xff]  ;;  %v7963_v7 = vld [vmem:[#allocation37_spill] sm:$0xff] }
 0x22e   : > { %v1331_v37 = vsub.f32 %v7958_v10, %v5044_v47  ;;  %v1359_v26 = vsub.f32 %v7960_v23, %v5326_v63  ;;  %v1360_v4 = vsub.f32 %v7960_v23, %v5328_v46  ;;  %v1873_v54 = vadd.f32 %v1809_v39, %v7961_v45  ;;  %v7964_v10 = vld [vmem:[#allocation64_spill] sm:$0xff]  ;;  %v7965_v39 = vld [vmem:[#allocation18_spill] sm:$0xff] }
 0x22f   : > { %2731 = vmin.xlane.f32.xlu1 %v2730_v24  ;;  %v5819_v24 = vadd.f32 %v1526_v22, %v5620_v19  ;;  %v1874_v9 = vadd.f32 %v1810_v33, %v7962_v15  ;;  %v1901_v19 = vadd.f32 %v1837_v32, %v5373_v53  ;;  %v2697_v0 = vmin.f32 %v1947_v2, %v1948_v31 }
 0x230   : > { %v2685_v30 = vmin.f32 %v1939_v18, %v1940_v8  ;;  %v1902_v20 = vadd.f32 %v1838_v52, %v5376_v57  ;;  %v1387_v6 = vsub.f32 %v7963_v7, %v5326_v63  ;;  %v1388_v51 = vsub.f32 %v7963_v7, %v5328_v46  ;;  %v7973_v7 = vld [vmem:[#allocation118_spill] sm:$0xff] }
 0x231   : > { %v2727_v22 = vmin.f32 %v1967_v43, %v1968_v16  ;;  %v5840_v38 = vadd.f32 %v1516_v34, %v7964_v10  ;;  %v1324_v23 = vsub.f32 %v7965_v39, %v5042_v27  ;;  %v1527_v33 = vmul.f32 %v1330_v60, %v1330_v60  ;;  %v5844_v45 = vpop.xlane.xlu1 %2139 }
 0x232   : > { %7966 = vst [vmem:[#allocation79_spill] sm:$0xff] %v5844_v45  ;;  %v7967_v53 = vmin.f32 %v5749_v55, 1.0737418e+09  ;;  %v7968_v57 = vmin.f32 %v5746_v1, 1.0737418e+09  ;;  %v1528_v31 = vmul.f32 %v1331_v37, %v1331_v37  ;;  %v1807_v18 = vmul.f32 %v1359_v26, %v1359_v26  ;;  %v7969_v26 = vld [vmem:[#allocation96_spill] sm:$0xff] }
 0x233   : > { %v1808_v8 = vmul.f32 %v1360_v4, %v1360_v4  ;;  %v1643_v32 = vmin.f32 %v5813_v48, 1.0737418e+09  ;;  %v1937_v34 = vmin.f32 %v1873_v54, 1.0737418e+09  ;;  %v1938_v52 = vmin.f32 %v1874_v9, 1.0737418e+09  ;;  %v5859_v54 = vpop.xlane.xlu2 %2133  ;;  %v7971_v9 = vld [vmem:[#allocation99_spill] sm:$0xff] }
 0x234   : > { %2698 = vmin.xlane.f32.xlu2 %v2697_v0  ;;  %v2198_v2 = vmin.f32 %v7968_v57, %v7967_v53  ;;  %v1653_v27 = vmin.f32 %v5816_v61, 1.0737418e+09  ;;  %v1654_v43 = vmin.f32 %v5819_v24, 1.0737418e+09  ;;  %v1965_v16 = vmin.f32 %v1901_v19, 1.0737418e+09  ;;  %7970 = vst [vmem:[#allocation80_spill] sm:$0xff] %v5859_v54 }
 0x235   : > { %2686 = vmin.xlane.f32.xlu0 %v2685_v30  ;;  %v1966_v60 = vmin.f32 %v1902_v20, 1.0737418e+09  ;;  %v1835_v15 = vmul.f32 %v1387_v6, %v1387_v6  ;;  %v1836_v55 = vmul.f32 %v1388_v51, %v1388_v51  ;;  %v1325_v1 = vsub.f32 %v7965_v39, %v5044_v47  ;;  %v7972_v30 = vld [vmem:[#allocation100_spill] sm:$0xff]  ;;  %v7974_v51 = vld [vmem:[#allocation63_spill] sm:$0xff]  ;;  %v5871_v39 = vpop.xlane.xlu0 %2145 }
 0x236   : > { %v1521_v37 = vmul.f32 %v1324_v23, %v1324_v23  ;;  %v1349_v4 = vsub.f32 %v7969_v26, %v5326_v63  ;;  %v1350_v0 = vsub.f32 %v7969_v26, %v5328_v46  ;;  %v1591_v61 = vadd.f32 %v1527_v33, %v5624_v5 }
 0x237   : > { %2728 = vmin.xlane.f32.xlu1 %v2727_v22  ;;  %v1592_v24 = vadd.f32 %v1528_v31, %v5628_v49  ;;  %v1871_v19 = vadd.f32 %v1807_v18, %v7971_v9  ;;  %v1872_v20 = vadd.f32 %v1808_v8, %v7972_v30  ;;  %v1357_v47 = vsub.f32 %v7973_v7, %v5326_v63 }
 0x238   : > { %v1358_v6 = vsub.f32 %v7973_v7, %v5328_v46  ;;  %v1385_v22 = vsub.f32 %v7974_v51, %v5326_v63  ;;  %v2682_v23 = vmin.f32 %v1937_v34, %v1938_v52  ;;  %v1386_v5 = vsub.f32 %v7974_v51, %v5328_v46  ;;  %v7980_v51 = vld [vmem:[#allocation58_spill] sm:$0xff] }
 0x239   : > { %v1899_v49 = vadd.f32 %v1835_v15, %v7957_v41  ;;  %v1900_v33 = vadd.f32 %v1836_v55, %v7964_v10  ;;  %v2724_v53 = vmin.f32 %v1965_v16, %v1966_v60  ;;  %v1522_v57 = vmul.f32 %v1325_v1, %v1325_v1  ;;  %v5877_v8 = vpop.xlane.xlu1 %2148 }
 0x23a   : > { %v1797_v31 = vmul.f32 %v1349_v4, %v1349_v4  ;;  %v1798_v18 = vmul.f32 %v1350_v0, %v1350_v0  ;;  %v1644_v26 = vmin.f32 %v5840_v38, 1.0737418e+09  ;;  %v1935_v9 = vmin.f32 %v1871_v19, 1.0737418e+09  ;;  %v7975_v4 = vld [vmem:[#allocation90_spill] sm:$0xff] }
 0x23b   : > { %v1936_v30 = vmin.f32 %v1872_v20, 1.0737418e+09  ;;  %v1655_v34 = vmin.f32 %v1591_v61, 1.0737418e+09  ;;  %v1656_v52 = vmin.f32 %v1592_v24, 1.0737418e+09  ;;  %v5881_v7 = vadd.f32 %v1521_v37, %v7944_v28  ;;  %v7976_v61 = vld [vmem:[#allocation105_spill] sm:$0xff]  ;;  %v7977_v37 = vld [vmem:[#allocation91_spill] sm:$0xff] }
 0x23c   : > { %2199 = vmin.xlane.f32.xlu2 %v2198_v2  ;;  %v1805_v41 = vmul.f32 %v1357_v47, %v1357_v47  ;;  %v1806_v10 = vmul.f32 %v1358_v6, %v1358_v6  ;;  %v5883_v16 = vmin.f32 %v1653_v27, %v1654_v43  ;;  %v1833_v60 = vmul.f32 %v1385_v22, %v1385_v22  ;;  %v7978_v20 = vld [vmem:[#allocation109_spill] sm:$0xff] }
 0x23d   : > { %2683 = vmin.xlane.f32.xlu0 %v2682_v23  ;;  %v1834_v15 = vmul.f32 %v1386_v5, %v1386_v5  ;;  %v1963_v55 = vmin.f32 %v1899_v49, 1.0737418e+09  ;;  %v1964_v1 = vmin.f32 %v1900_v33, 1.0737418e+09  ;;  %v5886_v2 = vadd.f32 %v1522_v57, %v7945_v12  ;;  %v7979_v12 = vld [vmem:[#allocation110_spill] sm:$0xff]  ;;  %v5904_v23 = vpop.xlane.xlu2 %2142 }
 0x23e   : > { %v5889_v0 = vadd.f32 %v1797_v31, %v7975_v4  ;;  %v1355_v24 = vsub.f32 %v7976_v61, %v5326_v63  ;;  %v1356_v28 = vsub.f32 %v7976_v61, %v5328_v46  ;;  %v5896_v19 = vadd.f32 %v1798_v18, %v7977_v37  ;;  %7981 = vst [vmem:[#allocation43_spill] sm:$0xff] %v5904_v23  ;;  %v5910_v18 = vpop.xlane.xlu0 %2214 }
 0x23f   : > { %2725 = vmin.xlane.f32.xlu1 %v2724_v53  ;;  %4030 = vrsqrt.f32 %v5784_v21  ;;  %v2195_v27 = vmin.f32 %v1655_v34, %v1656_v52  ;;  %v2679_v43 = vmin.f32 %v1935_v9, %v1936_v30  ;;  %v1869_v47 = vadd.f32 %v1805_v41, %v7978_v20  ;;  %v7982_v41 = vld [vmem:[#allocation108_spill] sm:$0xff]  ;;  %v7984_v20 = vld [vmem:[#allocation17_spill] sm:$0xff] }
 0x240   : > { %v1870_v6 = vadd.f32 %v1806_v10, %v7979_v12  ;;  %v1383_v22 = vsub.f32 %v7980_v51, %v5326_v63  ;;  %4032 = vrsqrt.f32 %v5823_v17  ;;  %v1384_v5 = vsub.f32 %v7980_v51, %v5328_v46  ;;  %v7985_v51 = vld [vmem:[#allocation48_spill] sm:$0xff] }
 0x241   : > { %v1897_v49 = vadd.f32 %v1833_v60, %v7913_v50  ;;  %v1898_v33 = vadd.f32 %v1834_v15, %v7914_v56  ;;  %v2721_v53 = vmin.f32 %v1963_v55, %v1964_v1  ;;  %v1803_v57 = vmul.f32 %v1355_v24, %v1355_v24  ;;  %v5912_v9 = vpop.xlane.xlu1 %2710  ;;  %v7983_v56 = vld [vmem:[#allocation50_spill] sm:$0xff] }
 0x242   : > { %v1804_v31 = vmul.f32 %v1356_v28, %v1356_v28  ;;  %v1649_v30 = vmin.f32 %v5881_v7, 1.0737418e+09  ;;  %v1650_v34 = vmin.f32 %v5886_v2, 1.0737418e+09  ;;  %v1925_v52 = vmin.f32 %v5889_v0, 1.0737418e+09 }
 0x243   : > { %v1351_v10 = vsub.f32 %v7982_v41, %v5326_v63  ;;  %v1352_v50 = vsub.f32 %v7982_v41, %v5328_v46  ;;  %v1353_v60 = vsub.f32 %v7983_v56, %v5326_v63  ;;  %v1354_v15 = vsub.f32 %v7983_v56, %v5328_v46 }
 0x244   : > { %2196 = vmin.xlane.f32.xlu2 %v2195_v27  ;;  %v1933_v55 = vmin.f32 %v1869_v47, 1.0737418e+09  ;;  %v1934_v1 = vmin.f32 %v1870_v6, 1.0737418e+09  ;;  %v1831_v4 = vmul.f32 %v1383_v22, %v1383_v22  ;;  %v1832_v24 = vmul.f32 %v1384_v5, %v1384_v5  ;;  %v7986_v47 = vld [vmem:[#allocation94_spill] sm:$0xff] }
 0x245   : > { %2680 = vmin.xlane.f32.xlu0 %v2679_v43  ;;  %v5925_v61 = vpop.eup %4030  ;;  %v1961_v28 = vmin.f32 %v1897_v49, 1.0737418e+09  ;;  %v1962_v37 = vmin.f32 %v1898_v33, 1.0737418e+09  ;;  %4034 = vrsqrt.f32 %v5910_v18  ;;  %v1867_v12 = vadd.f32 %v1803_v57, %v7984_v20 }
 0x246   : > { %v5928_v27 = vpop.eup %4032  ;;  %v1381_v43 = vsub.f32 %v7985_v51, %v5326_v63  ;;  %4036 = vrsqrt.f32 %v5778_v35  ;;  %v1868_v6 = vadd.f32 %v1804_v31, %v7986_v47  ;;  %v1799_v22 = vmul.f32 %v1351_v10, %v1351_v10  ;;  %v5948_v47 = vpop.xlane.xlu2 %2166 }
 0x247   : > { %2722 = vmin.xlane.f32.xlu1 %v2721_v53  ;;  %v1382_v53 = vsub.f32 %v7985_v51, %v5328_v46  ;;  %v1800_v5 = vmul.f32 %v1352_v50, %v1352_v50  ;;  %4038 = vrsqrt.f32 %v5871_v39  ;;  %v1801_v49 = vmul.f32 %v1353_v60, %v1353_v60 }
 0x248   : > { %v1802_v33 = vmul.f32 %v1354_v15, %v1354_v15  ;;  %v2229_v57 = vmul.f32 %v5925_v61, %v5784_v21  ;;  %v2676_v41 = vmin.f32 %v1933_v55, %v1934_v1  ;;  %v1895_v63 = vadd.f32 %v1831_v4, %v5307_v11  ;;  %v7987_v55 = vld [vmem:[#allocation20_spill] sm:$0xff]  ;;  %v7988_v1 = vld [vmem:[#allocation22_spill] sm:$0xff] }
 0x249   : > { %v1896_v46 = vadd.f32 %v1832_v24, %v5320_v3  ;;  %v2277_v56 = vmul.f32 %v5928_v27, %v5823_v17  ;;  %v2718_v20 = vmin.f32 %v1961_v28, %v1962_v37  ;;  %v1926_v31 = vmin.f32 %v5896_v19, 1.0737418e+09  ;;  %v7989_v19 = vld [vmem:[#allocation26_spill] sm:$0xff]  ;;  %v7990_v28 = vld [vmem:[#allocation27_spill] sm:$0xff] }
 0x24a   : > { %v1931_v10 = vmin.f32 %v1867_v12, 1.0737418e+09  ;;  %v1829_v50 = vmul.f32 %v1381_v43, %v1381_v43  ;;  %v1830_v51 = vmul.f32 %v1382_v53, %v1382_v53  ;;  %v1932_v15 = vmin.f32 %v1868_v6, 1.0737418e+09  ;;  %v5962_v12 = vpop.xlane.xlu1 %2211 }
 0x24b   : > { %v5951_v60 = vpop.eup %4034  ;;  %v1863_v11 = vadd.f32 %v1799_v22, %v7987_v55  ;;  %v1864_v3 = vadd.f32 %v1800_v5, %v7988_v1  ;;  %4040 = vrsqrt.f32 %v5810_v13  ;;  %v1865_v24 = vadd.f32 %v1801_v49, %v7989_v19  ;;  %v5967_v5 = vpop.xlane.xlu0 %2163 }
 0x24c   : > { %2193 = vmin.xlane.f32.xlu2 %v5883_v16  ;;  %v5956_v4 = vpop.eup %4036  ;;  %v1866_v37 = vadd.f32 %v1802_v33, %v7990_v28  ;;  %v2230_v16 = vmul.f32 %v5925_v61, %v2229_v57  ;;  %4042 = vrsqrt.f32 %v5806_v44  ;;  %v1959_v53 = vmin.f32 %v1895_v63, 1.0737418e+09 }
 0x24d   : > { %2677 = vmin.xlane.f32.xlu0 %v2676_v41  ;;  %v5964_v43 = vpop.eup %4038  ;;  %v1960_v6 = vmin.f32 %v1896_v46, 1.0737418e+09  ;;  %v2278_v22 = vmul.f32 %v5928_v27, %v2277_v56  ;;  %4044 = vrsqrt.f32 %v5948_v47  ;;  %v1893_v49 = vadd.f32 %v1829_v50, %v7935_v29 }
 0x24e   : > { %v1894_v33 = vadd.f32 %v1830_v51, %v7936_v62  ;;  %v2589_v57 = vmul.f32 %v5951_v60, %v5910_v18  ;;  %4046 = vrsqrt.f32 %v5912_v9  ;;  %v1927_v41 = vmin.f32 %v1863_v11, 1.0737418e+09 }
 0x24f   : > { %2719 = vmin.xlane.f32.xlu1 %v2718_v20  ;;  %v1928_v20 = vmin.f32 %v1864_v3, 1.0737418e+09  ;;  %v2217_v63 = vmul.f32 %v5956_v4, %v5778_v35  ;;  %v2673_v46 = vmin.f32 %v1931_v10, %v1932_v15  ;;  %v1929_v56 = vmin.f32 %v1865_v24, 1.0737418e+09 }
 0x250   : > { %v2231_v55 = vmul.f32 0.5, %v2230_v16  ;;  %v2313_v29 = vmul.f32 %v5964_v43, %v5871_v39  ;;  %4048 = vrsqrt.f32 %v5967_v5  ;;  %v1930_v50 = vmin.f32 %v1866_v37, 1.0737418e+09 }
 0x251   : > { %v5981_v62 = vpop.eup %4040  ;;  %v2279_v51 = vmul.f32 0.5, %v2278_v22  ;;  %4050 = vrsqrt.f32 %v5859_v54  ;;  %v2715_v11 = vmin.f32 %v1959_v53, %v1960_v6  ;;  %v1957_v3 = vmin.f32 %v1893_v49, 1.0737418e+09 }
 0x252   : > { %v5984_v1 = vpop.eup %4042  ;;  %v1958_v19 = vmin.f32 %v1894_v33, 1.0737418e+09  ;;  %v2590_v10 = vmul.f32 %v5951_v60, %v2589_v57  ;;  %v7991_v15 = vmin.f32 %v5743_v25, 1.0737418e+09  ;;  %v7992_v24 = vmin.f32 %v5740_v42, 1.0737418e+09  ;;  %v6031_v33 = vpop.xlane.xlu1 %2160 }
 0x253   : > { %v5996_v37 = vpop.eup %4044  ;;  %v2218_v16 = vmul.f32 %v5956_v4, %v2217_v63  ;;  %4052 = vrsqrt.f32 %v5962_v12  ;;  %v6010_v42 = vmin.f32 %v1643_v32, %v1644_v26  ;;  %v2232_v6 = vsub.f32 1.5, %v2231_v55 }
 0x254   : > { %2190 = vmin.xlane.f32.xlu2 %v5719_v59  ;;  %v5992_v28 = vmin.f32 %v7992_v24, %v7991_v15  ;;  %v7993_v59 = vmin.f32 %v5752_v58, 1.0737418e+09  ;;  %v6012_v25 = vpop.eup %4046  ;;  %v2314_v22 = vmul.f32 %v5964_v43, %v2313_v29  ;;  %v2186_v36 = vmin.f32 %v1649_v30, %v1650_v34 }
 0x255   : > { %2674 = vmin.xlane.f32.xlu0 %v2673_v46  ;;  %v6021_v58 = vmin.f32 %v1925_v52, %v1926_v31  ;;  %v2253_v38 = vmul.f32 %v5981_v62, %v5810_v13  ;;  %v2670_v48 = vmin.f32 %v1929_v56, %v1930_v50  ;;  %v6025_v32 = vmin.f32 %v1927_v41, %v1928_v20 }
 0x256   : > { %v6004_v53 = vmin.f32 %v7993_v59, %v1648_v14  ;;  %v2280_v14 = vsub.f32 1.5, %v2279_v51  ;;  %v6027_v26 = vpop.eup %4048  ;;  %v2241_v49 = vmul.f32 %v5984_v1, %v5806_v44  ;;  %v2591_v2 = vmul.f32 0.5, %v2590_v10 }
 0x257   : > { %2716 = vmin.xlane.f32.xlu1 %v2715_v11  ;;  %v2712_v7 = vmin.f32 %v1957_v3, %v1958_v19  ;;  %v6033_v30 = vstv %s3146_s19  ;;  %v6035_v0 = vpop.eup %4050  ;;  %v2219_v34 = vmul.f32 0.5, %v2218_v16  ;;  %4054 = vrsqrt.f32 %v5844_v45 }
 0x258   : > { %v2397_v52 = vmul.f32 %v5996_v37, %v5948_v47  ;;  %v2941_v31 = vmul.f32 %v6012_v25, %v5912_v9  ;;  %v2233_v57 = vmul.f32 %v5925_v61, %v2232_v6  ;;  %v2315_v63 = vmul.f32 0.5, %v2314_v22 }
 0x259   : > { %v6045_v46 = vpop.eup %4052  ;;  %v2281_v56 = vmul.f32 %v5928_v27, %v2280_v14  ;;  %v2254_v29 = vmul.f32 %v5981_v62, %v2253_v38  ;;  %v2385_v50 = vmul.f32 %v6027_v26, %v5967_v5  ;;  %v2242_v51 = vmul.f32 %v5984_v1, %v2241_v49 }
 0x25a   : > { %v2592_v11 = vsub.f32 1.5, %v2591_v2  ;;  %v2265_v61 = vmul.f32 %v6035_v0, %v5859_v54  ;;  %4056 = vrsqrt.f32 %v6031_v33  ;;  %v2220_v3 = vsub.f32 1.5, %v2219_v34 }
 0x25b   : > { %v2398_v19 = vmul.f32 %v5996_v37, %v2397_v52  ;;  %v2942_v10 = vmul.f32 %v6012_v25, %v2941_v31  ;;  %v6063_v15 = vmul.f32 %v2233_v57, %v5784_v21  ;;  %v2316_v24 = vsub.f32 1.5, %v2315_v63 }
 0x25c   : > { %2187 = vmin.xlane.f32.xlu2 %v2186_v36  ;;  %v2577_v59 = vmul.f32 %v6045_v46, %v5962_v12  ;;  %v6071_v22 = vmul.f32 %v2281_v56, %v5823_v17  ;;  %v2255_v36 = vmul.f32 0.5, %v2254_v29  ;;  %v2386_v14 = vmul.f32 %v6027_v26, %v2385_v50 }
 0x25d   : > { %2671 = vmin.xlane.f32.xlu0 %v2670_v48  ;;  %7994 = vst [vmem:[#allocation77_spill] sm:$0xff] %v6063_v15  ;;  %v6068_v6 = vpop.eup %4054  ;;  %4058 = vrsqrt.f32 %v5904_v23  ;;  %v2243_v38 = vmul.f32 0.5, %v2242_v51  ;;  %v2593_v49 = vmul.f32 %v5951_v60, %v2592_v11  ;;  %v2266_v2 = vmul.f32 %v6035_v0, %v2265_v61 }
 0x25e   : > { %7995 = vst [vmem:[#allocation78_spill] sm:$0xff] %v6071_v22  ;;  %v2221_v34 = vmul.f32 %v5956_v4, %v2220_v3  ;;  %v2399_v52 = vmul.f32 0.5, %v2398_v19  ;;  %v2943_v31 = vmul.f32 0.5, %v2942_v10  ;;  %v2317_v63 = vmul.f32 %v5964_v43, %v2316_v24 }
 0x25f   : > { %2713 = vmin.xlane.f32.xlu1 %v2712_v7  ;;  %vm2595_vm0 = vcmp.eq.f32.partialorder %v5910_v18, inf  ;;  %v2289_v60 = vmul.f32 %v6068_v6, %v5844_v45  ;;  %v2578_v56 = vmul.f32 %v6045_v46, %v2577_v59  ;;  %v2256_v29 = vsub.f32 1.5, %v2255_v36 }
 0x260   : > { %v6082_v57 = vpop.eup %4056  ;;  %v2598_v50 = vand.u32 2147483648, %v5910_v18  ;;  %v2387_v4 = vmul.f32 0.5, %v2386_v14  ;;  %v2244_v51 = vsub.f32 1.5, %v2243_v38  ;;  %v2594_v11 = vmul.f32 %v2593_v49, %v5910_v18 }
 0x261   : > { %v2267_v61 = vmul.f32 0.5, %v2266_v2  ;;  %vm2597_vm1 = vcmp.eq.f32.partialorder %v5910_v18, 0.0  ;;  %v6098_v3 = vmul.f32 %v2221_v34, %v5778_v35  ;;  %v2400_v19 = vsub.f32 1.5, %v2399_v52 }
 0x262   : > { %v6078_v7 = vpop.xlane.xlu1 %2752  ;;  %v2944_v10 = vsub.f32 1.5, %v2943_v31  ;;  %v2373_v24 = vmul.f32 %v6082_v57, %v6031_v33  ;;  %v6104_v59 = vmul.f32 %v2317_v63, %v5871_v39  ;;  %v2290_v36 = vmul.f32 %v6068_v6, %v2289_v60 }
 0x263   : > { %4060 = vrsqrt.f32 %v6078_v7  ;;  %v6095_v43 = vpop.eup %4058  ;;  %7996 = vst [vmem:[#allocation85_spill] sm:$0xff] %v6098_v3  ;;  %v2579_v14 = vmul.f32 0.5, %v2578_v56  ;;  %v2257_v49 = vmul.f32 %v5981_v62, %v2256_v29  ;;  %v2388_v34 = vsub.f32 1.5, %v2387_v4 }
 0x264   : > { %4062 = vrsqrt.f32 %v5877_v8  ;;  %2184 = vmin.xlane.f32.xlu2 %v6004_v53  ;;  %v2394_v52 = vand.u32 2147483648, %v5967_v5  ;;  %v2268_v31 = vsub.f32 1.5, %v2267_v61  ;;  %v2301_v63 = vmul.f32 %v6095_v43, %v5904_v23 }
 0x265   : > { %2668 = vmin.xlane.f32.xlu0 %v6025_v32  ;;  %v2245_v32 = vmul.f32 %v5984_v1, %v2244_v51  ;;  %v2596_v60 = vsel %vm2595_vm0, %v5910_v18, %v2594_v11  ;;  %v2401_v56 = vmul.f32 %v5996_v37, %v2400_v19  ;;  %v2945_v1 = vmul.f32 %v6012_v25, %v2944_v10 }
 0x266   : > { %v2374_v29 = vmul.f32 %v6082_v57, %v2373_v24  ;;  %v2291_v4 = vmul.f32 0.5, %v2290_v36  ;;  %vm2391_vm2 = vcmp.eq.f32.partialorder %v5967_v5, inf  ;;  %v2580_v51 = vsub.f32 1.5, %v2579_v14 }
 0x267   : > { %v6136_v11 = vmul.f32 %v2257_v49, %v5810_v13  ;;  %v2389_v37 = vmul.f32 %v6027_v26, %v2388_v34  ;;  %v2599_v19 = vsel %vm2597_vm1, %v2598_v50, %v2596_v60  ;;  %v6143_v10 = vmul.f32 %v2245_v32, %v5806_v44 }
 0x268   : > { %v6118_v41 = vpop.xlane.xlu0 %2755  ;;  %v2302_v24 = vmul.f32 %v6095_v43, %v2301_v63  ;;  %v6149_v14 = vstv %s3149_s21  ;;  %v2269_v49 = vmul.f32 %v6035_v0, %v2268_v31  ;;  %v2402_v26 = vmul.f32 %v2401_v56, %v5948_v47 }
 0x269   : > { %v6108_v38 = vpop.eup %4060  ;;  %7997 = vst [vmem:[#allocation86_spill] sm:$0xff] %v6136_v11  ;;  %v2946_v34 = vmul.f32 %v2945_v1, %v5912_v9  ;;  %v2375_v18 = vmul.f32 0.5, %v2374_v29  ;;  %vm2393_vm3 = vcmp.eq.f32.partialorder %v5967_v5, 0.0  ;;  %v2292_v50 = vsub.f32 1.5, %v2291_v4 }
 0x26a   : > { %v6116_v55 = vpop.xlane.xlu1 %2701  ;;  %v6125_v62 = vpop.eup %4062  ;;  %v3109_v61 = vmul.f32 %v6108_v38, %v6078_v7  ;;  %7998 = vst [vmem:[#allocation44_spill] sm:$0xff] %v6143_v10  ;;  %v2581_v32 = vmul.f32 %v6045_v46, %v2580_v51  ;;  %v2390_v0 = vmul.f32 %v2389_v37, %v5967_v5  ;;  %vm2403_vm4 = vcmp.eq.f32.partialorder %v5948_v47, inf }
 0x26b   : > { %4064 = vrsqrt.f32 %v6116_v55  ;;  %v2325_v36 = vmul.f32 %v6125_v62, %v5877_v8  ;;  %v2406_v31 = vand.u32 2147483648, %v5948_v47  ;;  %vm2947_vm5 = vcmp.eq.f32.partialorder %v5912_v9, inf }
 0x26c   : > { %4066 = vrsqrt.f32 %v6118_v41  ;;  %2181 = vmin.xlane.f32.xlu2 %v5636_v40  ;;  %v3110_v63 = vmul.f32 %v6108_v38, %v3109_v61  ;;  %v3214_v40 = vmul.f32 %v6033_v30, %v2599_v19  ;;  %v2303_v56 = vmul.f32 0.5, %v2302_v24 }
 0x26d   : > { %2665 = vmin.xlane.f32.xlu0 %v6021_v58  ;;  %v2326_v1 = vmul.f32 %v6125_v62, %v2325_v36  ;;  %v2950_v46 = vand.u32 2147483648, %v5912_v9  ;;  %v2376_v61 = vsub.f32 1.5, %v2375_v18  ;;  %v2404_v19 = vsel %vm2403_vm4, %v5948_v47, %v2402_v26 }
 0x26e   : > { %v2948_v48 = vsel %vm2947_vm5, %v5912_v9, %v2946_v34  ;;  %v2582_v24 = vmul.f32 %v2581_v32, %v5962_v12  ;;  %v3111_v36 = vmul.f32 0.5, %v3110_v63  ;;  %vm2405_vm6 = vcmp.eq.f32.partialorder %v5948_v47, 0.0 }
 0x26f   : > { %vm2949_vm7 = vcmp.eq.f32.partialorder %v5912_v9, 0.0  ;;  %v2392_v18 = vsel %vm2391_vm2, %v5967_v5, %v2390_v0  ;;  %v2327_v26 = vmul.f32 0.5, %v2326_v1  ;;  %v2407_v34 = vsel %vm2405_vm6, %v2406_v31, %v2404_v19  ;;  %v6200_v31 = vld [vmem:[%s4380_s13 + $0xf8] sm:$0xff] }
 0x270   : > { %v6173_v51 = vpop.xlane.xlu0 %2704  ;;  %v2951_v32 = vsel %vm2949_vm7, %v2950_v46, %v2948_v48  ;;  %v2293_v63 = vmul.f32 %v6068_v6, %v2292_v50  ;;  %vm2583_vm8 = vcmp.eq.f32.partialorder %v5962_v12, inf  ;;  %v2377_v47 = vmul.f32 %v6082_v57, %v2376_v61 }
 0x271   : > { %v6159_v60 = vpop.eup %4064  ;;  %4068 = vrsqrt.f32 %v6173_v51  ;;  %v3112_v9 = vsub.f32 1.5, %v3111_v36  ;;  %v2395_v0 = vsel %vm2393_vm3, %v2394_v52, %v2392_v18  ;;  %v2584_v1 = vsel %vm2583_vm8, %v5962_v12, %v2582_v24 }
 0x272   : > { %v6165_v58 = vpop.eup %4066  ;;  %v2905_v29 = vmul.f32 %v6159_v60, %v6116_v55  ;;  %v6171_v4 = vpop.xlane.xlu1 %2202  ;;  %v3198_v6 = vmul.f32 %v6033_v30, %v2407_v34  ;;  %v3263_v50 = vmul.f32 %v6149_v14, %v2951_v32  ;;  %vm2585_vm9 = vcmp.eq.f32.partialorder %v5962_v12, 0.0 }
 0x273   : > { %v3121_v37 = vmul.f32 %v6165_v58, %v6118_v41  ;;  %4070 = vrsqrt.f32 %v6171_v4  ;;  %v6217_v61 = vmul.f32 %v2293_v63, %v5844_v45  ;;  %v2378_v19 = vmul.f32 %v2377_v47, %v6031_v33  ;;  %v6229_v47 = vld [vmem:[%s4380_s13 + $0x70] sm:$0xff] }
 0x274   : > { %v2906_v16 = vmul.f32 %v6159_v60, %v2905_v29  ;;  %2178 = vmin.xlane.f32.xlu2 %v6010_v42  ;;  %v2304_v29 = vsub.f32 1.5, %v2303_v56  ;;  %v2586_v42 = vand.u32 2147483648, %v5962_v12  ;;  %v2328_v56 = vsub.f32 1.5, %v2327_v26 }
 0x275   : > { %v3122_v53 = vmul.f32 %v6165_v58, %v3121_v37  ;;  %8000 = vst [vmem:[#allocation84_spill] sm:$0xff] %v6217_v61  ;;  %v3113_v18 = vmul.f32 %v6108_v38, %v3112_v9  ;;  %v3246_v34 = vmul.f32 %v3214_v40, %v6200_v31  ;;  %v3197_v32 = vmul.f32 %v6033_v30, %v2395_v0  ;;  %v8001_v38 = vld [vmem:[#allocation74_spill] sm:$0xff] }
 0x276   : > { %v2907_v37 = vmul.f32 0.5, %v2906_v16  ;;  %v6207_v16 = vmul.f32 %v2269_v49, %v5859_v54  ;;  %v2587_v24 = vsel %vm2585_vm9, %v2586_v42, %v2584_v1  ;;  %v2305_v12 = vmul.f32 %v6095_v43, %v2304_v29  ;;  %v6241_v29 = vld [vmem:[%s4380_s13 + $0xf0] sm:$0xff] }
 0x277   : > { %v3123_v48 = vmul.f32 0.5, %v3122_v53  ;;  %v6204_v57 = vpop.eup %4068  ;;  %v3165_v53 = vld [vmem:[%s4380_s13 + $0x78] sm:$0xff]  ;;  %v2329_v25 = vmul.f32 %v6125_v62, %v2328_v56  ;;  %vm2379_vm10 = vcmp.eq.f32.partialorder %v6031_v33, inf  ;;  %v3213_v9 = vmul.f32 %v6033_v30, %v2587_v24 }
 0x278   : > { %7999 = vst [vmem:[#allocation13_spill] sm:$0xff] %v6207_v16  ;;  %v6212_v46 = vpop.xlane.xlu0 %2205  ;;  %v2917_v49 = vmul.f32 %v6204_v57, %v6173_v51  ;;  %v2908_v26 = vsub.f32 1.5, %v2907_v37  ;;  %v3230_v20 = vmul.f32 %v3198_v6, %v3165_v53  ;;  %v3295_v2 = vmul.f32 %v3263_v50, %v3165_v53 }
 0x279   : > { %v6222_v36 = vpop.eup %4070  ;;  %v3124_v63 = vsub.f32 1.5, %v3123_v48  ;;  %v2380_v37 = vsel %vm2379_vm10, %v6031_v33, %v2378_v19  ;;  %v2382_v62 = vand.u32 2147483648, %v6031_v33  ;;  %v3114_v0 = vmul.f32 %v3113_v18, %v6078_v7 }
 0x27a   : > { %v6210_v52 = vpop.xlane.xlu1 %2151  ;;  %v2541_v40 = vmul.f32 %v6222_v36, %v6171_v4  ;;  %v2918_v43 = vmul.f32 %v6204_v57, %v2917_v49  ;;  %v2909_v1 = vmul.f32 %v6159_v60, %v2908_v26  ;;  %v3229_v42 = vmul.f32 %v3197_v32, %v6229_v47 }
 0x27b   : > { %4072 = vrsqrt.f32 %v6210_v52  ;;  %v3125_v48 = vmul.f32 %v6165_v58, %v3124_v63  ;;  %v3327_v50 = vmul.f32 %v3230_v20, %v3230_v20  ;;  %v3359_v56 = vmul.f32 %v3295_v2, %v3295_v2 }
 0x27c   : > { %2175 = vmin.xlane.f32.xlu2 %v8001_v38  ;;  %4074 = vrsqrt.f32 %v6212_v46  ;;  %vm2381_vm11 = vcmp.eq.f32.partialorder %v6031_v33, 0.0  ;;  %v6257_v49 = vmul.f32 %v3246_v34, %v3246_v34  ;;  %v3245_v60 = vmul.f32 %v3213_v9, %v6241_v29 }
 0x27d   : > { %v2383_v24 = vsel %vm2381_vm11, %v2382_v62, %v2380_v37  ;;  %v6261_v18 = vmul.f32 %v2305_v12, %v5904_v23  ;;  %vm3115_vm12 = vcmp.eq.f32.partialorder %v6078_v7, inf  ;;  %v2542_v20 = vmul.f32 %v6222_v36, %v2541_v40  ;;  %v6287_v62 = vld [vmem:[%s4380_s13 + $0x68] sm:$0xff] }
 0x27e   : > { %v2919_v33 = vmul.f32 0.5, %v2918_v43  ;;  %v6268_v58 = vmul.f32 %v2329_v25, %v5877_v8  ;;  %v2910_v26 = vmul.f32 %v2909_v1, %v6116_v55  ;;  %v6271_v34 = vmul.f32 %v3229_v42, %v3229_v42  ;;  %v8003_v43 = vld [vmem:[#allocation39_spill] sm:$0xff] }
 0x27f   : > { %v6249_v6 = vpop.xlane.xlu2 %2758  ;;  %8002 = vst [vmem:[#allocation11_spill] sm:$0xff] %v6261_v18  ;;  %v3116_v32 = vsel %vm3115_vm12, %v6078_v7, %v3114_v0  ;;  %v3118_v12 = vand.u32 2147483648, %v6078_v7  ;;  %v3126_v38 = vmul.f32 %v3125_v48, %v6118_v41  ;;  %v6278_v9 = vadd.f32 %v3359_v56, %v3327_v50 }
 0x280   : > { %4076 = vrsqrt.f32 %v6249_v6  ;;  %v6255_v19 = vpop.xlane.xlu0 %2154  ;;  %v3196_v40 = vmul.f32 %v6033_v30, %v2383_v24  ;;  %vm2911_vm13 = vcmp.eq.f32.partialorder %v6116_v55, inf  ;;  %v2914_v25 = vand.u32 2147483648, %v6116_v55 }
 0x281   : > { %v6265_v2 = vpop.eup %4072  ;;  %v6284_v37 = vmul.f32 %v3245_v60, %v3245_v60  ;;  %vm3117_vm14 = vcmp.eq.f32.partialorder %v6078_v7, 0.0  ;;  %vm3127_vm15 = vcmp.eq.f32.partialorder %v6118_v41, inf  ;;  %v2543_v0 = vmul.f32 0.5, %v2542_v20 }
 0x282   : > { %v6253_v53 = vpop.xlane.xlu1 %2743  ;;  %v6274_v63 = vpop.eup %4074  ;;  %v2920_v1 = vsub.f32 1.5, %v2919_v33  ;;  %v3119_v42 = vsel %vm3117_vm14, %v3118_v12, %v3116_v32  ;;  %v2337_v50 = vmul.f32 %v6265_v2, %v6210_v52  ;;  %v2912_v60 = vsel %vm2911_vm13, %v6116_v55, %v2910_v26 }
 0x283   : > { %v2553_v56 = vmul.f32 %v6274_v63, %v6212_v46  ;;  %4078 = vrsqrt.f32 %v6253_v53  ;;  %v3128_v20 = vsel %vm3127_vm15, %v6118_v41, %v3126_v38  ;;  %v3228_v33 = vmul.f32 %v3196_v40, %v6287_v62  ;;  %v6314_v38 = vld [vmem:[%s4380_s13 + $0xe8] sm:$0xff] }
 0x284   : > { %2172 = vmin.xlane.f32.xlu2 %v8003_v43  ;;  %4080 = vrsqrt.f32 %v6255_v19  ;;  %v3130_v32 = vand.u32 2147483648, %v6118_v41  ;;  %v3277_v26 = vmul.f32 %v6149_v14, %v3119_v42  ;;  %vm2913_vm0 = vcmp.eq.f32.partialorder %v6116_v55, 0.0 }
 0x285   : > { %v2921_v27 = vmul.f32 %v6204_v57, %v2920_v1  ;;  %vm3129_vm1 = vcmp.eq.f32.partialorder %v6118_v41, 0.0  ;;  %v2915_v40 = vsel %vm2913_vm0, %v2914_v25, %v2912_v60  ;;  %v2544_v3 = vsub.f32 1.5, %v2543_v0 }
 0x286   : > { %v4077_v48 = vpop.eup %4076  ;;  %v2338_v15 = vmul.f32 %v6265_v2, %v2337_v50  ;;  %v2554_v35 = vmul.f32 %v6274_v63, %v2553_v56  ;;  %v3131_v10 = vsel %vm3129_vm1, %v3130_v32, %v3128_v20  ;;  %vm2923_vm2 = vcmp.eq.f32.partialorder %v6173_v51, inf }
 0x287   : > { %v3133_v24 = vmul.f32 %v4077_v48, %v6249_v6  ;;  %v6299_v7 = vpop.xlane.xlu2 %2707  ;;  %v6320_v55 = vmul.f32 %v3228_v33, %v3228_v33  ;;  %v2926_v41 = vand.u32 2147483648, %v6173_v51  ;;  %vm2925_vm3 = vcmp.eq.f32.partialorder %v6173_v51, 0.0 }
 0x288   : > { %4082 = vrsqrt.f32 %v6299_v7  ;;  %v6307_v43 = vpop.xlane.xlu0 %2746  ;;  %v3309_v25 = vmul.f32 %v3277_v26, %v6314_v38  ;;  %v2922_v50 = vmul.f32 %v2921_v27, %v6173_v51  ;;  %v3260_v60 = vmul.f32 %v6149_v14, %v2915_v40 }
 0x289   : > { %v3134_v5 = vmul.f32 %v4077_v48, %v3133_v24  ;;  %v6322_v57 = vpop.eup %4078  ;;  %v2545_v20 = vmul.f32 %v6222_v36, %v2544_v3  ;;  %v2339_v33 = vmul.f32 0.5, %v2338_v15  ;;  %v2555_v32 = vmul.f32 0.5, %v2554_v35  ;;  %v6353_v36 = vld [vmem:[%s4380_s13 + $0x60] sm:$0xff] }
 0x28a   : > { %v6305_v12 = vpop.xlane.xlu1 %2740  ;;  %v6329_v0 = vpop.eup %4080  ;;  %v3073_v26 = vmul.f32 %v6322_v57, %v6253_v53  ;;  %v6350_v3 = vmul.f32 %v3309_v25, %v3309_v25  ;;  %vm3139_vm4 = vcmp.eq.f32.partialorder %v6249_v6, inf  ;;  %v3142_v44 = vand.u32 2147483648, %v6249_v6 }
 0x28b   : > { %v3135_v42 = vmul.f32 0.5, %v3134_v5  ;;  %v3278_v5 = vmul.f32 %v6149_v14, %v3131_v10  ;;  %4084 = vrsqrt.f32 %v6305_v12  ;;  %v2349_v40 = vmul.f32 %v6329_v0, %v6255_v19 }
 0x28c   : > { %2169 = vmin.xlane.f32.xlu2 %v5992_v28  ;;  %4086 = vrsqrt.f32 %v6307_v43  ;;  %v2340_v21 = vsub.f32 1.5, %v2339_v33  ;;  %v2556_v10 = vsub.f32 1.5, %v2555_v32  ;;  %v6363_v25 = vmul.f32 %v2545_v20, %v6171_v4 }
 0x28d   : > { %v3136_v56 = vsub.f32 1.5, %v3135_v42  ;;  %v3310_v11 = vmul.f32 %v3278_v5, %v6241_v29  ;;  %v3074_v16 = vmul.f32 %v6322_v57, %v3073_v26  ;;  %vm2559_vm5 = vcmp.eq.f32.partialorder %v6212_v46, inf }
 0x28e   : > { %v4083_v24 = vpop.eup %4082  ;;  %vm3141_vm6 = vcmp.eq.f32.partialorder %v6249_v6, 0.0  ;;  %v2341_v26 = vmul.f32 %v6265_v2, %v2340_v21  ;;  %vm2561_vm7 = vcmp.eq.f32.partialorder %v6212_v46, 0.0  ;;  %vm2935_vm8 = vcmp.eq.f32.partialorder %v6299_v7, inf }
 0x28f   : > { %v3137_v28 = vmul.f32 %v4077_v48, %v3136_v56  ;;  %v2929_v1 = vmul.f32 %v4083_v24, %v6299_v7  ;;  %v6340_v27 = vpop.xlane.xlu2 %2208  ;;  %v2924_v56 = vsel %vm2923_vm2, %v6173_v51, %v2922_v50  ;;  %v2350_v50 = vmul.f32 %v6329_v0, %v2349_v40 }
 0x290   : > { %4088 = vrsqrt.f32 %v6340_v27  ;;  %v6348_v15 = vpop.xlane.xlu0 %2695  ;;  %v2927_v32 = vsel %vm2925_vm3, %v2926_v41, %v2924_v56  ;;  %v2557_v51 = vmul.f32 %v6274_v63, %v2556_v10  ;;  %v3374_v40 = vmul.f32 %v3310_v11, %v3310_v11 }
 0x291   : > { %v3138_v48 = vmul.f32 %v3137_v28, %v6249_v6  ;;  %v2930_v42 = vmul.f32 %v4083_v24, %v2929_v1  ;;  %v3292_v28 = vmul.f32 %v3260_v60, %v6353_v36  ;;  %v6367_v54 = vpop.eup %4084  ;;  %v3261_v1 = vmul.f32 %v6149_v14, %v2927_v32 }
 0x292   : > { %v6346_v35 = vpop.xlane.xlu1 %2737  ;;  %v6374_v29 = vpop.eup %4086  ;;  %v3061_v22 = vmul.f32 %v6367_v54, %v6305_v12  ;;  %v6407_v63 = vmul.f32 %v2341_v26, %v6210_v52  ;;  %v2938_v10 = vand.u32 2147483648, %v6299_v7  ;;  %vm2937_vm9 = vcmp.eq.f32.partialorder %v6299_v7, 0.0 }
 0x293   : > { %v2931_v13 = vmul.f32 0.5, %v2930_v42  ;;  %4090 = vrsqrt.f32 %v6346_v35  ;;  %v3140_v60 = vsel %vm3139_vm4, %v6249_v6, %v3138_v48  ;;  %v3075_v42 = vmul.f32 0.5, %v3074_v16 }
 0x294   : > { %v3143_v41 = vsel %vm3141_vm6, %v3142_v44, %v3140_v60  ;;  %v6391_v33 = vmul.f32 %v3292_v28, %v3292_v28  ;;  %v2351_v48 = vmul.f32 0.5, %v2350_v50  ;;  %v3085_v11 = vmul.f32 %v6374_v29, %v6307_v43 }
 0x295   : > { %v2932_v5 = vsub.f32 1.5, %v2931_v13  ;;  %v3279_v2 = vmul.f32 %v6149_v14, %v3143_v41  ;;  %v3293_v60 = vmul.f32 %v3261_v1, %v6287_v62  ;;  %v3076_v41 = vsub.f32 1.5, %v3075_v42 }
 0x296   : > { %v6382_v20 = vpop.eup %4088  ;;  %v3062_v26 = vmul.f32 %v6367_v54, %v3061_v22  ;;  %v3086_v17 = vmul.f32 %v6374_v29, %v3085_v11  ;;  %v6427_v62 = vadd.f32 %v3374_v40, %v6284_v37  ;;  %vm2571_vm10 = vcmp.eq.f32.partialorder %v6340_v27, inf }
 0x297   : > { %v2565_v13 = vmul.f32 %v6382_v20, %v6340_v27  ;;  %v6388_v56 = vpop.xlane.xlu2 %2157  ;;  %v2933_v6 = vmul.f32 %v4083_v24, %v2932_v5  ;;  %v2558_v24 = vmul.f32 %v2557_v51, %v6212_v46  ;;  %v2352_v51 = vsub.f32 1.5, %v2351_v48 }
 0x298   : > { %4092 = vrsqrt.f32 %v6388_v56  ;;  %v6398_v44 = vpop.xlane.xlu0 %2692  ;;  %v3311_v61 = vmul.f32 %v3279_v2, %v6200_v31  ;;  %v3357_v11 = vmul.f32 %v3293_v60, %v3293_v60  ;;  %v3077_v2 = vmul.f32 %v6322_v57, %v3076_v41 }
 0x299   : > { %v2566_v16 = vmul.f32 %v6382_v20, %v2565_v13  ;;  %4094 = vrsqrt.f32 %v6348_v15  ;;  %v6412_v28 = vpop.eup %4090  ;;  %v2934_v13 = vmul.f32 %v2933_v6, %v6299_v7  ;;  %v2560_v22 = vsel %vm2559_vm5, %v6212_v46, %v2558_v24 }
 0x29a   : > { %v6396_v21 = vpop.xlane.xlu1 %2734  ;;  %v3375_v6 = vmul.f32 %v3311_v61, %v3311_v61  ;;  %v3063_v32 = vmul.f32 0.5, %v3062_v26  ;;  %v3087_v45 = vmul.f32 0.5, %v3086_v17  ;;  %v8005_v41 = vand.u32 2147483648, %v6212_v46 }
 0x29b   : > { %v2567_v5 = vmul.f32 0.5, %v2566_v16  ;;  %4096 = vrsqrt.f32 %v6396_v21  ;;  %v3049_v16 = vmul.f32 %v6412_v28, %v6346_v35  ;;  %v2936_v24 = vsel %vm2935_vm8, %v6299_v7, %v2934_v13 }
 0x29c   : > { %4098 = vrsqrt.f32 %v6398_v44  ;;  %v3407_v18 = vadd.f32 %v3375_v6, %v6257_v49  ;;  %v6456_v26 = vsel %vm2561_vm7, %v8005_v41, %v2560_v22  ;;  %v2939_v49 = vsel %vm2937_vm9, %v2938_v10, %v2936_v24 }
 0x29d   : > { %v2568_v42 = vsub.f32 1.5, %v2567_v5  ;;  %v2353_v5 = vmul.f32 %v6329_v0, %v2352_v51  ;;  %v3050_v57 = vmul.f32 %v6412_v28, %v3049_v16  ;;  %v6468_v16 = vmul.f32 %v3077_v2, %v6253_v53 }
 0x29e   : > { %v4093_v50 = vpop.eup %4092  ;;  %3502 = vrot.lane.b32.xlu0 %v3407_v18, %s4283_s22  ;;  %v3064_v46 = vsub.f32 1.5, %v3063_v32  ;;  %v2574_v22 = vand.u32 2147483648, %v6340_v27  ;;  %v3262_v2 = vmul.f32 %v6149_v14, %v2939_v49  ;;  %vm2573_vm11 = vcmp.eq.f32.partialorder %v6340_v27, 0.0 }
 0x29f   : > { %v6432_v1 = vpop.eup %4094  ;;  %v2361_v48 = vmul.f32 %v4093_v50, %v6388_v56  ;;  %v6435_v31 = vpop.xlane.xlu2 %2749  ;;  %v2569_v17 = vmul.f32 %v6382_v20, %v2568_v42  ;;  %v6475_v18 = vmul.f32 %v2353_v5, %v6255_v19  ;;  %v3088_v20 = vsub.f32 1.5, %v3087_v45 }
 0x2a0   : > { %4100 = vrsqrt.f32 %v6435_v31  ;;  %v6441_v40 = vpop.xlane.xlu0 %2689  ;;  %v2881_v60 = vmul.f32 %v6432_v1, %v6348_v15  ;;  %v3051_v24 = vmul.f32 0.5, %v3050_v57  ;;  %v3294_v41 = vmul.f32 %v3262_v2, %v6229_v47 }
 0x2a1   : > { %v2362_v61 = vmul.f32 %v4093_v50, %v2361_v48  ;;  %v6458_v13 = vpop.eup %4096  ;;  %v3389_v48 = vadd.f32 %v3357_v11, %v6320_v55  ;;  %v3089_v57 = vmul.f32 %v6374_v29, %v3088_v20  ;;  %vm2367_vm12 = vcmp.eq.f32.partialorder %v6388_v56, inf }
 0x2a2   : > { %v6439_v37 = vpop.xlane.xlu1 %2731  ;;  %v6465_v51 = vpop.eup %4098  ;;  %v2882_v10 = vmul.f32 %v6432_v1, %v2881_v60  ;;  %v3037_v6 = vmul.f32 %v6458_v13, %v6396_v21  ;;  %v3065_v60 = vmul.f32 %v6367_v54, %v3064_v46  ;;  %v3358_v46 = vmul.f32 %v3294_v41, %v3294_v41 }
 0x2a3   : > { %8004 = vst [vmem:[#allocation82_spill] sm:$0xff] %v6439_v37  ;;  %v2363_v0 = vmul.f32 0.5, %v2362_v61  ;;  %4102 = vrsqrt.f32 %v6439_v37  ;;  %v2869_v45 = vmul.f32 %v6465_v51, %v6398_v44  ;;  %v3052_v11 = vsub.f32 1.5, %v3051_v24 }
 0x2a4   : > { %3470 = vrot.lane.b32.xlu2 %v6278_v9, %s4283_s22  ;;  %4104 = vrsqrt.f32 %v6441_v40  ;;  %v2570_v9 = vmul.f32 %v2569_v17, %v6340_v27  ;;  %v2883_v54 = vmul.f32 0.5, %v2882_v10  ;;  %v3038_v47 = vmul.f32 %v6458_v13, %v3037_v6 }
 0x2a5   : > { %v2364_v42 = vsub.f32 1.5, %v2363_v0  ;;  %v2870_v2 = vmul.f32 %v6465_v51, %v2869_v45  ;;  %v3390_v10 = vadd.f32 %v3358_v46, %v6271_v34  ;;  %v6523_v6 = vmul.f32 %v3065_v60, %v6305_v12 }
 0x2a6   : > { %v6478_v7 = vpop.eup %4100  ;;  %3500 = vrot.lane.b32.xlu0 %v6427_v62, %s4283_s22  ;;  %v2370_v62 = vand.u32 2147483648, %v6388_v56  ;;  %vm2369_vm13 = vcmp.eq.f32.partialorder %v6388_v56, 0.0  ;;  %vm3103_vm14 = vcmp.eq.f32.partialorder %v6435_v31, inf  ;;  %vm2547_vm15 = vcmp.eq.f32.partialorder %v6171_v4, inf }
 0x2a7   : > { %v3097_v5 = vmul.f32 %v6478_v7, %v6435_v31  ;;  %v6490_v61 = vpop.xlane.xlu2 %2698  ;;  %v2365_v49 = vmul.f32 %v4093_v50, %v2364_v42  ;;  %v2572_v50 = vsel %vm2571_vm10, %v6340_v27, %v2570_v9  ;;  %v2884_v9 = vsub.f32 1.5, %v2883_v54  ;;  %3468 = vrot.lane.b32.xlu1 %v3390_v10, %s4283_s22 }
 0x2a8   : > { %v6503_v23 = vpop.xlane.xlu0 %2686  ;;  %4106 = vrsqrt.f32 %v6490_v61  ;;  %v2575_v34 = vsel %vm2573_vm11, %v2574_v22, %v2572_v50  ;;  %vm2549_vm0 = vcmp.eq.f32.partialorder %v6171_v4, 0.0  ;;  %vm3091_vm1 = vcmp.eq.f32.partialorder %v6307_v43, inf }
 0x2a9   : > { %v6498_v17 = vpop.eup %4102  ;;  %v3098_v32 = vmul.f32 %v6478_v7, %v3097_v5  ;;  %v2366_v24 = vmul.f32 %v2365_v49, %v6388_v56  ;;  %v3053_v5 = vmul.f32 %v6412_v28, %v3052_v11  ;;  %v3212_v41 = vmul.f32 %v6033_v30, %v2575_v34 }
 0x2aa   : > { %v6494_v0 = vpop.xlane.xlu1 %2728  ;;  %v6507_v55 = vpop.eup %4104  ;;  %v3025_v29 = vmul.f32 %v6498_v17, %v6439_v37  ;;  %vm3105_vm2 = vcmp.eq.f32.partialorder %v6435_v31, 0.0  ;;  %vm2355_vm3 = vcmp.eq.f32.partialorder %v6255_v19, inf  ;;  %vm2343_vm4 = vcmp.eq.f32.partialorder %v6210_v52, inf }
 0x2ab   : > { %v3099_v20 = vmul.f32 0.5, %v3098_v32  ;;  %v2857_v42 = vmul.f32 %v6507_v55, %v6441_v40  ;;  %4108 = vrsqrt.f32 %v6494_v0  ;;  %v3039_v32 = vmul.f32 0.5, %v3038_v47 }
 0x2ac   : > { %3466 = vrot.lane.b32.xlu2 %v3389_v48, %s4283_s22  ;;  %4110 = vrsqrt.f32 %v6503_v23  ;;  %v6533_v48 = vmul.f32 %v3089_v57, %v6307_v43  ;;  %v3026_v60 = vmul.f32 %v6498_v17, %v3025_v29  ;;  %v2871_v47 = vmul.f32 0.5, %v2870_v2 }
 0x2ad   : > { %v3100_v46 = vsub.f32 1.5, %v3099_v20  ;;  %v2858_v10 = vmul.f32 %v6507_v55, %v2857_v42  ;;  %v3244_v22 = vmul.f32 %v3212_v41, %v6314_v38  ;;  %v2368_v28 = vsel %vm2367_vm12, %v6388_v56, %v2366_v24 }
 0x2ae   : > { %v6540_v54 = vpop.eup %4106  ;;  %v2885_v2 = vmul.f32 %v6432_v1, %v2884_v9  ;;  %v3040_v29 = vsub.f32 1.5, %v3039_v32  ;;  %v6558_v20 = vmul.f32 %v6033_v30, %v6456_v26  ;;  %v6563_v42 = vmul.f32 %v3053_v5, %v6346_v35 }
 0x2af   : > { %v6538_v49 = vpop.xlane.xlu2 %2199  ;;  %v3027_v24 = vmul.f32 0.5, %v3026_v60  ;;  %v2893_v34 = vmul.f32 %v6540_v54, %v6490_v61  ;;  %v3341_v41 = vmul.f32 %v3244_v22, %v3244_v22  ;;  %v2872_v9 = vsub.f32 1.5, %v2871_v47 }
 0x2b0   : > { %4112 = vrsqrt.f32 %v6538_v49  ;;  %v6568_v1 = vpop.xlane.xlu0 %2683  ;;  %v3101_v32 = vmul.f32 %v6478_v7, %v3100_v46  ;;  %v2859_v45 = vmul.f32 0.5, %v2858_v10  ;;  %v2371_v26 = vsel %vm2369_vm13, %v2370_v62, %v2368_v28 }
 0x2b1   : > { %v6552_v11 = vpop.eup %4108  ;;  %v3405_v60 = vadd.f32 %v6350_v3, %v3341_v41  ;;  %v6582_v47 = vmul.f32 %v2885_v2, %v6348_v15  ;;  %v3041_v7 = vmul.f32 %v6458_v13, %v3040_v29  ;;  %v3028_v62 = vsub.f32 1.5, %v3027_v24 }
 0x2b2   : > { %v6546_v57 = vpop.xlane.xlu1 %2725  ;;  %v6560_v38 = vpop.eup %4110  ;;  %v3013_v5 = vmul.f32 %v6552_v11, %v6494_v0  ;;  %v2894_v46 = vmul.f32 %v6540_v54, %v2893_v34  ;;  %v3195_v10 = vmul.f32 %v6033_v30, %v2371_v26  ;;  %v2873_v13 = vmul.f32 %v6465_v51, %v2872_v9 }
 0x2b3   : > { %v2845_v27 = vmul.f32 %v6560_v38, %v6503_v23  ;;  %4114 = vrsqrt.f32 %v6546_v57  ;;  %3498 = vrot.lane.b32.xlu1 %v3405_v60, %s4283_s22  ;;  %v3102_v2 = vmul.f32 %v3101_v32, %v6435_v31  ;;  %v2860_v24 = vsub.f32 1.5, %v2859_v45 }
 0x2b4   : > { %4116 = vrsqrt.f32 %v6568_v1  ;;  %v3014_v34 = vmul.f32 %v6552_v11, %v3013_v5  ;;  %v3227_v60 = vmul.f32 %v3195_v10, %v6353_v36  ;;  %v6605_v26 = vmul.f32 %v3041_v7, %v6396_v21  ;;  %v3178_v36 = vld [vmem:[%s4380_s13 + $0xe0] sm:$0xff] }
 0x2b5   : > { %v2846_v41 = vmul.f32 %v6560_v38, %v2845_v27  ;;  %v3029_v27 = vmul.f32 %v6498_v17, %v3028_v62  ;;  %v2895_v32 = vmul.f32 0.5, %v2894_v46  ;;  %v6619_v7 = vmul.f32 %v2873_v13, %v6398_v44 }
 0x2b6   : > { %v6579_v22 = vpop.eup %4112  ;;  %8006 = vst [vmem:[#allocation46_spill] sm:$0xff] %v6605_v26  ;;  %v3324_v5 = vmul.f32 %v3227_v60, %v3227_v60  ;;  %v3104_v51 = vsel %vm3103_vm14, %v6435_v31, %v3102_v2  ;;  %v2861_v17 = vmul.f32 %v6507_v55, %v2860_v24  ;;  %v3015_v62 = vmul.f32 0.5, %v3014_v34 }
 0x2b7   : > { %v2529_v3 = vmul.f32 %v6579_v22, %v6538_v49  ;;  %v6593_v28 = vpop.xlane.xlu2 %2196  ;;  %v2847_v46 = vmul.f32 0.5, %v2846_v41  ;;  %v6638_v2 = vmul.f32 %v3029_v27, %v6439_v37  ;;  %v2896_v55 = vsub.f32 1.5, %v2895_v32 }
 0x2b8   : > { %4118 = vrsqrt.f32 %v6593_v28  ;;  %v3388_v60 = vadd.f32 %v6391_v33, %v3324_v5  ;;  %v6635_v29 = vpop.xlane.xlu0 %2680  ;;  %v8008_v24 = vand.u32 2147483648, %v6435_v31  ;;  %v2548_v27 = vsel %vm2547_vm15, %v6171_v4, %v6363_v25 }
 0x2b9   : > { %v2530_v9 = vmul.f32 %v6579_v22, %v2529_v3  ;;  %v6610_v45 = vpop.eup %4114  ;;  %8007 = vst [vmem:[#allocation89_spill] sm:$0xff] %v6638_v2  ;;  %v6656_v32 = vmul.f32 %v2861_v17, %v6441_v40  ;;  %v2848_v3 = vsub.f32 1.5, %v2847_v46  ;;  %v2897_v25 = vmul.f32 %v6540_v54, %v2896_v55  ;;  %v3177_v54 = vld [vmem:[%s4380_s13 + $0xd8] sm:$0xff] }
 0x2ba   : > { %v6614_v10 = vpop.xlane.xlu1 %2722  ;;  %v6616_v56 = vpop.eup %4116  ;;  %v3001_v13 = vmul.f32 %v6610_v45, %v6546_v57  ;;  %3464 = vrot.lane.b32.xlu0 %v3388_v60, %s4283_s22  ;;  %v3107_v34 = vsel %vm3105_vm2, %v8008_v24, %v3104_v51  ;;  %v3016_v60 = vsub.f32 1.5, %v3015_v62  ;;  %vm2899_vm5 = vcmp.eq.f32.partialorder %v6490_v61, inf }
 0x2bb   : > { %v2531_v26 = vmul.f32 0.5, %v2530_v9  ;;  %4120 = vrsqrt.f32 %v6614_v10  ;;  %v2833_v33 = vmul.f32 %v6616_v56, %v6568_v1  ;;  %v3243_v9 = vmul.f32 %v6558_v20, %v3178_v36 }
 0x2bc   : > { %v3276_v5 = vmul.f32 %v6149_v14, %v3107_v34  ;;  %4122 = vrsqrt.f32 %v6635_v29  ;;  %v3002_v51 = vmul.f32 %v6610_v45, %v3001_v13  ;;  %v8009_v20 = vand.u32 2147483648, %v6171_v4 }
 0x2bd   : > { %v2532_v31 = vsub.f32 1.5, %v2531_v26  ;;  %v2834_v17 = vmul.f32 %v6616_v56, %v2833_v33  ;;  %v3092_v26 = vsel %vm3091_vm1, %v6307_v43, %v6533_v48  ;;  %vm3093_vm6 = vcmp.eq.f32.partialorder %v6307_v43, 0.0 }
 0x2be   : > { %v6629_v50 = vpop.eup %4118  ;;  %v3308_v24 = vmul.f32 %v3276_v5, %v3178_v36  ;;  %v2551_v34 = vsel %vm2549_vm0, %v8009_v20, %v2548_v27  ;;  %v3340_v36 = vmul.f32 %v3243_v9, %v3243_v9  ;;  %v3017_v33 = vmul.f32 %v6552_v11, %v3016_v60 }
 0x2bf   : > { %v2517_v41 = vmul.f32 %v6629_v50, %v6593_v28  ;;  %v6679_v55 = vpop.xlane.xlu2 %2193  ;;  %v2849_v5 = vmul.f32 %v6560_v38, %v2848_v3  ;;  %v8010_v48 = vand.u32 2147483648, %v6307_v43  ;;  %v3210_v20 = vmul.f32 %v6033_v30, %v2551_v34 }
 0x2c0   : > { %v3372_v13 = vmul.f32 %v3308_v24, %v3308_v24  ;;  %vm2887_vm7 = vcmp.eq.f32.partialorder %v6348_v15, inf  ;;  %v3003_v9 = vmul.f32 0.5, %v3002_v51  ;;  %v6691_v37 = vmul.f32 0.5, %v2834_v17 }
 0x2c1   : > { %v6672_v46 = vpop.eup %4120  ;;  %v2518_v4 = vmul.f32 %v6629_v50, %v2517_v41  ;;  %v3095_v27 = vsel %vm3093_vm6, %v8010_v48, %v3092_v26  ;;  %v2533_v41 = vmul.f32 %v6579_v22, %v2532_v31  ;;  %v3242_v38 = vmul.f32 %v3210_v20, %v3177_v54 }
 0x2c2   : > { %v3404_v24 = vadd.f32 %v3372_v13, %v3340_v36  ;;  %v3275_v62 = vmul.f32 %v6149_v14, %v3095_v27  ;;  %v6689_v2 = vpop.eup %4122  ;;  %v2989_v11 = vmul.f32 %v6672_v46, %v6614_v10  ;;  %4124 = vrsqrt.f32 %v6679_v55  ;;  %v6700_v31 = vpop.xlane.xlu1 %2719 }
 0x2c3   : > { %vm2331_vm8 = vcmp.eq.f32.partialorder %v5877_v8, inf  ;;  %v2898_v43 = vmul.f32 %v2897_v25, %v6490_v61  ;;  %v2519_v3 = vmul.f32 0.5, %v2518_v4  ;;  %v2526_v22 = vand.u32 2147483648, %v6593_v28 }
 0x2c4   : > { %3496 = vrot.lane.b32.xlu2 %v3404_v24, %s4283_s22  ;;  %v3307_v60 = vmul.f32 %v3275_v62, %v3177_v54  ;;  %v6703_v51 = vmul.f32 %v3017_v33, %v6494_v0  ;;  %v6706_v34 = vmul.f32 %v2849_v5, %v6503_v23  ;;  %v2830_v26 = vand.u32 2147483648, %v6635_v29  ;;  %v6718_v5 = vpop.xlane.xlu0 %2677 }
 0x2c5   : > { %v3004_v36 = vsub.f32 1.5, %v3003_v9  ;;  %v2821_v25 = vmul.f32 %v6689_v2, %v6635_v29  ;;  %v3339_v4 = vmul.f32 %v3242_v38, %v3242_v38  ;;  %v6713_v62 = vmul.f32 %v2533_v41, %v6538_v49 }
 0x2c6   : > { %v3371_v13 = vmul.f32 %v3307_v60, %v3307_v60  ;;  %v2836_v54 = vsub.f32 1.5, %v6691_v37  ;;  %v2990_v33 = vmul.f32 %v6672_v46, %v2989_v11  ;;  %4126 = vrsqrt.f32 %v6700_v31  ;;  %v3161_v11 = vld [vmem:[%s4380_s13 + $0x58] sm:$0xff] }
 0x2c7   : > { %vm2875_vm9 = vcmp.eq.f32.partialorder %v6398_v44, inf  ;;  %v2520_v48 = vsub.f32 1.5, %v2519_v3  ;;  %v2356_v20 = vsel %vm2355_vm3, %v6255_v19, %v6475_v18  ;;  %vm2357_vm10 = vcmp.eq.f32.partialorder %v6255_v19, 0.0 }
 0x2c8   : > { %v3403_v27 = vadd.f32 %v3371_v13, %v3339_v4  ;;  %v6726_v41 = vpop.eup %4124  ;;  %v8011_v37 = vand.u32 2147483648, %v6255_v19  ;;  %v2900_v24 = vsel %vm2899_vm5, %v6490_v61, %v2898_v43  ;;  %vm2901_vm11 = vcmp.eq.f32.partialorder %v6490_v61, 0.0 }
 0x2c9   : > { %v2344_v18 = vsel %vm2343_vm4, %v6210_v52, %v6407_v63  ;;  %v2822_v38 = vmul.f32 %v6689_v2, %v2821_v25  ;;  %v2505_v19 = vmul.f32 %v6726_v41, %v6679_v55  ;;  %v8012_v3 = vand.u32 2147483648, %v6490_v61  ;;  %v3160_v61 = vld [vmem:[%s4380_s13 + $0x50] sm:$0xff] }
 0x2ca   : > { %v2359_v9 = vsel %vm2357_vm10, %v8011_v37, %v2356_v20  ;;  %3494 = vrot.lane.b32.xlu0 %v3403_v27, %s4283_s22  ;;  %4128 = vrsqrt.f32 %v6718_v5  ;;  %vm2345_vm12 = vcmp.eq.f32.partialorder %v6210_v52, 0.0  ;;  %v2888_v63 = vsel %vm2887_vm7, %v6348_v15, %v6582_v47 }
 0x2cb   : > { %v2903_v60 = vsel %vm2901_vm11, %v8012_v3, %v2900_v24  ;;  %v3194_v43 = vmul.f32 %v6033_v30, %v2359_v9  ;;  %v2991_v25 = vmul.f32 0.5, %v2990_v33  ;;  %v8013_v27 = vand.u32 2147483648, %v6210_v52 }
 0x2cc   : > { %v3259_v4 = vmul.f32 %v6149_v14, %v2903_v60  ;;  %vm2889_vm13 = vcmp.eq.f32.partialorder %v6348_v15, 0.0  ;;  %v6757_v37 = vpop.eup %4126  ;;  %v8014_v24 = vand.u32 2147483648, %v6348_v15  ;;  %v2332_v47 = vsel %vm2331_vm8, %v5877_v8, %v6268_v58 }
 0x2cd   : > { %v3226_v13 = vmul.f32 %v3194_v43, %v3161_v11  ;;  %v2347_v20 = vsel %vm2345_vm12, %v8013_v27, %v2344_v18  ;;  %v3005_v33 = vmul.f32 %v6610_v45, %v3004_v36  ;;  %v2823_v52 = vmul.f32 0.5, %v2822_v38  ;;  %v6768_v27 = vpop.xlane.xlu2 %2190 }
 0x2ce   : > { %v3291_v9 = vmul.f32 %v3259_v4, %v3161_v11  ;;  %v2891_v3 = vsel %vm2889_vm13, %v8014_v24, %v2888_v63  ;;  %v3193_v60 = vmul.f32 %v6033_v30, %v2347_v20  ;;  %v2506_v18 = vmul.f32 %v6726_v41, %v2505_v19  ;;  %v6772_v4 = vpop.xlane.xlu1 %2716 }
 0x2cf   : > { %v3323_v43 = vmul.f32 %v3226_v13, %v3226_v13  ;;  %v3258_v15 = vmul.f32 %v6149_v14, %v2891_v3  ;;  %vm2333_vm14 = vcmp.eq.f32.partialorder %v5877_v8, 0.0  ;;  %vm3079_vm15 = vcmp.eq.f32.partialorder %v6253_v53, inf  ;;  %v6788_v3 = vpop.xlane.xlu0 %2674 }
 0x2d0   : > { %v3355_v17 = vmul.f32 %v3291_v9, %v3291_v9  ;;  %v3225_v11 = vmul.f32 %v3193_v60, %v3160_v61  ;;  %vm2535_vm0 = vcmp.eq.f32.partialorder %v6538_v49, inf  ;;  %v2837_v58 = vmul.f32 %v6616_v56, %v2836_v54  ;;  %v6782_v63 = vpop.eup %4128 }
 0x2d1   : > { %v2521_v45 = vmul.f32 %v6629_v50, %v2520_v48  ;;  %v2977_v36 = vmul.f32 %v6757_v37, %v6700_v31  ;;  %v8015_v38 = vand.u32 2147483648, %v5877_v8  ;;  %v2992_v13 = vsub.f32 1.5, %v2991_v25  ;;  %v3159_v48 = vld [vmem:[%s4380_s13 + $0x48] sm:$0xff] }
 0x2d2   : > { %v3387_v20 = vadd.f32 %v3355_v17, %v3323_v43  ;;  %v3290_v9 = vmul.f32 %v3258_v15, %v3160_v61  ;;  %v2876_v24 = vsel %vm2875_vm9, %v6398_v44, %v6619_v7  ;;  %v2824_v56 = vsub.f32 1.5, %v2823_v52 }
 0x2d3   : > { %v2335_v19 = vsel %vm2333_vm14, %v8015_v38, %v2332_v47  ;;  %v2507_v50 = vmul.f32 0.5, %v2506_v18  ;;  %v3322_v54 = vmul.f32 %v3225_v11, %v3225_v11  ;;  %vm2877_vm1 = vcmp.eq.f32.partialorder %v6398_v44, 0.0 }
 0x2d4   : > { %3462 = vrot.lane.b32.xlu1 %v3387_v20, %s4283_s22  ;;  %v3354_v8 = vmul.f32 %v3290_v9, %v3290_v9  ;;  %v8016_v25 = vand.u32 2147483648, %v6398_v44  ;;  %v3192_v61 = vmul.f32 %v6033_v30, %v2335_v19  ;;  %4130 = vrsqrt.f32 %v6768_v27 }
 0x2d5   : > { %v6798_v7 = vmul.f32 %v3005_v33, %v6546_v57  ;;  %v2978_v60 = vmul.f32 %v6757_v37, %v2977_v36  ;;  %v2809_v47 = vmul.f32 %v6782_v63, %v6718_v5  ;;  %v6805_v18 = vmul.f32 %v2837_v58, %v6568_v1  ;;  %v6818_v9 = vpop.xlane.xlu2 %2187 }
 0x2d6   : > { %v2879_v17 = vsel %vm2877_vm1, %v8016_v25, %v2876_v24  ;;  %v2514_v44 = vand.u32 2147483648, %v6679_v55  ;;  %v3386_v43 = vadd.f32 %v3354_v8, %v3322_v54  ;;  %v3224_v11 = vmul.f32 %v3192_v61, %v3159_v48  ;;  %v3176_v61 = vld [vmem:[%s4380_s13 + $0xd0] sm:$0xff] }
 0x2d7   : > { %v3257_v52 = vmul.f32 %v6149_v14, %v2879_v17  ;;  %v2522_v15 = vmul.f32 %v2521_v45, %v6593_v28  ;;  %v2993_v38 = vmul.f32 %v6672_v46, %v2992_v13  ;;  %4132 = vrsqrt.f32 %v6772_v4 }
 0x2d8   : > { %vm2523_vm2 = vcmp.eq.f32.partialorder %v6593_v28, inf  ;;  %v2825_v36 = vmul.f32 %v6689_v2, %v2824_v56  ;;  %v2508_v19 = vsub.f32 1.5, %v2507_v50  ;;  %3460 = vrot.lane.b32.xlu2 %v3386_v43, %s4283_s22  ;;  %4134 = vrsqrt.f32 %v6788_v3  ;;  %v6832_v50 = vpop.xlane.xlu1 %2713 }
 0x2d9   : > { %v3289_v33 = vmul.f32 %v3257_v52, %v3159_v48  ;;  %vm3067_vm3 = vcmp.eq.f32.partialorder %v6305_v12, inf  ;;  %v2979_v58 = vmul.f32 0.5, %v2978_v60  ;;  %v2810_v46 = vmul.f32 %v6782_v63, %v2809_v47  ;;  %v6845_v52 = vpop.xlane.xlu0 %2671 }
 0x2da   : > { %v3321_v45 = vmul.f32 %v3224_v11, %v3224_v11  ;;  %v6820_v24 = vpop.eup %4130  ;;  %v2536_v2 = vsel %vm2535_vm0, %v6538_v49, %v6713_v62  ;;  %vm2537_vm4 = vcmp.eq.f32.partialorder %v6538_v49, 0.0  ;;  %v3080_v56 = vsel %vm3079_vm15, %v6253_v53, %v6468_v16 }
 0x2db   : > { %v3353_v13 = vmul.f32 %v3289_v33, %v3289_v33  ;;  %vm3081_vm5 = vcmp.eq.f32.partialorder %v6253_v53, 0.0  ;;  %v2493_v48 = vmul.f32 %v6820_v24, %v6768_v27  ;;  %v8017_v8 = vand.u32 2147483648, %v6538_v49 }
 0x2dc   : > { %v8018_v62 = vand.u32 2147483648, %v6253_v53  ;;  %v2509_v60 = vmul.f32 %v6726_v41, %v2508_v19  ;;  %4136 = vrsqrt.f32 %v6818_v9  ;;  %v6850_v11 = vmul.f32 %v2993_v38, %v6614_v10 }
 0x2dd   : > { %v3385_v54 = vadd.f32 %v3353_v13, %v3321_v45  ;;  %v2539_v25 = vsel %vm2537_vm4, %v8017_v8, %v2536_v2  ;;  %v6847_v43 = vpop.eup %4132  ;;  %v2494_v53 = vmul.f32 %v6820_v24, %v2493_v48  ;;  %4138 = vrsqrt.f32 %v6832_v50 }
 0x2de   : > { %v3083_v17 = vsel %vm3081_vm5, %v8018_v62, %v3080_v56  ;;  %v3209_v47 = vmul.f32 %v6033_v30, %v2539_v25  ;;  %v6856_v41 = vpop.eup %4134  ;;  %vm2319_vm6 = vcmp.eq.f32.partialorder %v5871_v39, inf  ;;  %v2980_v33 = vsub.f32 1.5, %v2979_v58 }
 0x2df   : > { %v3274_v16 = vmul.f32 %v6149_v14, %v3083_v17  ;;  %3458 = vrot.lane.b32.xlu0 %v3385_v54, %s4283_s22  ;;  %v2965_v19 = vmul.f32 %v6847_v43, %v6772_v4  ;;  %v6862_v38 = vmul.f32 %v2825_v36, %v6635_v29  ;;  %v2811_v2 = vmul.f32 0.5, %v2810_v46 }
 0x2e0   : > { %v3241_v45 = vmul.f32 %v3209_v47, %v3176_v61  ;;  %v2797_v56 = vmul.f32 %v6856_v41, %v6788_v3  ;;  %4140 = vrsqrt.f32 %v6845_v52  ;;  %v6868_v54 = vmul.f32 %v2509_v60, %v6679_v55 }
 0x2e1   : > { %v3306_v13 = vmul.f32 %v3274_v16, %v3176_v61  ;;  %v2495_v48 = vmul.f32 0.5, %v2494_v53  ;;  %vm2863_vm7 = vcmp.eq.f32.partialorder %v6441_v40, inf  ;;  %v2966_v25 = vmul.f32 %v6847_v43, %v2965_v19 }
 0x2e2   : > { %v3338_v8 = vmul.f32 %v3241_v45, %v3241_v45  ;;  %v2798_v62 = vmul.f32 %v6856_v41, %v2797_v56  ;;  %v2524_v36 = vsel %vm2523_vm2, %v6593_v28, %v2522_v15  ;;  %vm2525_vm8 = vcmp.eq.f32.partialorder %v6593_v28, 0.0  ;;  %v6877_v46 = vpop.eup %4136 }
 0x2e3   : > { %v3370_v58 = vmul.f32 %v3306_v13, %v3306_v13  ;;  %v2981_v17 = vmul.f32 %v6757_v37, %v2980_v33  ;;  %v2527_v60 = vsel %vm2525_vm8, %v2526_v22, %v2524_v36  ;;  %v3068_v47 = vsel %vm3067_vm3, %v6305_v12, %v6523_v6  ;;  %v4139_v16 = vpop.eup %4138  ;;  %v6895_v33 = vld [vmem:[%s4380_s13 + $0xc8] sm:$0xff] }
 0x2e4   : > { %v2812_v53 = vsub.f32 1.5, %v2811_v2  ;;  %v2502_v15 = vand.u32 2147483648, %v6768_v27  ;;  %v2481_v19 = vmul.f32 %v6877_v46, %v6818_v9  ;;  %vm3069_vm9 = vcmp.eq.f32.partialorder %v6305_v12, 0.0 }
 0x2e5   : > { %v3402_v61 = vadd.f32 %v3370_v58, %v3338_v8  ;;  %v2496_v45 = vsub.f32 1.5, %v2495_v48  ;;  %v2953_v28 = vmul.f32 %v4139_v16, %v6832_v50  ;;  %v8019_v22 = vand.u32 2147483648, %v6305_v12 }
 0x2e6   : > { %v3208_v6 = vmul.f32 %v6033_v30, %v2527_v60  ;;  %v6898_v13 = vpop.eup %4140  ;;  %v2967_v2 = vmul.f32 0.5, %v2966_v25  ;;  %v2799_v56 = vmul.f32 0.5, %v2798_v62  ;;  %v2482_v8 = vmul.f32 %v6877_v46, %v2481_v19  ;;  %v8020_v19 = vld [vmem:[#allocation43_spill] sm:$0xff] }
 0x2e7   : > { %3492 = vrot.lane.b32.xlu1 %v3402_v61, %s4283_s22  ;;  %v3071_v37 = vsel %vm3069_vm9, %v8019_v22, %v3068_v47  ;;  %v6903_v48 = vmul.f32 %v2981_v17, %v6700_v31  ;;  %v2954_v36 = vmul.f32 %v4139_v16, %v2953_v28  ;;  %v2785_v12 = vmul.f32 %v6898_v13, %v6845_v52  ;;  %v6916_v47 = vpop.xlane.xlu2 %2184 }
 0x2e8   : > { %v3273_v58 = vmul.f32 %v6149_v14, %v3071_v37  ;;  %v3240_v61 = vmul.f32 %v3208_v6, %v6895_v33  ;;  %vm3055_vm10 = vcmp.eq.f32.partialorder %v6346_v35, inf  ;;  %vm2511_vm11 = vcmp.eq.f32.partialorder %v6679_v55, inf }
 0x2e9   : > { %v2813_v25 = vmul.f32 %v6782_v63, %v2812_v53  ;;  %v2483_v62 = vmul.f32 0.5, %v2482_v8  ;;  %v2320_v17 = vsel %vm2319_vm6, %v5871_v39, %v6104_v59  ;;  %vm2307_vm12 = vcmp.eq.f32.partialorder %v8020_v19, inf }
 0x2ea   : > { %v3305_v60 = vmul.f32 %v3273_v58, %v6895_v33  ;;  %v2497_v28 = vmul.f32 %v6820_v24, %v2496_v45  ;;  %v2955_v37 = vmul.f32 0.5, %v2954_v36  ;;  %v3337_v6 = vmul.f32 %v3240_v61, %v3240_v61  ;;  %v6931_v45 = vld [vmem:[%s4380_s13 + $0x40] sm:$0xff] }
 0x2eb   : > { %vm2851_vm13 = vcmp.eq.f32.partialorder %v6503_v23, inf  ;;  %v2968_v63 = vsub.f32 1.5, %v2967_v2  ;;  %v2800_v53 = vsub.f32 1.5, %v2799_v56  ;;  %vm2321_vm14 = vcmp.eq.f32.partialorder %v5871_v39, 0.0  ;;  %v6935_v56 = vpop.xlane.xlu0 %2668 }
 0x2ec   : > { %v3369_v8 = vmul.f32 %v3305_v60, %v3305_v60  ;;  %v2484_v58 = vsub.f32 1.5, %v2483_v62  ;;  %v2786_v59 = vmul.f32 %v6898_v13, %v2785_v12  ;;  %v8021_v20 = vand.u32 2147483648, %v5871_v39 }
 0x2ed   : > { %v2864_v24 = vsel %vm2863_vm7, %v6441_v40, %v6656_v32  ;;  %v2956_v36 = vsub.f32 1.5, %v2955_v37  ;;  %vm2865_vm15 = vcmp.eq.f32.partialorder %v6441_v40, 0.0  ;;  %v6938_v12 = vmul.f32 %v2813_v25, %v6718_v5 }
 0x2ee   : > { %v2323_v49 = vsel %vm2321_vm14, %v8021_v20, %v2320_v17  ;;  %v3401_v61 = vadd.f32 %v3369_v8, %v3337_v6  ;;  %v2806_v39 = vand.u32 2147483648, %v6788_v3  ;;  %v8022_v20 = vand.u32 2147483648, %v6441_v40 }
 0x2ef   : > { %v3191_v2 = vmul.f32 %v6033_v30, %v2323_v49  ;;  %4142 = vrsqrt.f32 %v6916_v47  ;;  %v2490_v32 = vand.u32 2147483648, %v6818_v9  ;;  %v6950_v25 = vmul.f32 %v2497_v28, %v6768_v27 }
 0x2f0   : > { %v2867_v62 = vsel %vm2865_vm15, %v8022_v20, %v2864_v24  ;;  %3490 = vrot.lane.b32.xlu2 %v3401_v61, %s4283_s22  ;;  %v2969_v37 = vmul.f32 %v6847_v43, %v2968_v63  ;;  %v2801_v40 = vmul.f32 %v6856_v41, %v2800_v53  ;;  %4144 = vrsqrt.f32 %v6935_v56  ;;  %v6977_v63 = vpop.xlane.xlu2 %2181 }
 0x2f1   : > { %v3223_v49 = vmul.f32 %v3191_v2, %v6931_v45  ;;  %v3256_v17 = vmul.f32 %v6149_v14, %v2867_v62  ;;  %v2485_v6 = vmul.f32 %v6877_v46, %v2484_v58  ;;  %v2957_v8 = vmul.f32 %v4139_v16, %v2956_v36  ;;  %v8023_v16 = vld [vmem:[#allocation11_spill] sm:$0xff] }
 0x2f2   : > { %v6956_v24 = vmul.f32 0.5, %v2786_v59  ;;  %v2512_v28 = vsel %vm2511_vm11, %v6679_v55, %v6868_v54  ;;  %vm2513_vm0 = vcmp.eq.f32.partialorder %v6679_v55, 0.0  ;;  %v3056_v43 = vsel %vm3055_vm10, %v6346_v35, %v6563_v42  ;;  %v6984_v59 = vld [vmem:[%s4380_s13 + $0xc0] sm:$0xff]  ;;  %v8025_v36 = vld [vmem:[#allocation79_spill] sm:$0xff] }
 0x2f3   : > { %v3288_v61 = vmul.f32 %v3256_v17, %v6931_v45  ;;  %v3320_v2 = vmul.f32 %v3223_v49, %v3223_v49  ;;  %vm3043_vm1 = vcmp.eq.f32.partialorder %v6396_v21, inf  ;;  %vm2499_vm2 = vcmp.eq.f32.partialorder %v6768_v27, inf }
 0x2f4   : > { %v2515_v46 = vsel %vm2513_vm0, %v2514_v44, %v2512_v28  ;;  %vm3057_vm3 = vcmp.eq.f32.partialorder %v6346_v35, 0.0  ;;  %v2308_v54 = vsel %vm2307_vm12, %v8020_v19, %v8023_v16  ;;  %v8024_v42 = vand.u32 2147483648, %v6346_v35 }
 0x2f5   : > { %v3352_v41 = vmul.f32 %v3288_v61, %v3288_v61  ;;  %v6979_v53 = vpop.eup %4142  ;;  %v3207_v55 = vmul.f32 %v6033_v30, %v2515_v46  ;;  %vm2309_vm4 = vcmp.eq.f32.partialorder %v8020_v19, 0.0  ;;  %v2852_v44 = vsel %vm2851_vm13, %v6503_v23, %v6706_v34  ;;  %v6999_v61 = vld [vmem:[%s4380_s13 + $0x38] sm:$0xff] }
 0x2f6   : > { %v3059_v58 = vsel %vm3057_vm3, %v8024_v42, %v3056_v43  ;;  %vm2295_vm5 = vcmp.eq.f32.partialorder %v8025_v36, inf  ;;  %v2469_v62 = vmul.f32 %v6979_v53, %v6916_v47  ;;  %v8026_v49 = vand.u32 2147483648, %v8020_v19  ;;  %v4145_v28 = vpop.eup %4144 }
 0x2f7   : > { %v3384_v20 = vadd.f32 %v3352_v41, %v3320_v2  ;;  %v3272_v35 = vmul.f32 %v6149_v14, %v3059_v58  ;;  %v3239_v43 = vmul.f32 %v3207_v55, %v6984_v59  ;;  %vm2853_vm6 = vcmp.eq.f32.partialorder %v6503_v23, 0.0 }
 0x2f8   : > { %v2311_v17 = vsel %vm2309_vm4, %v8026_v49, %v2308_v54  ;;  %4146 = vrsqrt.f32 %v6977_v63  ;;  %vm2839_vm7 = vcmp.eq.f32.partialorder %v6568_v1, inf  ;;  %v2470_v2 = vmul.f32 %v6979_v53, %v2469_v62  ;;  %v7017_v49 = vpop.xlane.xlu0 %2665 }
 0x2f9   : > { %v3190_v34 = vmul.f32 %v6033_v30, %v2311_v17  ;;  %3456 = vrot.lane.b32.xlu1 %v3384_v20, %s4283_s22  ;;  %v2773_v19 = vmul.f32 %v4145_v28, %v6935_v56  ;;  %v3304_v41 = vmul.f32 %v3272_v35, %v6984_v59  ;;  %v8027_v46 = vand.u32 2147483648, %v6503_v23 }
 0x2fa   : > { %v7013_v54 = vmul.f32 %v2969_v37, %v6772_v4  ;;  %v3336_v42 = vmul.f32 %v3239_v43, %v3239_v43  ;;  %v7020_v20 = vmul.f32 %v2801_v40, %v6788_v3  ;;  %v2471_v62 = vmul.f32 0.5, %v2470_v2 }
 0x2fb   : > { %v2855_v16 = vsel %vm2853_vm6, %v8027_v46, %v2852_v44  ;;  %v3222_v58 = vmul.f32 %v3190_v34, %v6999_v61  ;;  %v2774_v17 = vmul.f32 %v4145_v28, %v2773_v19  ;;  %v3368_v22 = vmul.f32 %v3304_v41, %v3304_v41 }
 0x2fc   : > { %v3255_v55 = vmul.f32 %v6149_v14, %v2855_v16  ;;  %v2486_v35 = vmul.f32 %v2485_v6, %v6818_v9  ;;  %v7024_v23 = vmul.f32 %v2957_v8, %v6832_v50  ;;  %v2788_v37 = vsub.f32 1.5, %v6956_v24  ;;  %v8028_v8 = vld [vmem:[#allocation46_spill] sm:$0xff] }
 0x2fd   : > { %v2775_v43 = vmul.f32 0.5, %v2774_v17  ;;  %v3400_v34 = vadd.f32 %v3368_v22, %v3336_v42  ;;  %v3319_v46 = vmul.f32 %v3222_v58, %v3222_v58  ;;  %4148 = vrsqrt.f32 %v7017_v49  ;;  %v7046_v42 = vpop.xlane.xlu2 %2178 }
 0x2fe   : > { %v3287_v44 = vmul.f32 %v3255_v55, %v6999_v61  ;;  %v7029_v16 = vpop.eup %4146  ;;  %vm2487_vm8 = vcmp.eq.f32.partialorder %v6818_v9, inf  ;;  %v2500_v6 = vsel %vm2499_vm2, %v6768_v27, %v6950_v25  ;;  %vm2501_vm9 = vcmp.eq.f32.partialorder %v6768_v27, 0.0  ;;  %v8029_v25 = vld [vmem:[#allocation82_spill] sm:$0xff] }
 0x2ff   : > { %v3044_v22 = vsel %vm3043_vm1, %v6396_v21, %v8028_v8  ;;  %v2472_v24 = vsub.f32 1.5, %v2471_v62  ;;  %v2776_v2 = vsub.f32 1.5, %v2775_v43  ;;  %3488 = vrot.lane.b32.xlu0 %v3400_v34, %s4283_s22  ;;  %v2457_v19 = vmul.f32 %v7029_v16, %v6977_v63  ;;  %v8030_v62 = vld [vmem:[#allocation84_spill] sm:$0xff] }
 0x300   : > { %v3351_v40 = vmul.f32 %v3287_v44, %v3287_v44  ;;  %v2503_v41 = vsel %vm2501_vm9, %v2502_v15, %v2500_v6  ;;  %vm3031_vm10 = vcmp.eq.f32.partialorder %v8029_v25, inf  ;;  %vm3045_vm11 = vcmp.eq.f32.partialorder %v6396_v21, 0.0  ;;  %v8031_v44 = vld [vmem:[#allocation72_spill] sm:$0xff] }
 0x301   : > { %v3206_v55 = vmul.f32 %v6033_v30, %v2503_v41  ;;  %v2296_v17 = vsel %vm2295_vm5, %v8025_v36, %v8030_v62  ;;  %vm2283_vm12 = vcmp.eq.f32.partialorder %v8031_v44, inf  ;;  %v2789_v43 = vmul.f32 %v6898_v13, %v2788_v37 }
 0x302   : > { %v3383_v58 = vadd.f32 %v3351_v40, %v3319_v46  ;;  %v2478_v27 = vand.u32 2147483648, %v6916_v47  ;;  %v2458_v15 = vmul.f32 %v7029_v16, %v2457_v19  ;;  %v8032_v34 = vand.u32 2147483648, %v6396_v21  ;;  %v7062_v40 = vld [vmem:[%s4380_s13 + $0xb8] sm:$0xff] }
 0x303   : > { %vm2827_vm13 = vcmp.eq.f32.partialorder %v6635_v29, inf  ;;  %v3238_v6 = vmul.f32 %v3206_v55, %v7062_v40  ;;  %vm2297_vm14 = vcmp.eq.f32.partialorder %v8025_v36, 0.0  ;;  %v2840_v13 = vsel %vm2839_vm7, %v6568_v1, %v6805_v18  ;;  %v7073_v37 = vpop.eup %4148  ;;  %v7080_v55 = vld [vmem:[%s4380_s13 + $0x30] sm:$0xff] }
 0x304   : > { %v3047_v46 = vsel %vm3045_vm11, %v8032_v34, %v3044_v22  ;;  %3454 = vrot.lane.b32.xlu2 %v3383_v58, %s4283_s22  ;;  %v2473_v21 = vmul.f32 %v6979_v53, %v2472_v24  ;;  %v2777_v22 = vmul.f32 %v4145_v28, %v2776_v2  ;;  %v2782_v19 = vand.u32 2147483648, %v6935_v56 }
 0x305   : > { %v3271_v8 = vmul.f32 %v6149_v14, %v3047_v46  ;;  %v8033_v41 = vand.u32 2147483648, %v8025_v36  ;;  %v3335_v34 = vmul.f32 %v3238_v6, %v3238_v6  ;;  %vm2841_vm15 = vcmp.eq.f32.partialorder %v6568_v1, 0.0 }
 0x306   : > { %v7086_v18 = vmul.f32 %v2789_v43, %v6845_v52  ;;  %v2459_v60 = vmul.f32 0.5, %v2458_v15  ;;  %v8034_v53 = vand.u32 2147483648, %v6568_v1  ;;  %4150 = vrsqrt.f32 %v7046_v42 }
 0x307   : > { %v2299_v58 = vsel %vm2297_vm14, %v8033_v41, %v2296_v17  ;;  %v3303_v62 = vmul.f32 %v3271_v8, %v7062_v40  ;;  %v2466_v36 = vand.u32 2147483648, %v6977_v63  ;;  %v2474_v6 = vmul.f32 %v2473_v21, %v6916_v47 }
 0x308   : > { %v3189_v46 = vmul.f32 %v6033_v30, %v2299_v58  ;;  %v2843_v28 = vsel %vm2841_vm15, %v8034_v53, %v2840_v13  ;;  %vm2475_vm0 = vcmp.eq.f32.partialorder %v6916_v47, inf  ;;  %v2761_v43 = vmul.f32 %v7073_v37, %v7017_v49  ;;  %v7114_v53 = vpop.xlane.xlu2 %2175 }
 0x309   : > { %v3367_v24 = vmul.f32 %v3303_v62, %v3303_v62  ;;  %v3254_v17 = vmul.f32 %v6149_v14, %v2843_v28  ;;  %v2770_v15 = vand.u32 2147483648, %v7017_v49  ;;  %v2488_v1 = vsel %vm2487_vm8, %v6818_v9, %v2486_v35  ;;  %v8036_v28 = vld [vmem:[#allocation78_spill] sm:$0xff] }
 0x30a   : > { %v3221_v2 = vmul.f32 %v3189_v46, %v7080_v55  ;;  %vm3019_vm1 = vcmp.eq.f32.partialorder %v6494_v0, inf  ;;  %v7104_v8 = vmul.f32 %v2777_v22, %v6935_v56  ;;  %vm2489_vm2 = vcmp.eq.f32.partialorder %v6818_v9, 0.0  ;;  %v8035_v46 = vld [vmem:[#allocation89_spill] sm:$0xff] }
 0x30b   : > { %v3399_v13 = vadd.f32 %v3367_v24, %v3335_v34  ;;  %v3286_v41 = vmul.f32 %v3254_v17, %v7080_v55  ;;  %v2460_v21 = vsub.f32 1.5, %v2459_v60  ;;  %v2491_v62 = vsel %vm2489_vm2, %v2490_v32, %v2488_v1  ;;  %v8037_v60 = vld [vmem:[#allocation80_spill] sm:$0xff]  ;;  %v7130_v1 = vld [vmem:[%s4380_s13 + $0xb0] sm:$0xff] }
 0x30c   : > { %v3318_v58 = vmul.f32 %v3221_v2, %v3221_v2  ;;  %v3032_v35 = vsel %vm3031_vm10, %v8029_v25, %v8035_v46  ;;  %vm3033_vm3 = vcmp.eq.f32.partialorder %v8029_v25, 0.0  ;;  %v3205_v34 = vmul.f32 %v6033_v30, %v2491_v62  ;;  %v7123_v32 = vpop.eup %4150 }
 0x30d   : > { %3486 = vrot.lane.b32.xlu1 %v3399_v13, %s4283_s22  ;;  %v3350_v22 = vmul.f32 %v3286_v41, %v3286_v41  ;;  %v2284_v9 = vsel %vm2283_vm12, %v8031_v44, %v8036_v28  ;;  %vm2271_vm4 = vcmp.eq.f32.partialorder %v8037_v60, inf  ;;  %v2762_v24 = vmul.f32 %v7073_v37, %v2761_v43 }
 0x30e   : > { %v8038_v2 = vand.u32 2147483648, %v8029_v25  ;;  %vm2285_vm5 = vcmp.eq.f32.partialorder %v8031_v44, 0.0  ;;  %v2828_v13 = vsel %vm2827_vm13, %v6635_v29, %v6862_v38  ;;  %vm2815_vm6 = vcmp.eq.f32.partialorder %v6718_v5, inf }
 0x30f   : > { %v3382_v41 = vadd.f32 %v3350_v22, %v3318_v58  ;;  %v2445_v62 = vmul.f32 %v7123_v32, %v7046_v42  ;;  %v3237_v43 = vmul.f32 %v3205_v34, %v7130_v1  ;;  %v2461_v46 = vmul.f32 %v7029_v16, %v2460_v21 }
 0x310   : > { %v3035_v17 = vsel %vm3033_vm3, %v8038_v2, %v3032_v35  ;;  %v8039_v35 = vand.u32 2147483648, %v8031_v44  ;;  %vm2829_vm7 = vcmp.eq.f32.partialorder %v6635_v29, 0.0  ;;  %4152 = vrsqrt.f32 %v7114_v53  ;;  %v7153_v2 = vld [vmem:[%s4380_s13 + $0x28] sm:$0xff] }
 0x311   : > { %v3270_v25 = vmul.f32 %v6149_v14, %v3035_v17  ;;  %3452 = vrot.lane.b32.xlu0 %v3382_v41, %s4283_s22  ;;  %v2446_v38 = vmul.f32 %v7123_v32, %v2445_v62  ;;  %v3334_v22 = vmul.f32 %v3237_v43, %v3237_v43  ;;  %v2831_v34 = vsel %vm2829_vm7, %v2830_v26, %v2828_v13  ;;  %v8040_v43 = vld [vmem:[#allocation42_spill] sm:$0xff] }
 0x312   : > { %v2287_v28 = vsel %vm2285_vm5, %v8039_v35, %v2284_v9  ;;  %v2763_v16 = vmul.f32 0.5, %v2762_v24  ;;  %v2454_v44 = vand.u32 2147483648, %v7046_v42  ;;  %v3253_v9 = vmul.f32 %v6149_v14, %v2831_v34 }
 0x313   : > { %v3302_v58 = vmul.f32 %v3270_v25, %v7130_v1  ;;  %v3188_v21 = vmul.f32 %v6033_v30, %v2287_v28  ;;  %vm3007_vm8 = vcmp.eq.f32.partialorder %v6546_v57, inf  ;;  %vm2463_vm9 = vcmp.eq.f32.partialorder %v6977_v63, inf }
 0x314   : > { %v2447_v17 = vmul.f32 0.5, %v2446_v38  ;;  %v2476_v29 = vsel %vm2475_vm0, %v6916_v47, %v2474_v6  ;;  %vm2477_vm10 = vcmp.eq.f32.partialorder %v6916_v47, 0.0  ;;  %v3285_v24 = vmul.f32 %v3253_v9, %v7153_v2  ;;  %v7181_v9 = vpop.xlane.xlu2 %2172 }
 0x315   : > { %v3366_v41 = vmul.f32 %v3302_v58, %v3302_v58  ;;  %v3220_v26 = vmul.f32 %v3188_v21, %v7153_v2  ;;  %v2479_v13 = vsel %vm2477_vm10, %v2478_v27, %v2476_v29  ;;  %v3020_v62 = vsel %vm3019_vm1, %v6494_v0, %v6703_v51  ;;  %v7179_v21 = vld [vmem:[%s4380_s13 + $0xa8] sm:$0xff] }
 0x316   : > { %vm2259_vm11 = vcmp.eq.f32.partialorder %v8040_v43, inf  ;;  %v2462_v25 = vmul.f32 %v2461_v46, %v6977_v63  ;;  %vm3021_vm12 = vcmp.eq.f32.partialorder %v6494_v0, 0.0  ;;  %v3204_v35 = vmul.f32 %v6033_v30, %v2479_v13  ;;  %v4153_v28 = vpop.eup %4152 }
 0x317   : > { %v3398_v6 = vadd.f32 %v3366_v41, %v3334_v22  ;;  %v2764_v38 = vsub.f32 1.5, %v2763_v16  ;;  %v3317_v58 = vmul.f32 %v3220_v26, %v3220_v26  ;;  %v3349_v34 = vmul.f32 %v3285_v24, %v3285_v24  ;;  %v8042_v16 = vld [vmem:[#allocation13_spill] sm:$0xff] }
 0x318   : > { %v8041_v47 = vand.u32 2147483648, %v6494_v0  ;;  %vm2803_vm13 = vcmp.eq.f32.partialorder %v6788_v3, inf  ;;  %v2433_v51 = vmul.f32 %v4153_v28, %v7114_v53  ;;  %v3236_v46 = vmul.f32 %v3204_v35, %v7179_v21 }
 0x319   : > { %3484 = vrot.lane.b32.xlu2 %v3398_v6, %s4283_s22  ;;  %v2272_v0 = vsel %vm2271_vm4, %v8037_v60, %v8042_v16  ;;  %v2448_v41 = vsub.f32 1.5, %v2447_v17  ;;  %v3381_v29 = vadd.f32 %v3349_v34, %v3317_v58  ;;  %vm2273_vm14 = vcmp.eq.f32.partialorder %v8037_v60, 0.0 }
 0x31a   : > { %v3023_v27 = vsel %vm3021_vm12, %v8041_v47, %v3020_v62  ;;  %v2816_v26 = vsel %vm2815_vm6, %v6718_v5, %v6938_v12  ;;  %v2434_v24 = vmul.f32 %v4153_v28, %v2433_v51  ;;  %v3333_v62 = vmul.f32 %v3236_v46, %v3236_v46  ;;  %v7208_v47 = vld [vmem:[%s4380_s13 + $0x20] sm:$0xff] }
 0x31b   : > { %v3269_v22 = vmul.f32 %v6149_v14, %v3023_v27  ;;  %vm2817_vm15 = vcmp.eq.f32.partialorder %v6718_v5, 0.0  ;;  %v7200_v6 = vmul.f32 %v7073_v37, %v2764_v38  ;;  %3450 = vrot.lane.b32.xlu1 %v3381_v29, %s4283_s22  ;;  %v8043_v17 = vand.u32 2147483648, %v8037_v60 }
 0x31c   : > { %v8044_v58 = vand.u32 2147483648, %v6718_v5  ;;  %4154 = vrsqrt.f32 %v7181_v9  ;;  %v2435_v12 = vmul.f32 0.5, %v2434_v24  ;;  %v2449_v37 = vmul.f32 %v7123_v32, %v2448_v41 }
 0x31d   : > { %v3301_v13 = vmul.f32 %v3269_v22, %v7179_v21  ;;  %v2275_v35 = vsel %vm2273_vm14, %v8043_v17, %v2272_v0  ;;  %vm2451_vm0 = vcmp.eq.f32.partialorder %v7046_v42, inf  ;;  %v2464_v60 = vsel %vm2463_vm9, %v6977_v63, %v2462_v25  ;;  %v8045_v25 = vld [vmem:[#allocation86_spill] sm:$0xff] }
 0x31e   : > { %v2819_v34 = vsel %vm2817_vm15, %v8044_v58, %v2816_v26  ;;  %v3187_v51 = vmul.f32 %v6033_v30, %v2275_v35  ;;  %vm2465_vm1 = vcmp.eq.f32.partialorder %v6977_v63, 0.0  ;;  %v3008_v5 = vsel %vm3007_vm8, %v6546_v57, %v6798_v7  ;;  %v8046_v7 = vld [vmem:[#allocation41_spill] sm:$0xff] }
 0x31f   : > { %v3365_v27 = vmul.f32 %v3301_v13, %v3301_v13  ;;  %v3252_v46 = vmul.f32 %v6149_v14, %v2819_v34  ;;  %vm2995_vm2 = vcmp.eq.f32.partialorder %v6614_v10, inf  ;;  %v2436_v38 = vsub.f32 1.5, %v2435_v12  ;;  %v7240_v13 = vld [vmem:[%s4380_s13 + $0xa0] sm:$0xff]  ;;  %v7250_v12 = vpop.xlane.xlu2 %2169 }
 0x320   : > { %v3219_v32 = vmul.f32 %v3187_v51, %v7208_v47  ;;  %v2467_v0 = vsel %vm2465_vm1, %v2466_v36, %v2464_v60  ;;  %vm3009_vm3 = vcmp.eq.f32.partialorder %v6546_v57, 0.0  ;;  %v2260_v41 = vsel %vm2259_vm11, %v8040_v43, %v8045_v25 }
 0x321   : > { %v3397_v22 = vadd.f32 %v3365_v27, %v3333_v62  ;;  %v3284_v16 = vmul.f32 %v3252_v46, %v7208_v47  ;;  %vm2261_vm4 = vcmp.eq.f32.partialorder %v8040_v43, 0.0  ;;  %vm2247_vm5 = vcmp.eq.f32.partialorder %v8046_v7, inf  ;;  %v7256_v46 = vld [vmem:[%s4380_s13 + $0x18] sm:$0xff] }
 0x322   : > { %vm2791_vm6 = vcmp.eq.f32.partialorder %v6845_v52, inf  ;;  %v2437_v29 = vmul.f32 %v4153_v28, %v2436_v38  ;;  %v3316_v26 = vmul.f32 %v3219_v32, %v3219_v32  ;;  %v8047_v36 = vand.u32 2147483648, %v6546_v57  ;;  %v4155_v62 = vpop.eup %4154 }
 0x323   : > { %3482 = vrot.lane.b32.xlu0 %v3397_v22, %s4283_s22  ;;  %v3348_v63 = vmul.f32 %v3284_v16, %v3284_v16  ;;  %v3203_v17 = vmul.f32 %v6033_v30, %v2467_v0  ;;  %v8048_v58 = vand.u32 2147483648, %v8040_v43  ;;  %v2804_v28 = vsel %vm2803_vm13, %v6788_v3, %v7020_v20 }
 0x324   : > { %v3011_v24 = vsel %vm3009_vm3, %v8047_v36, %v3008_v5  ;;  %v2450_v57 = vmul.f32 %v2449_v37, %v7046_v42  ;;  %v2421_v51 = vmul.f32 %v4155_v62, %v7181_v9  ;;  %vm2805_vm7 = vcmp.eq.f32.partialorder %v6788_v3, 0.0 }
 0x325   : > { %v3268_v35 = vmul.f32 %v6149_v14, %v3011_v24  ;;  %v2263_v34 = vsel %vm2261_vm4, %v8048_v58, %v2260_v41  ;;  %v3380_v27 = vadd.f32 %v3348_v63, %v3316_v26  ;;  %v3235_v60 = vmul.f32 %v3203_v17, %v7240_v13  ;;  %v8049_v41 = vld [vmem:[#allocation40_spill] sm:$0xff] }
 0x326   : > { %v2807_v5 = vsel %vm2805_vm7, %v2806_v39, %v2804_v28  ;;  %v3186_v20 = vmul.f32 %v6033_v30, %v2263_v34  ;;  %vm2439_vm8 = vcmp.eq.f32.partialorder %v7114_v53, inf  ;;  %v2422_v37 = vmul.f32 %v4155_v62, %v2421_v51 }
 0x327   : > { %v3300_v43 = vmul.f32 %v3268_v35, %v7240_v13  ;;  %3448 = vrot.lane.b32.xlu2 %v3380_v27, %s4283_s22  ;;  %v3251_v38 = vmul.f32 %v6149_v14, %v2807_v5  ;;  %4156 = vrsqrt.f32 %v7250_v12  ;;  %vm2983_vm9 = vcmp.eq.f32.partialorder %v6700_v31, inf }
 0x328   : > { %v2438_v22 = vmul.f32 %v2437_v29, %v7114_v53  ;;  %v3332_v32 = vmul.f32 %v3235_v60, %v3235_v60  ;;  %v3218_v3 = vmul.f32 %v3186_v20, %v7256_v46  ;;  %v2423_v39 = vmul.f32 0.5, %v2422_v37 }
 0x329   : > { %v3364_v16 = vmul.f32 %v3300_v43, %v3300_v43  ;;  %v3283_v0 = vmul.f32 %v3251_v38, %v7256_v46  ;;  %v2452_v25 = vsel %vm2451_vm0, %v7046_v42, %v2450_v57  ;;  %vm2453_vm10 = vcmp.eq.f32.partialorder %v7046_v42, 0.0  ;;  %v7289_v42 = vld [vmem:[%s4380_s13 + $0x98] sm:$0xff] }
 0x32a   : > { %vm2235_vm11 = vcmp.eq.f32.partialorder %v8049_v41, inf  ;;  %v3315_v63 = vmul.f32 %v3218_v3, %v3218_v3  ;;  %v2455_v29 = vsel %vm2453_vm10, %v2454_v44, %v2452_v25  ;;  %v2996_v36 = vsel %vm2995_vm2, %v6614_v10, %v6850_v11  ;;  %v8051_v44 = vld [vmem:[#allocation44_spill] sm:$0xff]  ;;  %v7313_v3 = vld [vmem:[%s4380_s13 + $0x10] sm:$0xff] }
 0x32b   : > { %v3396_v26 = vadd.f32 %v3364_v16, %v3332_v32  ;;  %v2424_v24 = vsub.f32 1.5, %v2423_v39  ;;  %v3347_v17 = vmul.f32 %v3283_v0, %v3283_v0  ;;  %vm2997_vm12 = vcmp.eq.f32.partialorder %v6614_v10, 0.0 }
 0x32c   : > { %v3202_v35 = vmul.f32 %v6033_v30, %v2455_v29  ;;  %vm2779_vm13 = vcmp.eq.f32.partialorder %v6935_v56, inf  ;;  %v8050_v58 = vand.u32 2147483648, %v6614_v10  ;;  %v2248_v11 = vsel %vm2247_vm5, %v8046_v7, %v8051_v44  ;;  %v8056_v44 = vld [vmem:[#allocation77_spill] sm:$0xff] }
 0x32d   : > { %3480 = vrot.lane.b32.xlu1 %v3396_v26, %s4283_s22  ;;  %vm2249_vm14 = vcmp.eq.f32.partialorder %v8046_v7, 0.0  ;;  %v2792_v28 = vsel %vm2791_vm6, %v6845_v52, %v7086_v18  ;;  %v4157_v57 = vpop.eup %4156  ;;  %v2425_v27 = vmul.f32 %v4155_v62, %v2424_v24  ;;  %v3379_v51 = vadd.f32 %v3347_v17, %v3315_v63  ;;  %v8054_v63 = vld [vmem:[#allocation69_spill] sm:$0xff]  ;;  %v7330_v17 = vpop.permute.xlu2 %3470 }
 0x32e   : > { %v2999_v34 = vsel %vm2997_vm12, %v8050_v58, %v2996_v36  ;;  %v3234_v10 = vmul.f32 %v3202_v35, %v7289_v42  ;;  %v2442_v43 = vand.u32 2147483648, %v7114_v53  ;;  %v2409_v5 = vmul.f32 %v4157_v57, %v7250_v12 }
 0x32f   : > { %v3267_v60 = vmul.f32 %v6149_v14, %v2999_v34  ;;  %v8052_v20 = vand.u32 2147483648, %v8046_v7  ;;  %vm2793_vm15 = vcmp.eq.f32.partialorder %v6845_v52, 0.0  ;;  %v2426_v38 = vmul.f32 %v2425_v27, %v7181_v9  ;;  %3446 = vrot.lane.b32.xlu0 %v3379_v51, %s4283_s22  ;;  %v7336_v34 = vld [vmem:[%s4380_s13 + $0x90] sm:$0xff] }
 0x330   : > { %v3331_v62 = vmul.f32 %v3234_v10, %v3234_v10  ;;  %v8053_v32 = vand.u32 2147483648, %v6845_v52  ;;  %vm2971_vm0 = vcmp.eq.f32.partialorder %v6772_v4, inf  ;;  %v2410_v39 = vmul.f32 %v4157_v57, %v2409_v5 }
 0x331   : > { %v2251_v37 = vsel %vm2249_vm14, %v8052_v20, %v2248_v11  ;;  %v3299_v18 = vmul.f32 %v3267_v60, %v7289_v42  ;;  %v2440_v25 = vsel %vm2439_vm8, %v7114_v53, %v2438_v22  ;;  %vm2441_vm1 = vcmp.eq.f32.partialorder %v7114_v53, 0.0 }
 0x332   : > { %v2795_v16 = vsel %vm2793_vm15, %v8053_v32, %v2792_v28  ;;  %v3185_v7 = vmul.f32 %v6033_v30, %v2251_v37  ;;  %v2984_v52 = vsel %vm2983_vm9, %v6700_v31, %v6903_v48  ;;  %vm2985_vm2 = vcmp.eq.f32.partialorder %v6700_v31, 0.0  ;;  %v7343_v28 = vpop.permute.xlu0 %3502  ;;  %v7358_v32 = vld [vmem:[%s4380_s13 + $0x8] sm:$0xff] }
 0x333   : > { %v3250_v0 = vmul.f32 %v6149_v14, %v2795_v16  ;;  %v3363_v26 = vmul.f32 %v3299_v18, %v3299_v18  ;;  %vm2223_vm3 = vcmp.eq.f32.partialorder %v8054_v63, inf  ;;  %v2411_v29 = vmul.f32 0.5, %v2410_v39 }
 0x334   : > { %v3217_v36 = vmul.f32 %v3185_v7, %v7313_v3  ;;  %v2443_v22 = vsel %vm2441_vm1, %v2442_v43, %v2440_v25  ;;  %vm2767_vm4 = vcmp.eq.f32.partialorder %v7017_v49, inf  ;;  %v8055_v35 = vand.u32 2147483648, %v6700_v31 }
 0x335   : > { %v3282_v24 = vmul.f32 %v3250_v0, %v7313_v3  ;;  %v3395_v53 = vadd.f32 %v3363_v26, %v3331_v62  ;;  %v3201_v48 = vmul.f32 %v6033_v30, %v2443_v22  ;;  %v2236_v11 = vsel %vm2235_vm11, %v8049_v41, %v8056_v44  ;;  %v7386_v22 = vpop.permute.xlu2 %3466 }
 0x336   : > { %v2987_v58 = vsel %vm2985_vm2, %v8055_v35, %v2984_v52  ;;  %v2412_v27 = vsub.f32 1.5, %v2411_v29  ;;  %v3314_v51 = vmul.f32 %v3217_v36, %v3217_v36  ;;  %vm2237_vm5 = vcmp.eq.f32.partialorder %v8049_v41, 0.0 }
 0x337   : > { %v3346_v10 = vmul.f32 %v3282_v24, %v3282_v24  ;;  %v3266_v60 = vmul.f32 %v6149_v14, %v2987_v58  ;;  %3478 = vrot.lane.b32.xlu2 %v3395_v53, %s4283_s22  ;;  %v3233_v31 = vmul.f32 %v3201_v48, %v7336_v34  ;;  %v2780_v43 = vsel %vm2779_vm13, %v6935_v56, %v7104_v8  ;;  %v7391_v58 = vld [vmem:[%s4380_s13 + $0x88] sm:$0xff] }
 0x338   : > { %vm2781_vm6 = vcmp.eq.f32.partialorder %v6935_v56, 0.0  ;;  %v2413_v5 = vmul.f32 %v4157_v57, %v2412_v27  ;;  %v8057_v18 = vand.u32 2147483648, %v8049_v41  ;;  %v2766_v16 = vmul.f32 %v7200_v6, %v7017_v49 }
 0x339   : > { %v3378_v20 = vadd.f32 %v3346_v10, %v3314_v51  ;;  %v3298_v37 = vmul.f32 %v3266_v60, %v7336_v34  ;;  %v3330_v39 = vmul.f32 %v3233_v31, %v3233_v31  ;;  %v2783_v7 = vsel %vm2781_vm6, %v2782_v19, %v2780_v43  ;;  %v7403_v10 = vld [vmem:[%s4380_s13] sm:$0xff] }
 0x33a   : > { %v2239_v62 = vsel %vm2237_vm5, %v8057_v18, %v2236_v11  ;;  %vm2959_vm7 = vcmp.eq.f32.partialorder %v6832_v50, inf  ;;  %vm2427_vm8 = vcmp.eq.f32.partialorder %v7181_v9, inf  ;;  %v2430_v57 = vand.u32 2147483648, %v7181_v9  ;;  %v3469_v18 = vpop.permute.xlu1 %3468 }
 0x33b   : > { %v3184_v8 = vmul.f32 %v6033_v30, %v2239_v62  ;;  %3444 = vrot.lane.b32.xlu1 %v3378_v20, %s4283_s22  ;;  %v3362_v41 = vmul.f32 %v3298_v37, %v3298_v37  ;;  %v3249_v0 = vmul.f32 %v6149_v14, %v2783_v7  ;;  %v2428_v6 = vsel %vm2427_vm8, %v7181_v9, %v2426_v38  ;;  %v8058_v38 = vld [vmem:[#allocation85_spill] sm:$0xff] }
 0x33c   : > { %vm2429_vm9 = vcmp.eq.f32.partialorder %v7181_v9, 0.0  ;;  %v2972_v56 = vsel %vm2971_vm0, %v6772_v4, %v7013_v54  ;;  %v2414_v19 = vmul.f32 %v2413_v5, %v7250_v12  ;;  %vm2973_vm10 = vcmp.eq.f32.partialorder %v6772_v4, 0.0 }
 0x33d   : > { %v3216_v25 = vmul.f32 %v3184_v8, %v7358_v32  ;;  %v3394_v26 = vadd.f32 %v3362_v41, %v3330_v39  ;;  %v3281_v52 = vmul.f32 %v3249_v0, %v7358_v32  ;;  %v2431_v29 = vsel %vm2429_vm9, %v2430_v57, %v2428_v6  ;;  %v7425_v6 = vld [vmem:[%s4380_s13 + $0x80] sm:$0xff] }
 0x33e   : > { %v3200_v24 = vmul.f32 %v6033_v30, %v2431_v29  ;;  %v2224_v9 = vsel %vm2223_vm3, %v8054_v63, %v8058_v38  ;;  %v8059_v53 = vand.u32 2147483648, %v6772_v4  ;;  %vm2225_vm11 = vcmp.eq.f32.partialorder %v8054_v63, 0.0  ;;  %v3501_v4 = vpop.permute.xlu0 %3500  ;;  %v4158_v29 = vld [vmem:[%s4380_s13 + $0xf8] sm:$0xff] }
 0x33f   : > { %v3313_v36 = vmul.f32 %v3216_v25, %v3216_v25  ;;  %3476 = vrot.lane.b32.xlu0 %v3394_v26, %s4283_s22  ;;  %v3345_v54 = vmul.f32 %v3281_v52, %v3281_v52  ;;  %v2768_v48 = vsel %vm2767_vm4, %v7017_v49, %v2766_v16  ;;  %v8060_v27 = vand.u32 2147483648, %v8054_v63 }
 0x340   : > { %v2975_v35 = vsel %vm2973_vm10, %v8059_v53, %v2972_v56  ;;  %v3232_v44 = vmul.f32 %v3200_v24, %v7391_v58  ;;  %vm2769_vm12 = vcmp.eq.f32.partialorder %v7017_v49, 0.0  ;;  %vm2415_vm13 = vcmp.eq.f32.partialorder %v7250_v12, inf  ;;  %v4159_v24 = vld [vmem:[%s4380_s13 + $0x70] sm:$0xff]  ;;  %v4161_v53 = vld [vmem:[%s4380_s13 + $0x78] sm:$0xff] }
 0x341   : > { %v3265_v11 = vmul.f32 %v6149_v14, %v2975_v35  ;;  %v2227_v51 = vsel %vm2225_vm11, %v8060_v27, %v2224_v9  ;;  %v3377_v60 = vadd.f32 %v3345_v54, %v3313_v36  ;;  %v2771_v31 = vsel %vm2769_vm12, %v2770_v15, %v2768_v48  ;;  %v4160_v9 = vld [vmem:[%s4380_s13 + $0xf0] sm:$0xff] }
 0x342   : > { %v3183_v43 = vmul.f32 %v6033_v30, %v2227_v51  ;;  %v2418_v5 = vand.u32 2147483648, %v7250_v12  ;;  %v3329_v37 = vmul.f32 %v3232_v44, %v3232_v44  ;;  %v3248_v63 = vmul.f32 %v6149_v14, %v2771_v31  ;;  %v3499_v48 = vpop.permute.xlu1 %3498  ;;  %v4164_v31 = vld [vmem:[%s4380_s13 + $0x68] sm:$0xff] }
 0x343   : > { %v3297_v20 = vmul.f32 %v3265_v11, %v7391_v58  ;;  %v2962_v62 = vand.u32 2147483648, %v6832_v50  ;;  %3442 = vrot.lane.b32.xlu2 %v3377_v60, %s4283_s22  ;;  %v2416_v49 = vsel %vm2415_vm13, %v7250_v12, %v2414_v19  ;;  %vm2417_vm14 = vcmp.eq.f32.partialorder %v7250_v12, 0.0  ;;  %v4163_v60 = vld [vmem:[%s4380_s13 + $0x60] sm:$0xff] }
 0x344   : > { %v3215_v16 = vmul.f32 %v3183_v43, %v7403_v10  ;;  %v3280_v39 = vmul.f32 %v3248_v63, %v7403_v10  ;;  %v2419_v7 = vsel %vm2417_vm14, %v2418_v5, %v2416_v49  ;;  %v2960_v8 = vsel %vm2959_vm7, %v6832_v50, %v7024_v23  ;;  %v4165_v5 = vld [vmem:[%s4380_s13 + $0xe0] sm:$0xff] }
 0x345   : > { %v3361_v15 = vmul.f32 %v3297_v20, %v3297_v20  ;;  %vm2961_vm15 = vcmp.eq.f32.partialorder %v6832_v50, 0.0  ;;  %v3199_v57 = vmul.f32 %v6033_v30, %v2419_v7  ;;  %v3497_v50 = vpop.permute.xlu2 %3496  ;;  %v3567_v36 = vmul.f32 %v4158_v29, %v7343_v28  ;;  %v4162_v28 = vld [vmem:[%s4380_s13 + $0xe8] sm:$0xff] }
 0x346   : > { %v3312_v0 = vmul.f32 %v3215_v16, %v3215_v16  ;;  %v3344_v25 = vmul.f32 %v3280_v39, %v3280_v39  ;;  %v2963_v12 = vsel %vm2961_vm15, %v2962_v62, %v2960_v8  ;;  %v3465_v26 = vpop.permute.xlu0 %3464  ;;  %v3550_v38 = vmul.f32 %v4159_v24, %v3469_v18  ;;  %v4166_v16 = vld [vmem:[%s4380_s13 + $0xd8] sm:$0xff] }
 0x347   : > { %v3393_v41 = vadd.f32 %v3361_v15, %v3329_v37  ;;  %v3231_v56 = vmul.f32 %v3199_v57, %v7425_v6  ;;  %v3264_v19 = vmul.f32 %v6149_v14, %v2963_v12  ;;  %v3566_v14 = vmul.f32 %v4160_v9, %v3501_v4  ;;  %v4167_v15 = vld [vmem:[%s4380_s13 + $0x58] sm:$0xff] }
 0x348   : > { %v3376_v23 = vadd.f32 %v3344_v25, %v3312_v0  ;;  %v3551_v35 = vmul.f32 %v4161_v53, %v7330_v17  ;;  %v3565_v51 = vmul.f32 %v4162_v28, %v3499_v48  ;;  %v3548_v4 = vmul.f32 %v4163_v60, %v3465_v26 }
 0x349   : > { %3474 = vrot.lane.b32.xlu1 %v3393_v41, %s4283_s22  ;;  %v3296_v30 = vmul.f32 %v3264_v19, %v7425_v6  ;;  %v3328_v52 = vmul.f32 %v3231_v56, %v3231_v56  ;;  %v3955_v27 = vpack.i.bf16 %v3566_v14, %v3550_v38  ;;  %v3549_v43 = vmul.f32 %v4164_v31, %v7386_v22  ;;  %v4168_v41 = vld [vmem:[%s4380_s13 + $0x48] sm:$0xff]  ;;  %v4169_v56 = vld [vmem:[%s4380_s13 + $0x50] sm:$0xff] }
 0x34a   : > { %3440 = vrot.lane.b32.xlu0 %v3376_v23, %s4283_s22  ;;  %v3950_v11 = vpack.i.bf16 %v3567_v36, %v3551_v35  ;;  %v3564_v17 = vmul.f32 %v4165_v5, %v3497_v50  ;;  %v3463_v62 = vpop.permute.xlu1 %3462  ;;  %v4170_v23 = vld [vmem:[%s4380_s13 + $0xd0] sm:$0xff]  ;;  %s3755_s13 = sshll.u32 %s209_s12, 4  ;;  %s3756_s13 = int_to_ptr.vmem [resolvable:$true] %s3755_s13 }
 0x34b   : > { %v3360_v54 = vmul.f32 %v3296_v30, %v3296_v30  ;;  %v3960_v37 = vpack.i.bf16 %v3565_v51, %v3549_v43  ;;  %v3547_v39 = vmul.f32 %v4167_v15, %v3463_v62 }
 0x34c   : > { %v3965_v18 = vpack.i.bf16 %v3564_v17, %v3548_v4 }
 0x34d   : > { %v3392_v44 = vadd.f32 %v3360_v54, %v3328_v52  ;;  %v3461_v63 = vpop.permute.xlu2 %3460 }
 0x34e   : > { %v3495_v20 = vpop.permute.xlu0 %3494  ;;  %v3546_v19 = vmul.f32 %v4169_v56, %v3461_v63 }
 0x34f   : > { %3472 = vrot.lane.b32.xlu2 %v3392_v44, %s4283_s22  ;;  %v3563_v49 = vmul.f32 %v4166_v16, %v3495_v20 }
 0x351   : > { %3951 = vrot.lane.b32.xlu1 %v3950_v11, %s4284_s27  ;;  %v3970_v7 = vpack.i.bf16 %v3563_v49, %v3547_v39 }
 0x352   : > { %3956 = vrot.lane.b32.xlu0 %v3955_v27, %s4284_s27 }
 0x355   : > { %v3491_v22 = vpop.permute.xlu2 %3490 }
 0x356   : > { %v3459_v8 = vpop.permute.xlu0 %3458  ;;  %v3561_v57 = vmul.f32 %v3491_v22, %v6895_v33 }
 0x357   : > { %3961 = vrot.lane.b32.xlu2 %v3960_v37, %s4284_s27  ;;  %v3545_v0 = vmul.f32 %v4168_v41, %v3459_v8 }
 0x359   : > { %3966 = vrot.lane.b32.xlu1 %v3965_v18, %s4284_s27  ;;  %v3980_v25 = vpack.i.bf16 %v3561_v57, %v3545_v0  ;;  %v3493_v12 = vpop.permute.xlu1 %3492 }
 0x35a   : > { %3971 = vrot.lane.b32.xlu0 %v3970_v7, %s4284_s27  ;;  %v3562_v26 = vmul.f32 %v4170_v23, %v3493_v12 }
 0x35c   : > { %v3975_v50 = vpack.i.bf16 %v3562_v26, %v3546_v19 }
 0x35e   : > { %v3455_v24 = vpop.permute.xlu2 %3454 }
 0x35f   : > { %3976 = vrot.lane.b32.xlu2 %v3975_v50, %s4284_s27  ;;  %v3543_v9 = vmul.f32 %v3455_v24, %v6999_v61 }
 0x361   : > { %3981 = vrot.lane.b32.xlu1 %v3980_v25, %s4284_s27 }
 0x36b   : > { %v3457_v30 = vpop.permute.xlu1 %3456 }
 0x36c   : > { %v3544_v29 = vmul.f32 %v3457_v30, %v6931_v45 }
 0x371   : > { %v3489_v52 = vpop.permute.xlu0 %3488 }
 0x372   : > { %v3560_v36 = vmul.f32 %v3489_v52, %v6984_v59 }
 0x373   : > { %v3485_v54 = vpop.permute.xlu2 %3484 }
 0x374   : > { %v3985_v33 = vpack.i.bf16 %v3560_v36, %v3544_v29  ;;  %v3558_v48 = vmul.f32 %v3485_v54, %v7130_v1 }
 0x376   : > { %3986 = vrot.lane.b32.xlu0 %v3985_v33, %s4284_s27 }
 0x37f   : > { %v3487_v38 = vpop.permute.xlu1 %3486 }
 0x380   : > { %v3559_v14 = vmul.f32 %v3487_v38, %v7062_v40 }
 0x381   : > { %v3449_v28 = vpop.permute.xlu2 %3448 }
 0x382   : > { %v3990_v53 = vpack.i.bf16 %v3559_v14, %v3543_v9  ;;  %v3540_v1 = vmul.f32 %v3449_v28, %v7208_v47 }
 0x383   : > { %v3453_v35 = vpop.permute.xlu0 %3452 }
 0x384   : > { %v3542_v44 = vmul.f32 %v3453_v35, %v7080_v55  ;;  %3991 = vrot.lane.b32.xlu2 %v3990_v53, %s4284_s27 }
 0x386   : > { %v3995_v45 = vpack.i.bf16 %v3558_v48, %v3542_v44 }
 0x388   : > { %3996 = vrot.lane.b32.xlu1 %v3995_v45, %s4284_s27 }
 0x38d   : > { %v3451_v59 = vpop.permute.xlu1 %3450 }
 0x38e   : > { %v3541_v27 = vmul.f32 %v3451_v59, %v7153_v2 }
 0x391   : > { %v3479_v60 = vpop.permute.xlu2 %3478 }
 0x392   : > { %v3555_v43 = vmul.f32 %v3479_v60, %v7289_v42 }
 0x395   : > { %v3483_v11 = vpop.permute.xlu0 %3482 }
 0x396   : > { %v3557_v61 = vmul.f32 %v3483_v11, %v7179_v21 }
 0x398   : > { %v4000_v40 = vpack.i.bf16 %v3557_v61, %v3541_v27 }
 0x39a   : > { %4001 = vrot.lane.b32.xlu0 %v4000_v40, %s4284_s27 }
 0x39d   : > { %v3443_v20 = vpop.permute.xlu2 %3442 }
 0x39e   : > { %v3537_v42 = vmul.f32 %v3443_v20, %v7358_v32 }
 0x39f   : > { %v3481_v51 = vpop.permute.xlu1 %3480 }
 0x3a0   : > { %v3556_v55 = vmul.f32 %v3481_v51, %v7240_v13 }
 0x3a1   : > { %v3447_v31 = vpop.permute.xlu0 %3446 }
 0x3a2   : > { %v4005_v4 = vpack.i.bf16 %v3556_v55, %v3540_v1  ;;  %v3539_v5 = vmul.f32 %v3447_v31, %v7256_v46 }
 0x3a4   : > { %4006 = vrot.lane.b32.xlu2 %v4005_v4, %s4284_s27  ;;  %v4010_v2 = vpack.i.bf16 %v3555_v43, %v3539_v5 }
 0x3a6   : > { %4011 = vrot.lane.b32.xlu1 %v4010_v2, %s4284_s27  ;;  %v4285_v2 = vmov 1.0  }
 0x3a9   : > { %v3473_v13 = vpop.permute.xlu2 %3472 }
 0x3aa   : > { %v3552_v16 = vmul.f32 %v3473_v13, %v7425_v6 }
 0x3ad   : > { %v3445_v21 = vpop.permute.xlu1 %3444 }
 0x3ae   : > { %v3538_v37 = vmul.f32 %v3445_v21, %v7313_v3 }
 0x3b1   : > { %v3477_v17 = vpop.permute.xlu0 %3476  ;;  %v3962_v22 = vpop.permute.xlu2 %3961 }
 0x3b2   : > { %v3554_v47 = vmul.f32 %v3477_v17, %v7336_v34  ;;  %v3963_v6 = vunpack.i.l.bf16 %v3962_v22  ;;  %v3964_v57 = vunpack.i.h.bf16 %v3962_v22 }
 0x3b4   : > { %v4015_v63 = vpack.i.bf16 %v3554_v47, %v3538_v37 }
 0x3b6   : > { %4016 = vrot.lane.b32.xlu0 %v4015_v63, %s4284_s27 }
 0x3b9   : > { %v3977_v25 = vpop.permute.xlu2 %3976 }
 0x3ba   : > { %v3978_v23 = vunpack.i.l.bf16 %v3977_v25  ;;  %v3979_v26 = vunpack.i.h.bf16 %v3977_v25 }
 0x3bb   : > { %v3475_v18 = vpop.permute.xlu1 %3474 }
 0x3bc   : > { %v3553_v46 = vmul.f32 %v3475_v18, %v7391_v58  ;;  %v3441_v62 = vpop.permute.xlu0 %3440 }
 0x3bd   : > { %v3536_v15 = vmul.f32 %v3441_v62, %v7403_v10 }
 0x3be   : > { %v4020_v49 = vpack.i.bf16 %v3553_v46, %v3537_v42 }
 0x3bf   : > { %v4025_v39 = vpack.i.bf16 %v3552_v16, %v3536_v15 }
 0x3c0   : > { %4021 = vrot.lane.b32.xlu2 %v4020_v49, %s4284_s27 }
 0x3c1   : > { %4026 = vrot.lane.b32.xlu1 %v4025_v39, %s4284_s27 }
 0x3c3   : > { %v3952_v3 = vpop.permute.xlu1 %3951 }
 0x3c4   : > { %v3953_v34 = vunpack.i.l.bf16 %v3952_v3  ;;  %v3954_v7 = vunpack.i.h.bf16 %v3952_v3  ;;  %v3957_v8 = vpop.permute.xlu0 %3956 }
 0x3c5   : > { %v3958_v32 = vunpack.i.l.bf16 %v3957_v8  ;;  %v3959_v58 = vunpack.i.h.bf16 %v3957_v8 }
 0x3c6   : > { %3696 = vmatpush.msra.mxu0 %v3953_v34  ;;  %3716 = vmatpush.msra.mxu1 %v3954_v7 }
 0x3c8   : > { %3697 = vmatpush.msra.mxu0 %v3958_v32  ;;  %3717 = vmatpush.msra.mxu1 %v3959_v58 }
 0x3ca   : > { %3698 = vmatpush.msra.mxu0 %v3963_v6  ;;  %3718 = vmatpush.msra.mxu1 %v3964_v57 }
 0x3cb   : > { %v3967_v10 = vpop.permute.xlu1 %3966 }
 0x3cc   : > { %v3968_v41 = vunpack.i.l.bf16 %v3967_v10  ;;  %v3969_v0 = vunpack.i.h.bf16 %v3967_v10  ;;  %v3972_v12 = vpop.permute.xlu0 %3971 }
 0x3cd   : > { %v3973_v56 = vunpack.i.l.bf16 %v3972_v12  ;;  %v3974_v19 = vunpack.i.h.bf16 %v3972_v12 }
 0x3ce   : > { %3699 = vmatpush.msra.mxu0 %v3968_v41  ;;  %3719 = vmatpush.msra.mxu1 %v3969_v0 }
 0x3d0   : > { %3700 = vmatpush.msra.mxu0 %v3973_v56  ;;  %3720 = vmatpush.msra.mxu1 %v3974_v19 }
 0x3d2   : > { %3701 = vmatpush.msra.mxu0 %v3978_v23  ;;  %3721 = vmatpush.msra.mxu1 %v3979_v26 }
 0x3d3   : > { %v3982_v50 = vpop.permute.xlu1 %3981 }
 0x3d4   : > { %v3983_v30 = vunpack.i.l.bf16 %v3982_v50  ;;  %v3984_v52 = vunpack.i.h.bf16 %v3982_v50 }
 0x3d6   : > { %3702 = vmatpush.msra.mxu0 %v3983_v30  ;;  %3722 = vmatpush.msra.mxu1 %v3984_v52 }
 0x3de   : > { %v3992_v29 = vpop.permute.xlu2 %3991 }
 0x3df   : > { %v3993_v38 = vunpack.i.l.bf16 %v3992_v29  ;;  %v3994_v9 = vunpack.i.h.bf16 %v3992_v29 }
 0x3e8   : > { %v3987_v36 = vpop.permute.xlu0 %3986 }
 0x3e9   : > { %v3988_v33 = vunpack.i.l.bf16 %v3987_v36  ;;  %v3989_v24 = vunpack.i.h.bf16 %v3987_v36 }
 0x3eb   : > { %3703 = vmatpush.msra.mxu0 %v3988_v33  ;;  %3723 = vmatpush.msra.mxu1 %v3989_v24 }
 0x3ed   : > { %3704 = vmatpush.msra.mxu0 %v3993_v38  ;;  %3724 = vmatpush.msra.mxu1 %v3994_v9 }
 0x3fa   : > { %v3997_v14 = vpop.permute.xlu1 %3996 }
 0x3fb   : > { %v3998_v54 = vunpack.i.l.bf16 %v3997_v14  ;;  %v3999_v53 = vunpack.i.h.bf16 %v3997_v14 }
 0x3fd   : > { %3705 = vmatpush.msra.mxu0 %v3998_v54  ;;  %3725 = vmatpush.msra.mxu1 %v3999_v53 }
 0x3fe   : > { %v4007_v35 = vpop.permute.xlu2 %4006 }
 0x3ff   : > { %v4008_v59 = vunpack.i.l.bf16 %v4007_v35  ;;  %v4009_v11 = vunpack.i.h.bf16 %v4007_v35 }
 0x40c   : > { %v4002_v48 = vpop.permute.xlu0 %4001 }
 0x40d   : > { %v4003_v44 = vunpack.i.l.bf16 %v4002_v48  ;;  %v4004_v45 = vunpack.i.h.bf16 %v4002_v48 }
 0x40f   : > { %3706 = vmatpush.msra.mxu0 %v4003_v44  ;;  %3726 = vmatpush.msra.mxu1 %v4004_v45 }
 0x411   : > { %3707 = vmatpush.msra.mxu0 %v4008_v59  ;;  %3727 = vmatpush.msra.mxu1 %v4009_v11 }
 0x418   : > { %v4012_v27 = vpop.permute.xlu1 %4011 }
 0x419   : > { %v4013_v61 = vunpack.i.l.bf16 %v4012_v27  ;;  %v4014_v28 = vunpack.i.h.bf16 %v4012_v27 }
 0x41a   : > { %v4022_v40 = vpop.permute.xlu2 %4021 }
 0x41b   : > { %3708 = vmatpush.msra.mxu0 %v4013_v61  ;;  %3728 = vmatpush.msra.mxu1 %v4014_v28  ;;  %v4024_v55 = vunpack.i.h.bf16 %v4022_v40  ;;  %v4023_v4 = vunpack.i.l.bf16 %v4022_v40 }
 0x428   : > { %v4017_v51 = vpop.permute.xlu0 %4016 }
 0x429   : > { %v4019_v1 = vunpack.i.h.bf16 %v4017_v51  ;;  %v4018_v60 = vunpack.i.l.bf16 %v4017_v51 }
 0x42b   : > { %3709 = vmatpush.msra.mxu0 %v4018_v60  ;;  %3729 = vmatpush.msra.mxu1 %v4019_v1 }
 0x42d   : > { %3710 = vmatpush.msra.mxu0 %v4023_v4  ;;  %3730 = vmatpush.msra.mxu1 %v4024_v55 }
 0x433   : > { %v4027_v31 = vpop.permute.xlu1 %4026 }
 0x434   : > { %v4029_v43 = vunpack.i.h.bf16 %v4027_v31  ;;  %v4028_v5 = vunpack.i.l.bf16 %v4027_v31 }
 0x436   : > { %3711 = vmatpush.msra.mxu0 %v4028_v5  ;;  %3731 = vmatpush.msra.mxu1 %v4029_v43 }
 0x437   : > { %3712 = vmatmul.f32.vlgmr.msra.gmra.mxu0 %v4285_v2  ;;  %3732 = vmatmul.f32.vlgmr.msra.gmra.mxu1 %v4285_v2 }
 0x4b4   : > { %v3713_v21 = vpop.f32.mrf.mxu0  ;;  %v3733_v17 = vpop.f32.mrf.mxu1 }
 0x4b5   : > { %v3734_v20 = vadd.f32 %v3733_v17, %v3713_v21 }
 0x4b7   : > { %3872 = vpush %v3734_v20 }
 0x4e8   : > { %s3873_s15 = spop %3872 }
 0x4e9   : > { %v3738_v37 = vstv %s3873_s15 }
 0x4ea   : > { %3740 = vst [vmem:[%s209_s12] sm:$0xff] %v3738_v37 }
 0x4eb   : > { %4222 = shalt.err (!%p4219_p7)
}
 0x4ec   : > { %3874 = dma.vmem_to_hbm [thread:$0]  (%p4357_p4), %s3756_s13, 128, %s3758_s14, %s3742_s16  }
 0x4ed PF: > { %p3880_p9 = scmp.ge.s32.totalorder %s4275_s26, 2  ;;  %s3769_s27 = sand.u32 1, %s4255_s23  }
 0x4ee   : > { %s3770_s28 = scalar_lea.sflag [#allocation8], %s3769_s27 }
 0x4ef   : > { %p3877_p10 = pnand %p3880_p9, %p4364_p8 }
 0x4f1   : > { %p3878_p11 = pneg %p3877_p10 }
 0x4f3   : > { %4250 = dma.done.wait (%p3878_p11), %s3770_s28, 128  }
 0x4f4   : > { %4252 = vsyncadd (%p3878_p11), %s3770_s28, 4294967168  ;;  %s30_s26 = sadd.s32 1, %s4275_s26   ;;  %s8061_s23 = smov %s4259_s24 }
 0x4f5   : > { %p27_p12 = scmp.ge.s32.totalorder %s30_s26, 4   ;;  %s8062_s24 = smov %s4263_s0 }
 0x4f6   : > { %s8063_s0 = smov %s4370_s8  ;;  %s8064_s25 = smov %s4271_s1 }
 0x4f7   : > { %s8065_s1 = smov %s8067_s29  ;;  %29 = sbr.rel (!%p27_p12) target bundleno = 11 (0xb), region = 77 }
 0x4fc   :  { %3776 = vsyncpa [#allocation8], 1 }
 0x4fd   :  { %3778 = vsyncpa [#allocation8 + $0x1], 1 }

</bundles_post_ra>
